<compile_context>
chip_gen: v6e
topology: v6e:2x2x1
jax: 0.10.0
libtpu: 0.0.40
codegen_flags: <defaults>
</compile_context>

<pallas_src>
import functools

import jax
import jax.numpy as jnp
from jax.experimental import pallas as pl
from jax.experimental.pallas import tpu as pltpu

KSIZE = 5
PAD = 2
C_IN = 1      # conv1 in channels
C_HID = 4     # conv1 out channels / deconv2 in channels
C_OUT = 1     # deconv2 out channels


def _round_up(n, m):
    return ((n + m - 1) // m) * m


def fused_autoencoder_kernel(x_ref, w1_ref, b1_ref, w2_ref, b2_ref,
                             o_ref, hid_s, *, H, W, accw, emb_off):
    """Fused conv1+ReLU -> deconv2(as flipped conv)+ReLU, direct VPU accumulation.

    Layout: each batch element's zero-padded image is flattened at padded width
    Wp = W+4, so tap (kh, kw) of every output pixel is the contiguous lane
    slice [kh*Wp+kw : kh*Wp+kw+accw).  Batch elements are stacked on the
    sublane axis, so one FMA covers the whole per-step batch slab.

    x_ref:  (1, Bblk, L)      padded input, flattened, lane-padded with zeros (VMEM)
    w1_ref: (4, 25)  SMEM     conv1 weight, taps ordered kh*5+kw
    b1_ref: (4,)     SMEM
    w2_ref: (4, 25)  SMEM     deconv-as-conv weight, per input channel ci
    b2_ref: (1,)     SMEM
    o_ref:  (1, Bblk, accw)   output in padded-width layout (lane-dense, 384 wide)
    hid_s:  VMEM (4, Bblk, L_hid)  zero-padded hidden activation scratch
    """
    Wp = W + 2 * PAD
    bsz = x_ref.shape[1]
    L_hid = hid_s.shape[2]

    # Valid-column mask for the padded-width flat layout, built from iota and
    # compares only (columns w' >= W of each flattened row are cross-row
    # garbage; columns >= H*Wp are lane padding).
    col = jax.lax.broadcasted_iota(jnp.int32, (1, accw), 1)
    valid = col < W                                   # row 0
    for r in range(1, H):
        lo = r * Wp
        valid = jnp.logical_or(valid,
                               jnp.logical_and(col >= lo, col < lo + W))

    # ---- stage 1: conv1 (1->4, 5x5, pad 2) + ReLU ----
    # 25 tap loads, 4x25 scalar-broadcast FMAs; 4 independent accumulator chains.
    acc1 = [jnp.full((bsz, accw), b1_ref[co], jnp.float32) for co in range(C_HID)]
    for kh in range(KSIZE):
        for kw in range(KSIZE):
            t = kh * KSIZE + kw
            off = kh * Wp + kw
            xs = x_ref[0, :, off:off + accw]          # (Bblk, accw)
            for co in range(C_HID):
                acc1[co] = acc1[co] + w1_ref[co, t] * xs

    # Embed masked activations into the zero "same"-padded hidden scratch.
    # Activation is written at a 128-aligned offset (unmasked lane-dense store);
    # only head/tail of the scratch are zeroed (aligned stores).  The masked
    # garbage columns land exactly on pad positions, so they stay zero.
    hid_s[:, :, :emb_off] = jnp.zeros((C_HID, bsz, emb_off), jnp.float32)
    if emb_off + accw < L_hid:
        hid_s[:, :, emb_off + accw:] = jnp.zeros(
            (C_HID, bsz, L_hid - emb_off - accw), jnp.float32)
    for co in range(C_HID):
        hid_s[co, :, emb_off:emb_off + accw] = jnp.where(
            valid, jnp.maximum(acc1[co], 0.0), 0.0)

    # ---- stage 2: deconv2 as flipped-kernel conv (4->1, 5x5, pad 2) + ReLU ----
    # Padded-hidden flat index q lives at lane emb_off + q - (2*Wp+2).
    base = emb_off - (2 * Wp + 2)
    acc2 = jnp.full((bsz, accw), b2_ref[0], jnp.float32)
    for ci in range(C_HID):
        part = None
        for kh in range(KSIZE):
            for kw in range(KSIZE):
                off = base + kh * Wp + kw
                term = w2_ref[ci, kh * KSIZE + kw] * hid_s[ci, :, off:off + accw]
                part = term if part is None else part + term
        acc2 = acc2 + part
    o_ref[0] = jnp.maximum(acc2, 0.0)                 # lane-dense (Bblk, accw)


def init_params(key):
    """Deterministic kaiming_uniform-style init matching the module's shapes."""
    k1, k2, k3, k4 = jax.random.split(key, 4)
    fan_in1 = C_IN * KSIZE * KSIZE
    bound1 = jnp.sqrt(2.0) * jnp.sqrt(3.0 / fan_in1)
    w1 = jax.random.uniform(k1, (C_HID, C_IN, KSIZE, KSIZE), jnp.float32,
                            -bound1, bound1)
    b1 = jax.random.uniform(k2, (C_HID,), jnp.float32,
                            -1.0 / jnp.sqrt(fan_in1), 1.0 / jnp.sqrt(fan_in1))
    fan_in2 = C_OUT * KSIZE * KSIZE
    bound2 = jnp.sqrt(2.0) * jnp.sqrt(3.0 / fan_in2)
    w2t = jax.random.uniform(k3, (C_HID, C_OUT, KSIZE, KSIZE), jnp.float32,
                             -bound2, bound2)
    b2 = jax.random.uniform(k4, (C_OUT,), jnp.float32,
                            -1.0 / jnp.sqrt(fan_in2), 1.0 / jnp.sqrt(fan_in2))
    return w1, b1, w2t, b2


def prepare_params(params):
    """One-time weight transform (outside the per-forward path)."""
    w1, b1, w2t, b2 = params
    w1_mat = w1.reshape(C_HID, C_IN * KSIZE * KSIZE)               # (4, 25)
    # stride-1 ConvTranspose2d(pad=2) == conv(pad=K-1-2=2) with spatially
    # flipped kernel and in/out channels swapped; C_OUT == 1, so keep the
    # per-input-channel 5x5 taps of the single output channel.
    w2_mat = jnp.flip(w2t, axis=(-2, -1))[:, 0, :, :].reshape(
        C_HID, KSIZE * KSIZE)                                      # (4, 25)
    return w1_mat, b1, w2_mat, b2


def _choose_batch_block(batch):
    """Per-grid-step batch: fold the whole batch into one step on single-TC
    chips (v5e/v6e); split it across the two TensorCores on v4/v5p/v7x."""
    kind = ""
    try:
        kind = jax.devices()[0].device_kind.lower()
    except Exception:
        pass
    dual_tc = any(tag in kind for tag in ("v4", "v5p", "v7", "7x"))
    if dual_tc and batch % 2 == 0:
        return batch // 2
    return batch


@functools.partial(jax.jit, static_argnames=("batch_block",))
def _forward_impl(x, w1_mat, b1_vec, w2_mat, b2_vec, *, batch_block):
    B, C, H, W = x.shape
    assert C == C_IN
    assert B % batch_block == 0
    G = B // batch_block

    Hp, Wp = H + 2 * PAD, W + 2 * PAD
    HWp = H * Wp
    ACCW = _round_up(HWp, 128)                         # lane-dense accumulation/output width
    # Max stage-1 tap read = (K-1)*Wp + (K-1) + ACCW; lane-pad input to cover it.
    L = _round_up((KSIZE - 1) * Wp + (KSIZE - 1) + ACCW, 128)
    EMB = _round_up(2 * Wp + 2, 128)                   # 128-aligned hidden embed offset
    L_HID = _round_up(EMB + ACCW + 2 * Wp + 2, 128)    # covers max stage-2 tap read

    xpad = jnp.pad(x, ((0, 0), (0, 0), (PAD, PAD), (PAD, PAD)))     # (B,1,Hp,Wp)
    xflat = jnp.pad(xpad.reshape(B, Hp * Wp), ((0, 0), (0, L - Hp * Wp)))
    xflat = xflat.reshape(G, batch_block, L)

    kernel = functools.partial(fused_autoencoder_kernel,
                               H=H, W=W, accw=ACCW, emb_off=EMB)

    out = pl.pallas_call(
        kernel,
        out_shape=jax.ShapeDtypeStruct((G, batch_block, ACCW), jnp.float32),
        grid=(G,),
        in_specs=[
            pl.BlockSpec((1, batch_block, L), lambda b: (b, 0, 0)),
            pl.BlockSpec(memory_space=pltpu.MemorySpace.SMEM),   # w1 (4,25)
            pl.BlockSpec(memory_space=pltpu.MemorySpace.SMEM),   # b1 (4,)
            pl.BlockSpec(memory_space=pltpu.MemorySpace.SMEM),   # w2 (4,25)
            pl.BlockSpec(memory_space=pltpu.MemorySpace.SMEM),   # b2 (1,)
        ],
        out_specs=pl.BlockSpec((1, batch_block, ACCW), lambda b: (b, 0, 0)),
        scratch_shapes=[
            pltpu.VMEM((C_HID, batch_block, L_HID), jnp.float32),  # padded hidden
        ],
        compiler_params=pltpu.CompilerParams(
            dimension_semantics=("parallel",)),
    )(xflat, w1_mat, b1_vec, w2_mat, b2_vec)

    # Strip padded-width garbage columns and lane padding (cheap fused slices).
    out = out.reshape(B, ACCW)[:, :HWp].reshape(B, 1, H, Wp)[:, :, :, :W]
    return out


def autoencoder_forward(x, prepped):
    """x: (B, 1, H, W) float32 -> (B, 1, H, W) float32."""
    w1_mat, b1_vec, w2_mat, b2_vec = prepped
    return _forward_impl(x, w1_mat, b1_vec, w2_mat, b2_vec,
                         batch_block=_choose_batch_block(x.shape[0]))


def _reference_forward(x, params):
    """Pure-JAX/XLA reference for correctness checking."""
    w1, b1, w2t, b2 = params

    def conv_relu(inp, wt, bias):
        y = jax.lax.conv_general_dilated(
            inp, wt, window_strides=(1, 1), padding=((PAD, PAD), (PAD, PAD)),
            dimension_numbers=("NCHW", "OIHW", "NCHW"),
            precision=jax.lax.Precision.HIGHEST)
        return jax.nn.relu(y + bias[None, :, None, None])

    h = conv_relu(x, w1, b1)
    w2c = jnp.flip(w2t, axis=(-2, -1)).transpose(1, 0, 2, 3)
    return conv_relu(h, w2c, b2)


if __name__ == "__main__":
    key = jax.random.PRNGKey(0)
    pkey, xkey = jax.random.split(key)
    params = init_params(pkey)
    prepped = prepare_params(params)

    # Module's conv1 expects 1 input channel -> x is (B, 1, H, W)
    x = jax.random.normal(xkey, (2, 1, 16, 16), dtype=jnp.float32)

    y = autoencoder_forward(x, prepped)
    y = jax.block_until_ready(y)

    y_ref = _reference_forward(x, params)
    assert y.shape == x.shape, (y.shape, x.shape)
    err = float(jnp.max(jnp.abs(y - y_ref)))
    assert jnp.allclose(y, y_ref, atol=5e-4, rtol=5e-4), \
        f"mismatch vs XLA reference (max abs err {err})"

    print("KERNEL_OK")
</pallas_src>

<mosaic_0001>
module attributes {stable_mosaic.version = 11 : i64} {
  func.func @fused_autoencoder_kernel(%arg0: i32, %arg1: memref<1x2x512xf32, #tpu.memory_space<vmem>>, %arg2: memref<4x25xf32, #tpu.memory_space<smem>>, %arg3: memref<4xf32, #tpu.memory_space<smem>>, %arg4: memref<4x25xf32, #tpu.memory_space<smem>>, %arg5: memref<1xf32, #tpu.memory_space<smem>>, %arg6: memref<1x2x384xf32, #tpu.memory_space<vmem>>, %arg7: memref<4x2x640xf32, #tpu.memory_space<vmem>>) attributes {dimension_semantics = [#tpu.dimension_semantics<parallel>], iteration_bounds = array<i64: 1>, scalar_prefetch = 0 : i64, scratch_operands = 1 : i64, tpu.core_type = #tpu.core_type<tc>, window_params = [{transform_indices = @transform_0, window_bounds = array<i64: 1, 2, 512>}, {transform_indices = @transform_1, window_bounds = array<i64: 4, 25>}, {transform_indices = @transform_2, window_bounds = array<i64: 4>}, {transform_indices = @transform_3, window_bounds = array<i64: 4, 25>}, {transform_indices = @transform_4, window_bounds = array<i64: 1>}, {transform_indices = @transform_5, window_bounds = array<i64: 1, 2, 384>}]} {
    %0 = tpu.iota {dimensions = array<i32: 1>} : vector<1x384xi32>
    %c16_i32 = arith.constant 16 : i32
    %1 = vector.broadcast %c16_i32 : i32 to vector<1x384xi32>
    %2 = arith.cmpi slt, %0, %1 : vector<1x384xi32>
    %c20_i32 = arith.constant 20 : i32
    %3 = vector.broadcast %c20_i32 : i32 to vector<1x384xi32>
    %4 = arith.cmpi sge, %0, %3 : vector<1x384xi32>
    %c36_i32 = arith.constant 36 : i32
    %5 = vector.broadcast %c36_i32 : i32 to vector<1x384xi32>
    %6 = arith.cmpi slt, %0, %5 : vector<1x384xi32>
    %7 = arith.andi %4, %6 : vector<1x384xi1>
    %8 = arith.ori %2, %7 : vector<1x384xi1>
    %c40_i32 = arith.constant 40 : i32
    %9 = vector.broadcast %c40_i32 : i32 to vector<1x384xi32>
    %10 = arith.cmpi sge, %0, %9 : vector<1x384xi32>
    %c56_i32 = arith.constant 56 : i32
    %11 = vector.broadcast %c56_i32 : i32 to vector<1x384xi32>
    %12 = arith.cmpi slt, %0, %11 : vector<1x384xi32>
    %13 = arith.andi %10, %12 : vector<1x384xi1>
    %14 = arith.ori %8, %13 : vector<1x384xi1>
    %c60_i32 = arith.constant 60 : i32
    %15 = vector.broadcast %c60_i32 : i32 to vector<1x384xi32>
    %16 = arith.cmpi sge, %0, %15 : vector<1x384xi32>
    %c76_i32 = arith.constant 76 : i32
    %17 = vector.broadcast %c76_i32 : i32 to vector<1x384xi32>
    %18 = arith.cmpi slt, %0, %17 : vector<1x384xi32>
    %19 = arith.andi %16, %18 : vector<1x384xi1>
    %20 = arith.ori %14, %19 : vector<1x384xi1>
    %c80_i32 = arith.constant 80 : i32
    %21 = vector.broadcast %c80_i32 : i32 to vector<1x384xi32>
    %22 = arith.cmpi sge, %0, %21 : vector<1x384xi32>
    %c96_i32 = arith.constant 96 : i32
    %23 = vector.broadcast %c96_i32 : i32 to vector<1x384xi32>
    %24 = arith.cmpi slt, %0, %23 : vector<1x384xi32>
    %25 = arith.andi %22, %24 : vector<1x384xi1>
    %26 = arith.ori %20, %25 : vector<1x384xi1>
    %c100_i32 = arith.constant 100 : i32
    %27 = vector.broadcast %c100_i32 : i32 to vector<1x384xi32>
    %28 = arith.cmpi sge, %0, %27 : vector<1x384xi32>
    %c116_i32 = arith.constant 116 : i32
    %29 = vector.broadcast %c116_i32 : i32 to vector<1x384xi32>
    %30 = arith.cmpi slt, %0, %29 : vector<1x384xi32>
    %31 = arith.andi %28, %30 : vector<1x384xi1>
    %32 = arith.ori %26, %31 : vector<1x384xi1>
    %c120_i32 = arith.constant 120 : i32
    %33 = vector.broadcast %c120_i32 : i32 to vector<1x384xi32>
    %34 = arith.cmpi sge, %0, %33 : vector<1x384xi32>
    %c136_i32 = arith.constant 136 : i32
    %35 = vector.broadcast %c136_i32 : i32 to vector<1x384xi32>
    %36 = arith.cmpi slt, %0, %35 : vector<1x384xi32>
    %37 = arith.andi %34, %36 : vector<1x384xi1>
    %38 = arith.ori %32, %37 : vector<1x384xi1>
    %c140_i32 = arith.constant 140 : i32
    %39 = vector.broadcast %c140_i32 : i32 to vector<1x384xi32>
    %40 = arith.cmpi sge, %0, %39 : vector<1x384xi32>
    %c156_i32 = arith.constant 156 : i32
    %41 = vector.broadcast %c156_i32 : i32 to vector<1x384xi32>
    %42 = arith.cmpi slt, %0, %41 : vector<1x384xi32>
    %43 = arith.andi %40, %42 : vector<1x384xi1>
    %44 = arith.ori %38, %43 : vector<1x384xi1>
    %c160_i32 = arith.constant 160 : i32
    %45 = vector.broadcast %c160_i32 : i32 to vector<1x384xi32>
    %46 = arith.cmpi sge, %0, %45 : vector<1x384xi32>
    %c176_i32 = arith.constant 176 : i32
    %47 = vector.broadcast %c176_i32 : i32 to vector<1x384xi32>
    %48 = arith.cmpi slt, %0, %47 : vector<1x384xi32>
    %49 = arith.andi %46, %48 : vector<1x384xi1>
    %50 = arith.ori %44, %49 : vector<1x384xi1>
    %c180_i32 = arith.constant 180 : i32
    %51 = vector.broadcast %c180_i32 : i32 to vector<1x384xi32>
    %52 = arith.cmpi sge, %0, %51 : vector<1x384xi32>
    %c196_i32 = arith.constant 196 : i32
    %53 = vector.broadcast %c196_i32 : i32 to vector<1x384xi32>
    %54 = arith.cmpi slt, %0, %53 : vector<1x384xi32>
    %55 = arith.andi %52, %54 : vector<1x384xi1>
    %56 = arith.ori %50, %55 : vector<1x384xi1>
    %c200_i32 = arith.constant 200 : i32
    %57 = vector.broadcast %c200_i32 : i32 to vector<1x384xi32>
    %58 = arith.cmpi sge, %0, %57 : vector<1x384xi32>
    %c216_i32 = arith.constant 216 : i32
    %59 = vector.broadcast %c216_i32 : i32 to vector<1x384xi32>
    %60 = arith.cmpi slt, %0, %59 : vector<1x384xi32>
    %61 = arith.andi %58, %60 : vector<1x384xi1>
    %62 = arith.ori %56, %61 : vector<1x384xi1>
    %c220_i32 = arith.constant 220 : i32
    %63 = vector.broadcast %c220_i32 : i32 to vector<1x384xi32>
    %64 = arith.cmpi sge, %0, %63 : vector<1x384xi32>
    %c236_i32 = arith.constant 236 : i32
    %65 = vector.broadcast %c236_i32 : i32 to vector<1x384xi32>
    %66 = arith.cmpi slt, %0, %65 : vector<1x384xi32>
    %67 = arith.andi %64, %66 : vector<1x384xi1>
    %68 = arith.ori %62, %67 : vector<1x384xi1>
    %c240_i32 = arith.constant 240 : i32
    %69 = vector.broadcast %c240_i32 : i32 to vector<1x384xi32>
    %70 = arith.cmpi sge, %0, %69 : vector<1x384xi32>
    %c256_i32 = arith.constant 256 : i32
    %71 = vector.broadcast %c256_i32 : i32 to vector<1x384xi32>
    %72 = arith.cmpi slt, %0, %71 : vector<1x384xi32>
    %73 = arith.andi %70, %72 : vector<1x384xi1>
    %74 = arith.ori %68, %73 : vector<1x384xi1>
    %c260_i32 = arith.constant 260 : i32
    %75 = vector.broadcast %c260_i32 : i32 to vector<1x384xi32>
    %76 = arith.cmpi sge, %0, %75 : vector<1x384xi32>
    %c276_i32 = arith.constant 276 : i32
    %77 = vector.broadcast %c276_i32 : i32 to vector<1x384xi32>
    %78 = arith.cmpi slt, %0, %77 : vector<1x384xi32>
    %79 = arith.andi %76, %78 : vector<1x384xi1>
    %80 = arith.ori %74, %79 : vector<1x384xi1>
    %c280_i32 = arith.constant 280 : i32
    %81 = vector.broadcast %c280_i32 : i32 to vector<1x384xi32>
    %82 = arith.cmpi sge, %0, %81 : vector<1x384xi32>
    %c296_i32 = arith.constant 296 : i32
    %83 = vector.broadcast %c296_i32 : i32 to vector<1x384xi32>
    %84 = arith.cmpi slt, %0, %83 : vector<1x384xi32>
    %85 = arith.andi %82, %84 : vector<1x384xi1>
    %86 = arith.ori %80, %85 : vector<1x384xi1>
    %c300_i32 = arith.constant 300 : i32
    %87 = vector.broadcast %c300_i32 : i32 to vector<1x384xi32>
    %88 = arith.cmpi sge, %0, %87 : vector<1x384xi32>
    %c316_i32 = arith.constant 316 : i32
    %89 = vector.broadcast %c316_i32 : i32 to vector<1x384xi32>
    %90 = arith.cmpi slt, %0, %89 : vector<1x384xi32>
    %91 = arith.andi %88, %90 : vector<1x384xi1>
    %92 = arith.ori %86, %91 : vector<1x384xi1>
    %c0 = arith.constant 0 : index
    %93 = memref.load %arg3[%c0] : memref<4xf32, #tpu.memory_space<smem>>
    %94 = vector.broadcast %93 : f32 to vector<2x384xf32>
    %c1 = arith.constant 1 : index
    %95 = memref.load %arg3[%c1] : memref<4xf32, #tpu.memory_space<smem>>
    %96 = vector.broadcast %95 : f32 to vector<2x384xf32>
    %c2 = arith.constant 2 : index
    %97 = memref.load %arg3[%c2] : memref<4xf32, #tpu.memory_space<smem>>
    %98 = vector.broadcast %97 : f32 to vector<2x384xf32>
    %c3 = arith.constant 3 : index
    %99 = memref.load %arg3[%c3] : memref<4xf32, #tpu.memory_space<smem>>
    %100 = vector.broadcast %99 : f32 to vector<2x384xf32>
    %c0_0 = arith.constant 0 : index
    %c0_1 = arith.constant 0 : index
    %c0_2 = arith.constant 0 : index
    %101 = vector.load %arg1[%c0_0, %c0_1, %c0_2] : memref<1x2x512xf32, #tpu.memory_space<vmem>>, vector<1x2x384xf32>
    %102 = vector.shape_cast %101 : vector<1x2x384xf32> to vector<2x384xf32>
    %c0_3 = arith.constant 0 : index
    %c0_4 = arith.constant 0 : index
    %103 = memref.load %arg2[%c0_3, %c0_4] : memref<4x25xf32, #tpu.memory_space<smem>>
    %104 = vector.broadcast %103 : f32 to vector<2x384xf32>
    %105 = arith.mulf %104, %102 : vector<2x384xf32>
    %106 = arith.addf %94, %105 : vector<2x384xf32>
    %c1_5 = arith.constant 1 : index
    %c0_6 = arith.constant 0 : index
    %107 = memref.load %arg2[%c1_5, %c0_6] : memref<4x25xf32, #tpu.memory_space<smem>>
    %108 = vector.broadcast %107 : f32 to vector<2x384xf32>
    %109 = arith.mulf %108, %102 : vector<2x384xf32>
    %110 = arith.addf %96, %109 : vector<2x384xf32>
    %c2_7 = arith.constant 2 : index
    %c0_8 = arith.constant 0 : index
    %111 = memref.load %arg2[%c2_7, %c0_8] : memref<4x25xf32, #tpu.memory_space<smem>>
    %112 = vector.broadcast %111 : f32 to vector<2x384xf32>
    %113 = arith.mulf %112, %102 : vector<2x384xf32>
    %114 = arith.addf %98, %113 : vector<2x384xf32>
    %c3_9 = arith.constant 3 : index
    %c0_10 = arith.constant 0 : index
    %115 = memref.load %arg2[%c3_9, %c0_10] : memref<4x25xf32, #tpu.memory_space<smem>>
    %116 = vector.broadcast %115 : f32 to vector<2x384xf32>
    %117 = arith.mulf %116, %102 : vector<2x384xf32>
    %118 = arith.addf %100, %117 : vector<2x384xf32>
    %c0_11 = arith.constant 0 : index
    %c0_12 = arith.constant 0 : index
    %c1_13 = arith.constant 1 : index
    %119 = vector.load %arg1[%c0_11, %c0_12, %c1_13] : memref<1x2x512xf32, #tpu.memory_space<vmem>>, vector<1x2x384xf32>
    %120 = vector.shape_cast %119 : vector<1x2x384xf32> to vector<2x384xf32>
    %c0_14 = arith.constant 0 : index
    %c1_15 = arith.constant 1 : index
    %121 = memref.load %arg2[%c0_14, %c1_15] : memref<4x25xf32, #tpu.memory_space<smem>>
    %122 = vector.broadcast %121 : f32 to vector<2x384xf32>
    %123 = arith.mulf %122, %120 : vector<2x384xf32>
    %124 = arith.addf %106, %123 : vector<2x384xf32>
    %c1_16 = arith.constant 1 : index
    %c1_17 = arith.constant 1 : index
    %125 = memref.load %arg2[%c1_16, %c1_17] : memref<4x25xf32, #tpu.memory_space<smem>>
    %126 = vector.broadcast %125 : f32 to vector<2x384xf32>
    %127 = arith.mulf %126, %120 : vector<2x384xf32>
    %128 = arith.addf %110, %127 : vector<2x384xf32>
    %c2_18 = arith.constant 2 : index
    %c1_19 = arith.constant 1 : index
    %129 = memref.load %arg2[%c2_18, %c1_19] : memref<4x25xf32, #tpu.memory_space<smem>>
    %130 = vector.broadcast %129 : f32 to vector<2x384xf32>
    %131 = arith.mulf %130, %120 : vector<2x384xf32>
    %132 = arith.addf %114, %131 : vector<2x384xf32>
    %c3_20 = arith.constant 3 : index
    %c1_21 = arith.constant 1 : index
    %133 = memref.load %arg2[%c3_20, %c1_21] : memref<4x25xf32, #tpu.memory_space<smem>>
    %134 = vector.broadcast %133 : f32 to vector<2x384xf32>
    %135 = arith.mulf %134, %120 : vector<2x384xf32>
    %136 = arith.addf %118, %135 : vector<2x384xf32>
    %c0_22 = arith.constant 0 : index
    %c0_23 = arith.constant 0 : index
    %c2_24 = arith.constant 2 : index
    %137 = vector.load %arg1[%c0_22, %c0_23, %c2_24] : memref<1x2x512xf32, #tpu.memory_space<vmem>>, vector<1x2x384xf32>
    %138 = vector.shape_cast %137 : vector<1x2x384xf32> to vector<2x384xf32>
    %c0_25 = arith.constant 0 : index
    %c2_26 = arith.constant 2 : index
    %139 = memref.load %arg2[%c0_25, %c2_26] : memref<4x25xf32, #tpu.memory_space<smem>>
    %140 = vector.broadcast %139 : f32 to vector<2x384xf32>
    %141 = arith.mulf %140, %138 : vector<2x384xf32>
    %142 = arith.addf %124, %141 : vector<2x384xf32>
    %c1_27 = arith.constant 1 : index
    %c2_28 = arith.constant 2 : index
    %143 = memref.load %arg2[%c1_27, %c2_28] : memref<4x25xf32, #tpu.memory_space<smem>>
    %144 = vector.broadcast %143 : f32 to vector<2x384xf32>
    %145 = arith.mulf %144, %138 : vector<2x384xf32>
    %146 = arith.addf %128, %145 : vector<2x384xf32>
    %c2_29 = arith.constant 2 : index
    %c2_30 = arith.constant 2 : index
    %147 = memref.load %arg2[%c2_29, %c2_30] : memref<4x25xf32, #tpu.memory_space<smem>>
    %148 = vector.broadcast %147 : f32 to vector<2x384xf32>
    %149 = arith.mulf %148, %138 : vector<2x384xf32>
    %150 = arith.addf %132, %149 : vector<2x384xf32>
    %c3_31 = arith.constant 3 : index
    %c2_32 = arith.constant 2 : index
    %151 = memref.load %arg2[%c3_31, %c2_32] : memref<4x25xf32, #tpu.memory_space<smem>>
    %152 = vector.broadcast %151 : f32 to vector<2x384xf32>
    %153 = arith.mulf %152, %138 : vector<2x384xf32>
    %154 = arith.addf %136, %153 : vector<2x384xf32>
    %c0_33 = arith.constant 0 : index
    %c0_34 = arith.constant 0 : index
    %c3_35 = arith.constant 3 : index
    %155 = vector.load %arg1[%c0_33, %c0_34, %c3_35] : memref<1x2x512xf32, #tpu.memory_space<vmem>>, vector<1x2x384xf32>
    %156 = vector.shape_cast %155 : vector<1x2x384xf32> to vector<2x384xf32>
    %c0_36 = arith.constant 0 : index
    %c3_37 = arith.constant 3 : index
    %157 = memref.load %arg2[%c0_36, %c3_37] : memref<4x25xf32, #tpu.memory_space<smem>>
    %158 = vector.broadcast %157 : f32 to vector<2x384xf32>
    %159 = arith.mulf %158, %156 : vector<2x384xf32>
    %160 = arith.addf %142, %159 : vector<2x384xf32>
    %c1_38 = arith.constant 1 : index
    %c3_39 = arith.constant 3 : index
    %161 = memref.load %arg2[%c1_38, %c3_39] : memref<4x25xf32, #tpu.memory_space<smem>>
    %162 = vector.broadcast %161 : f32 to vector<2x384xf32>
    %163 = arith.mulf %162, %156 : vector<2x384xf32>
    %164 = arith.addf %146, %163 : vector<2x384xf32>
    %c2_40 = arith.constant 2 : index
    %c3_41 = arith.constant 3 : index
    %165 = memref.load %arg2[%c2_40, %c3_41] : memref<4x25xf32, #tpu.memory_space<smem>>
    %166 = vector.broadcast %165 : f32 to vector<2x384xf32>
    %167 = arith.mulf %166, %156 : vector<2x384xf32>
    %168 = arith.addf %150, %167 : vector<2x384xf32>
    %c3_42 = arith.constant 3 : index
    %c3_43 = arith.constant 3 : index
    %169 = memref.load %arg2[%c3_42, %c3_43] : memref<4x25xf32, #tpu.memory_space<smem>>
    %170 = vector.broadcast %169 : f32 to vector<2x384xf32>
    %171 = arith.mulf %170, %156 : vector<2x384xf32>
    %172 = arith.addf %154, %171 : vector<2x384xf32>
    %c0_44 = arith.constant 0 : index
    %c0_45 = arith.constant 0 : index
    %c4 = arith.constant 4 : index
    %173 = vector.load %arg1[%c0_44, %c0_45, %c4] : memref<1x2x512xf32, #tpu.memory_space<vmem>>, vector<1x2x384xf32>
    %174 = vector.shape_cast %173 : vector<1x2x384xf32> to vector<2x384xf32>
    %c0_46 = arith.constant 0 : index
    %c4_47 = arith.constant 4 : index
    %175 = memref.load %arg2[%c0_46, %c4_47] : memref<4x25xf32, #tpu.memory_space<smem>>
    %176 = vector.broadcast %175 : f32 to vector<2x384xf32>
    %177 = arith.mulf %176, %174 : vector<2x384xf32>
    %178 = arith.addf %160, %177 : vector<2x384xf32>
    %c1_48 = arith.constant 1 : index
    %c4_49 = arith.constant 4 : index
    %179 = memref.load %arg2[%c1_48, %c4_49] : memref<4x25xf32, #tpu.memory_space<smem>>
    %180 = vector.broadcast %179 : f32 to vector<2x384xf32>
    %181 = arith.mulf %180, %174 : vector<2x384xf32>
    %182 = arith.addf %164, %181 : vector<2x384xf32>
    %c2_50 = arith.constant 2 : index
    %c4_51 = arith.constant 4 : index
    %183 = memref.load %arg2[%c2_50, %c4_51] : memref<4x25xf32, #tpu.memory_space<smem>>
    %184 = vector.broadcast %183 : f32 to vector<2x384xf32>
    %185 = arith.mulf %184, %174 : vector<2x384xf32>
    %186 = arith.addf %168, %185 : vector<2x384xf32>
    %c3_52 = arith.constant 3 : index
    %c4_53 = arith.constant 4 : index
    %187 = memref.load %arg2[%c3_52, %c4_53] : memref<4x25xf32, #tpu.memory_space<smem>>
    %188 = vector.broadcast %187 : f32 to vector<2x384xf32>
    %189 = arith.mulf %188, %174 : vector<2x384xf32>
    %190 = arith.addf %172, %189 : vector<2x384xf32>
    %c0_54 = arith.constant 0 : index
    %c0_55 = arith.constant 0 : index
    %c20 = arith.constant 20 : index
    %191 = vector.load %arg1[%c0_54, %c0_55, %c20] : memref<1x2x512xf32, #tpu.memory_space<vmem>>, vector<1x2x384xf32>
    %192 = vector.shape_cast %191 : vector<1x2x384xf32> to vector<2x384xf32>
    %c0_56 = arith.constant 0 : index
    %c5 = arith.constant 5 : index
    %193 = memref.load %arg2[%c0_56, %c5] : memref<4x25xf32, #tpu.memory_space<smem>>
    %194 = vector.broadcast %193 : f32 to vector<2x384xf32>
    %195 = arith.mulf %194, %192 : vector<2x384xf32>
    %196 = arith.addf %178, %195 : vector<2x384xf32>
    %c1_57 = arith.constant 1 : index
    %c5_58 = arith.constant 5 : index
    %197 = memref.load %arg2[%c1_57, %c5_58] : memref<4x25xf32, #tpu.memory_space<smem>>
    %198 = vector.broadcast %197 : f32 to vector<2x384xf32>
    %199 = arith.mulf %198, %192 : vector<2x384xf32>
    %200 = arith.addf %182, %199 : vector<2x384xf32>
    %c2_59 = arith.constant 2 : index
    %c5_60 = arith.constant 5 : index
    %201 = memref.load %arg2[%c2_59, %c5_60] : memref<4x25xf32, #tpu.memory_space<smem>>
    %202 = vector.broadcast %201 : f32 to vector<2x384xf32>
    %203 = arith.mulf %202, %192 : vector<2x384xf32>
    %204 = arith.addf %186, %203 : vector<2x384xf32>
    %c3_61 = arith.constant 3 : index
    %c5_62 = arith.constant 5 : index
    %205 = memref.load %arg2[%c3_61, %c5_62] : memref<4x25xf32, #tpu.memory_space<smem>>
    %206 = vector.broadcast %205 : f32 to vector<2x384xf32>
    %207 = arith.mulf %206, %192 : vector<2x384xf32>
    %208 = arith.addf %190, %207 : vector<2x384xf32>
    %c0_63 = arith.constant 0 : index
    %c0_64 = arith.constant 0 : index
    %c21 = arith.constant 21 : index
    %209 = vector.load %arg1[%c0_63, %c0_64, %c21] : memref<1x2x512xf32, #tpu.memory_space<vmem>>, vector<1x2x384xf32>
    %210 = vector.shape_cast %209 : vector<1x2x384xf32> to vector<2x384xf32>
    %c0_65 = arith.constant 0 : index
    %c6 = arith.constant 6 : index
    %211 = memref.load %arg2[%c0_65, %c6] : memref<4x25xf32, #tpu.memory_space<smem>>
    %212 = vector.broadcast %211 : f32 to vector<2x384xf32>
    %213 = arith.mulf %212, %210 : vector<2x384xf32>
    %214 = arith.addf %196, %213 : vector<2x384xf32>
    %c1_66 = arith.constant 1 : index
    %c6_67 = arith.constant 6 : index
    %215 = memref.load %arg2[%c1_66, %c6_67] : memref<4x25xf32, #tpu.memory_space<smem>>
    %216 = vector.broadcast %215 : f32 to vector<2x384xf32>
    %217 = arith.mulf %216, %210 : vector<2x384xf32>
    %218 = arith.addf %200, %217 : vector<2x384xf32>
    %c2_68 = arith.constant 2 : index
    %c6_69 = arith.constant 6 : index
    %219 = memref.load %arg2[%c2_68, %c6_69] : memref<4x25xf32, #tpu.memory_space<smem>>
    %220 = vector.broadcast %219 : f32 to vector<2x384xf32>
    %221 = arith.mulf %220, %210 : vector<2x384xf32>
    %222 = arith.addf %204, %221 : vector<2x384xf32>
    %c3_70 = arith.constant 3 : index
    %c6_71 = arith.constant 6 : index
    %223 = memref.load %arg2[%c3_70, %c6_71] : memref<4x25xf32, #tpu.memory_space<smem>>
    %224 = vector.broadcast %223 : f32 to vector<2x384xf32>
    %225 = arith.mulf %224, %210 : vector<2x384xf32>
    %226 = arith.addf %208, %225 : vector<2x384xf32>
    %c0_72 = arith.constant 0 : index
    %c0_73 = arith.constant 0 : index
    %c22 = arith.constant 22 : index
    %227 = vector.load %arg1[%c0_72, %c0_73, %c22] : memref<1x2x512xf32, #tpu.memory_space<vmem>>, vector<1x2x384xf32>
    %228 = vector.shape_cast %227 : vector<1x2x384xf32> to vector<2x384xf32>
    %c0_74 = arith.constant 0 : index
    %c7 = arith.constant 7 : index
    %229 = memref.load %arg2[%c0_74, %c7] : memref<4x25xf32, #tpu.memory_space<smem>>
    %230 = vector.broadcast %229 : f32 to vector<2x384xf32>
    %231 = arith.mulf %230, %228 : vector<2x384xf32>
    %232 = arith.addf %214, %231 : vector<2x384xf32>
    %c1_75 = arith.constant 1 : index
    %c7_76 = arith.constant 7 : index
    %233 = memref.load %arg2[%c1_75, %c7_76] : memref<4x25xf32, #tpu.memory_space<smem>>
    %234 = vector.broadcast %233 : f32 to vector<2x384xf32>
    %235 = arith.mulf %234, %228 : vector<2x384xf32>
    %236 = arith.addf %218, %235 : vector<2x384xf32>
    %c2_77 = arith.constant 2 : index
    %c7_78 = arith.constant 7 : index
    %237 = memref.load %arg2[%c2_77, %c7_78] : memref<4x25xf32, #tpu.memory_space<smem>>
    %238 = vector.broadcast %237 : f32 to vector<2x384xf32>
    %239 = arith.mulf %238, %228 : vector<2x384xf32>
    %240 = arith.addf %222, %239 : vector<2x384xf32>
    %c3_79 = arith.constant 3 : index
    %c7_80 = arith.constant 7 : index
    %241 = memref.load %arg2[%c3_79, %c7_80] : memref<4x25xf32, #tpu.memory_space<smem>>
    %242 = vector.broadcast %241 : f32 to vector<2x384xf32>
    %243 = arith.mulf %242, %228 : vector<2x384xf32>
    %244 = arith.addf %226, %243 : vector<2x384xf32>
    %c0_81 = arith.constant 0 : index
    %c0_82 = arith.constant 0 : index
    %c23 = arith.constant 23 : index
    %245 = vector.load %arg1[%c0_81, %c0_82, %c23] : memref<1x2x512xf32, #tpu.memory_space<vmem>>, vector<1x2x384xf32>
    %246 = vector.shape_cast %245 : vector<1x2x384xf32> to vector<2x384xf32>
    %c0_83 = arith.constant 0 : index
    %c8 = arith.constant 8 : index
    %247 = memref.load %arg2[%c0_83, %c8] : memref<4x25xf32, #tpu.memory_space<smem>>
    %248 = vector.broadcast %247 : f32 to vector<2x384xf32>
    %249 = arith.mulf %248, %246 : vector<2x384xf32>
    %250 = arith.addf %232, %249 : vector<2x384xf32>
    %c1_84 = arith.constant 1 : index
    %c8_85 = arith.constant 8 : index
    %251 = memref.load %arg2[%c1_84, %c8_85] : memref<4x25xf32, #tpu.memory_space<smem>>
    %252 = vector.broadcast %251 : f32 to vector<2x384xf32>
    %253 = arith.mulf %252, %246 : vector<2x384xf32>
    %254 = arith.addf %236, %253 : vector<2x384xf32>
    %c2_86 = arith.constant 2 : index
    %c8_87 = arith.constant 8 : index
    %255 = memref.load %arg2[%c2_86, %c8_87] : memref<4x25xf32, #tpu.memory_space<smem>>
    %256 = vector.broadcast %255 : f32 to vector<2x384xf32>
    %257 = arith.mulf %256, %246 : vector<2x384xf32>
    %258 = arith.addf %240, %257 : vector<2x384xf32>
    %c3_88 = arith.constant 3 : index
    %c8_89 = arith.constant 8 : index
    %259 = memref.load %arg2[%c3_88, %c8_89] : memref<4x25xf32, #tpu.memory_space<smem>>
    %260 = vector.broadcast %259 : f32 to vector<2x384xf32>
    %261 = arith.mulf %260, %246 : vector<2x384xf32>
    %262 = arith.addf %244, %261 : vector<2x384xf32>
    %c0_90 = arith.constant 0 : index
    %c0_91 = arith.constant 0 : index
    %c24 = arith.constant 24 : index
    %263 = vector.load %arg1[%c0_90, %c0_91, %c24] : memref<1x2x512xf32, #tpu.memory_space<vmem>>, vector<1x2x384xf32>
    %264 = vector.shape_cast %263 : vector<1x2x384xf32> to vector<2x384xf32>
    %c0_92 = arith.constant 0 : index
    %c9 = arith.constant 9 : index
    %265 = memref.load %arg2[%c0_92, %c9] : memref<4x25xf32, #tpu.memory_space<smem>>
    %266 = vector.broadcast %265 : f32 to vector<2x384xf32>
    %267 = arith.mulf %266, %264 : vector<2x384xf32>
    %268 = arith.addf %250, %267 : vector<2x384xf32>
    %c1_93 = arith.constant 1 : index
    %c9_94 = arith.constant 9 : index
    %269 = memref.load %arg2[%c1_93, %c9_94] : memref<4x25xf32, #tpu.memory_space<smem>>
    %270 = vector.broadcast %269 : f32 to vector<2x384xf32>
    %271 = arith.mulf %270, %264 : vector<2x384xf32>
    %272 = arith.addf %254, %271 : vector<2x384xf32>
    %c2_95 = arith.constant 2 : index
    %c9_96 = arith.constant 9 : index
    %273 = memref.load %arg2[%c2_95, %c9_96] : memref<4x25xf32, #tpu.memory_space<smem>>
    %274 = vector.broadcast %273 : f32 to vector<2x384xf32>
    %275 = arith.mulf %274, %264 : vector<2x384xf32>
    %276 = arith.addf %258, %275 : vector<2x384xf32>
    %c3_97 = arith.constant 3 : index
    %c9_98 = arith.constant 9 : index
    %277 = memref.load %arg2[%c3_97, %c9_98] : memref<4x25xf32, #tpu.memory_space<smem>>
    %278 = vector.broadcast %277 : f32 to vector<2x384xf32>
    %279 = arith.mulf %278, %264 : vector<2x384xf32>
    %280 = arith.addf %262, %279 : vector<2x384xf32>
    %c0_99 = arith.constant 0 : index
    %c0_100 = arith.constant 0 : index
    %c40 = arith.constant 40 : index
    %281 = vector.load %arg1[%c0_99, %c0_100, %c40] : memref<1x2x512xf32, #tpu.memory_space<vmem>>, vector<1x2x384xf32>
    %282 = vector.shape_cast %281 : vector<1x2x384xf32> to vector<2x384xf32>
    %c0_101 = arith.constant 0 : index
    %c10 = arith.constant 10 : index
    %283 = memref.load %arg2[%c0_101, %c10] : memref<4x25xf32, #tpu.memory_space<smem>>
    %284 = vector.broadcast %283 : f32 to vector<2x384xf32>
    %285 = arith.mulf %284, %282 : vector<2x384xf32>
    %286 = arith.addf %268, %285 : vector<2x384xf32>
    %c1_102 = arith.constant 1 : index
    %c10_103 = arith.constant 10 : index
    %287 = memref.load %arg2[%c1_102, %c10_103] : memref<4x25xf32, #tpu.memory_space<smem>>
    %288 = vector.broadcast %287 : f32 to vector<2x384xf32>
    %289 = arith.mulf %288, %282 : vector<2x384xf32>
    %290 = arith.addf %272, %289 : vector<2x384xf32>
    %c2_104 = arith.constant 2 : index
    %c10_105 = arith.constant 10 : index
    %291 = memref.load %arg2[%c2_104, %c10_105] : memref<4x25xf32, #tpu.memory_space<smem>>
    %292 = vector.broadcast %291 : f32 to vector<2x384xf32>
    %293 = arith.mulf %292, %282 : vector<2x384xf32>
    %294 = arith.addf %276, %293 : vector<2x384xf32>
    %c3_106 = arith.constant 3 : index
    %c10_107 = arith.constant 10 : index
    %295 = memref.load %arg2[%c3_106, %c10_107] : memref<4x25xf32, #tpu.memory_space<smem>>
    %296 = vector.broadcast %295 : f32 to vector<2x384xf32>
    %297 = arith.mulf %296, %282 : vector<2x384xf32>
    %298 = arith.addf %280, %297 : vector<2x384xf32>
    %c0_108 = arith.constant 0 : index
    %c0_109 = arith.constant 0 : index
    %c41 = arith.constant 41 : index
    %299 = vector.load %arg1[%c0_108, %c0_109, %c41] : memref<1x2x512xf32, #tpu.memory_space<vmem>>, vector<1x2x384xf32>
    %300 = vector.shape_cast %299 : vector<1x2x384xf32> to vector<2x384xf32>
    %c0_110 = arith.constant 0 : index
    %c11 = arith.constant 11 : index
    %301 = memref.load %arg2[%c0_110, %c11] : memref<4x25xf32, #tpu.memory_space<smem>>
    %302 = vector.broadcast %301 : f32 to vector<2x384xf32>
    %303 = arith.mulf %302, %300 : vector<2x384xf32>
    %304 = arith.addf %286, %303 : vector<2x384xf32>
    %c1_111 = arith.constant 1 : index
    %c11_112 = arith.constant 11 : index
    %305 = memref.load %arg2[%c1_111, %c11_112] : memref<4x25xf32, #tpu.memory_space<smem>>
    %306 = vector.broadcast %305 : f32 to vector<2x384xf32>
    %307 = arith.mulf %306, %300 : vector<2x384xf32>
    %308 = arith.addf %290, %307 : vector<2x384xf32>
    %c2_113 = arith.constant 2 : index
    %c11_114 = arith.constant 11 : index
    %309 = memref.load %arg2[%c2_113, %c11_114] : memref<4x25xf32, #tpu.memory_space<smem>>
    %310 = vector.broadcast %309 : f32 to vector<2x384xf32>
    %311 = arith.mulf %310, %300 : vector<2x384xf32>
    %312 = arith.addf %294, %311 : vector<2x384xf32>
    %c3_115 = arith.constant 3 : index
    %c11_116 = arith.constant 11 : index
    %313 = memref.load %arg2[%c3_115, %c11_116] : memref<4x25xf32, #tpu.memory_space<smem>>
    %314 = vector.broadcast %313 : f32 to vector<2x384xf32>
    %315 = arith.mulf %314, %300 : vector<2x384xf32>
    %316 = arith.addf %298, %315 : vector<2x384xf32>
    %c0_117 = arith.constant 0 : index
    %c0_118 = arith.constant 0 : index
    %c42 = arith.constant 42 : index
    %317 = vector.load %arg1[%c0_117, %c0_118, %c42] : memref<1x2x512xf32, #tpu.memory_space<vmem>>, vector<1x2x384xf32>
    %318 = vector.shape_cast %317 : vector<1x2x384xf32> to vector<2x384xf32>
    %c0_119 = arith.constant 0 : index
    %c12 = arith.constant 12 : index
    %319 = memref.load %arg2[%c0_119, %c12] : memref<4x25xf32, #tpu.memory_space<smem>>
    %320 = vector.broadcast %319 : f32 to vector<2x384xf32>
    %321 = arith.mulf %320, %318 : vector<2x384xf32>
    %322 = arith.addf %304, %321 : vector<2x384xf32>
    %c1_120 = arith.constant 1 : index
    %c12_121 = arith.constant 12 : index
    %323 = memref.load %arg2[%c1_120, %c12_121] : memref<4x25xf32, #tpu.memory_space<smem>>
    %324 = vector.broadcast %323 : f32 to vector<2x384xf32>
    %325 = arith.mulf %324, %318 : vector<2x384xf32>
    %326 = arith.addf %308, %325 : vector<2x384xf32>
    %c2_122 = arith.constant 2 : index
    %c12_123 = arith.constant 12 : index
    %327 = memref.load %arg2[%c2_122, %c12_123] : memref<4x25xf32, #tpu.memory_space<smem>>
    %328 = vector.broadcast %327 : f32 to vector<2x384xf32>
    %329 = arith.mulf %328, %318 : vector<2x384xf32>
    %330 = arith.addf %312, %329 : vector<2x384xf32>
    %c3_124 = arith.constant 3 : index
    %c12_125 = arith.constant 12 : index
    %331 = memref.load %arg2[%c3_124, %c12_125] : memref<4x25xf32, #tpu.memory_space<smem>>
    %332 = vector.broadcast %331 : f32 to vector<2x384xf32>
    %333 = arith.mulf %332, %318 : vector<2x384xf32>
    %334 = arith.addf %316, %333 : vector<2x384xf32>
    %c0_126 = arith.constant 0 : index
    %c0_127 = arith.constant 0 : index
    %c43 = arith.constant 43 : index
    %335 = vector.load %arg1[%c0_126, %c0_127, %c43] : memref<1x2x512xf32, #tpu.memory_space<vmem>>, vector<1x2x384xf32>
    %336 = vector.shape_cast %335 : vector<1x2x384xf32> to vector<2x384xf32>
    %c0_128 = arith.constant 0 : index
    %c13 = arith.constant 13 : index
    %337 = memref.load %arg2[%c0_128, %c13] : memref<4x25xf32, #tpu.memory_space<smem>>
    %338 = vector.broadcast %337 : f32 to vector<2x384xf32>
    %339 = arith.mulf %338, %336 : vector<2x384xf32>
    %340 = arith.addf %322, %339 : vector<2x384xf32>
    %c1_129 = arith.constant 1 : index
    %c13_130 = arith.constant 13 : index
    %341 = memref.load %arg2[%c1_129, %c13_130] : memref<4x25xf32, #tpu.memory_space<smem>>
    %342 = vector.broadcast %341 : f32 to vector<2x384xf32>
    %343 = arith.mulf %342, %336 : vector<2x384xf32>
    %344 = arith.addf %326, %343 : vector<2x384xf32>
    %c2_131 = arith.constant 2 : index
    %c13_132 = arith.constant 13 : index
    %345 = memref.load %arg2[%c2_131, %c13_132] : memref<4x25xf32, #tpu.memory_space<smem>>
    %346 = vector.broadcast %345 : f32 to vector<2x384xf32>
    %347 = arith.mulf %346, %336 : vector<2x384xf32>
    %348 = arith.addf %330, %347 : vector<2x384xf32>
    %c3_133 = arith.constant 3 : index
    %c13_134 = arith.constant 13 : index
    %349 = memref.load %arg2[%c3_133, %c13_134] : memref<4x25xf32, #tpu.memory_space<smem>>
    %350 = vector.broadcast %349 : f32 to vector<2x384xf32>
    %351 = arith.mulf %350, %336 : vector<2x384xf32>
    %352 = arith.addf %334, %351 : vector<2x384xf32>
    %c0_135 = arith.constant 0 : index
    %c0_136 = arith.constant 0 : index
    %c44 = arith.constant 44 : index
    %353 = vector.load %arg1[%c0_135, %c0_136, %c44] : memref<1x2x512xf32, #tpu.memory_space<vmem>>, vector<1x2x384xf32>
    %354 = vector.shape_cast %353 : vector<1x2x384xf32> to vector<2x384xf32>
    %c0_137 = arith.constant 0 : index
    %c14 = arith.constant 14 : index
    %355 = memref.load %arg2[%c0_137, %c14] : memref<4x25xf32, #tpu.memory_space<smem>>
    %356 = vector.broadcast %355 : f32 to vector<2x384xf32>
    %357 = arith.mulf %356, %354 : vector<2x384xf32>
    %358 = arith.addf %340, %357 : vector<2x384xf32>
    %c1_138 = arith.constant 1 : index
    %c14_139 = arith.constant 14 : index
    %359 = memref.load %arg2[%c1_138, %c14_139] : memref<4x25xf32, #tpu.memory_space<smem>>
    %360 = vector.broadcast %359 : f32 to vector<2x384xf32>
    %361 = arith.mulf %360, %354 : vector<2x384xf32>
    %362 = arith.addf %344, %361 : vector<2x384xf32>
    %c2_140 = arith.constant 2 : index
    %c14_141 = arith.constant 14 : index
    %363 = memref.load %arg2[%c2_140, %c14_141] : memref<4x25xf32, #tpu.memory_space<smem>>
    %364 = vector.broadcast %363 : f32 to vector<2x384xf32>
    %365 = arith.mulf %364, %354 : vector<2x384xf32>
    %366 = arith.addf %348, %365 : vector<2x384xf32>
    %c3_142 = arith.constant 3 : index
    %c14_143 = arith.constant 14 : index
    %367 = memref.load %arg2[%c3_142, %c14_143] : memref<4x25xf32, #tpu.memory_space<smem>>
    %368 = vector.broadcast %367 : f32 to vector<2x384xf32>
    %369 = arith.mulf %368, %354 : vector<2x384xf32>
    %370 = arith.addf %352, %369 : vector<2x384xf32>
    %c0_144 = arith.constant 0 : index
    %c0_145 = arith.constant 0 : index
    %c60 = arith.constant 60 : index
    %371 = vector.load %arg1[%c0_144, %c0_145, %c60] : memref<1x2x512xf32, #tpu.memory_space<vmem>>, vector<1x2x384xf32>
    %372 = vector.shape_cast %371 : vector<1x2x384xf32> to vector<2x384xf32>
    %c0_146 = arith.constant 0 : index
    %c15 = arith.constant 15 : index
    %373 = memref.load %arg2[%c0_146, %c15] : memref<4x25xf32, #tpu.memory_space<smem>>
    %374 = vector.broadcast %373 : f32 to vector<2x384xf32>
    %375 = arith.mulf %374, %372 : vector<2x384xf32>
    %376 = arith.addf %358, %375 : vector<2x384xf32>
    %c1_147 = arith.constant 1 : index
    %c15_148 = arith.constant 15 : index
    %377 = memref.load %arg2[%c1_147, %c15_148] : memref<4x25xf32, #tpu.memory_space<smem>>
    %378 = vector.broadcast %377 : f32 to vector<2x384xf32>
    %379 = arith.mulf %378, %372 : vector<2x384xf32>
    %380 = arith.addf %362, %379 : vector<2x384xf32>
    %c2_149 = arith.constant 2 : index
    %c15_150 = arith.constant 15 : index
    %381 = memref.load %arg2[%c2_149, %c15_150] : memref<4x25xf32, #tpu.memory_space<smem>>
    %382 = vector.broadcast %381 : f32 to vector<2x384xf32>
    %383 = arith.mulf %382, %372 : vector<2x384xf32>
    %384 = arith.addf %366, %383 : vector<2x384xf32>
    %c3_151 = arith.constant 3 : index
    %c15_152 = arith.constant 15 : index
    %385 = memref.load %arg2[%c3_151, %c15_152] : memref<4x25xf32, #tpu.memory_space<smem>>
    %386 = vector.broadcast %385 : f32 to vector<2x384xf32>
    %387 = arith.mulf %386, %372 : vector<2x384xf32>
    %388 = arith.addf %370, %387 : vector<2x384xf32>
    %c0_153 = arith.constant 0 : index
    %c0_154 = arith.constant 0 : index
    %c61 = arith.constant 61 : index
    %389 = vector.load %arg1[%c0_153, %c0_154, %c61] : memref<1x2x512xf32, #tpu.memory_space<vmem>>, vector<1x2x384xf32>
    %390 = vector.shape_cast %389 : vector<1x2x384xf32> to vector<2x384xf32>
    %c0_155 = arith.constant 0 : index
    %c16 = arith.constant 16 : index
    %391 = memref.load %arg2[%c0_155, %c16] : memref<4x25xf32, #tpu.memory_space<smem>>
    %392 = vector.broadcast %391 : f32 to vector<2x384xf32>
    %393 = arith.mulf %392, %390 : vector<2x384xf32>
    %394 = arith.addf %376, %393 : vector<2x384xf32>
    %c1_156 = arith.constant 1 : index
    %c16_157 = arith.constant 16 : index
    %395 = memref.load %arg2[%c1_156, %c16_157] : memref<4x25xf32, #tpu.memory_space<smem>>
    %396 = vector.broadcast %395 : f32 to vector<2x384xf32>
    %397 = arith.mulf %396, %390 : vector<2x384xf32>
    %398 = arith.addf %380, %397 : vector<2x384xf32>
    %c2_158 = arith.constant 2 : index
    %c16_159 = arith.constant 16 : index
    %399 = memref.load %arg2[%c2_158, %c16_159] : memref<4x25xf32, #tpu.memory_space<smem>>
    %400 = vector.broadcast %399 : f32 to vector<2x384xf32>
    %401 = arith.mulf %400, %390 : vector<2x384xf32>
    %402 = arith.addf %384, %401 : vector<2x384xf32>
    %c3_160 = arith.constant 3 : index
    %c16_161 = arith.constant 16 : index
    %403 = memref.load %arg2[%c3_160, %c16_161] : memref<4x25xf32, #tpu.memory_space<smem>>
    %404 = vector.broadcast %403 : f32 to vector<2x384xf32>
    %405 = arith.mulf %404, %390 : vector<2x384xf32>
    %406 = arith.addf %388, %405 : vector<2x384xf32>
    %c0_162 = arith.constant 0 : index
    %c0_163 = arith.constant 0 : index
    %c62 = arith.constant 62 : index
    %407 = vector.load %arg1[%c0_162, %c0_163, %c62] : memref<1x2x512xf32, #tpu.memory_space<vmem>>, vector<1x2x384xf32>
    %408 = vector.shape_cast %407 : vector<1x2x384xf32> to vector<2x384xf32>
    %c0_164 = arith.constant 0 : index
    %c17 = arith.constant 17 : index
    %409 = memref.load %arg2[%c0_164, %c17] : memref<4x25xf32, #tpu.memory_space<smem>>
    %410 = vector.broadcast %409 : f32 to vector<2x384xf32>
    %411 = arith.mulf %410, %408 : vector<2x384xf32>
    %412 = arith.addf %394, %411 : vector<2x384xf32>
    %c1_165 = arith.constant 1 : index
    %c17_166 = arith.constant 17 : index
    %413 = memref.load %arg2[%c1_165, %c17_166] : memref<4x25xf32, #tpu.memory_space<smem>>
    %414 = vector.broadcast %413 : f32 to vector<2x384xf32>
    %415 = arith.mulf %414, %408 : vector<2x384xf32>
    %416 = arith.addf %398, %415 : vector<2x384xf32>
    %c2_167 = arith.constant 2 : index
    %c17_168 = arith.constant 17 : index
    %417 = memref.load %arg2[%c2_167, %c17_168] : memref<4x25xf32, #tpu.memory_space<smem>>
    %418 = vector.broadcast %417 : f32 to vector<2x384xf32>
    %419 = arith.mulf %418, %408 : vector<2x384xf32>
    %420 = arith.addf %402, %419 : vector<2x384xf32>
    %c3_169 = arith.constant 3 : index
    %c17_170 = arith.constant 17 : index
    %421 = memref.load %arg2[%c3_169, %c17_170] : memref<4x25xf32, #tpu.memory_space<smem>>
    %422 = vector.broadcast %421 : f32 to vector<2x384xf32>
    %423 = arith.mulf %422, %408 : vector<2x384xf32>
    %424 = arith.addf %406, %423 : vector<2x384xf32>
    %c0_171 = arith.constant 0 : index
    %c0_172 = arith.constant 0 : index
    %c63 = arith.constant 63 : index
    %425 = vector.load %arg1[%c0_171, %c0_172, %c63] : memref<1x2x512xf32, #tpu.memory_space<vmem>>, vector<1x2x384xf32>
    %426 = vector.shape_cast %425 : vector<1x2x384xf32> to vector<2x384xf32>
    %c0_173 = arith.constant 0 : index
    %c18 = arith.constant 18 : index
    %427 = memref.load %arg2[%c0_173, %c18] : memref<4x25xf32, #tpu.memory_space<smem>>
    %428 = vector.broadcast %427 : f32 to vector<2x384xf32>
    %429 = arith.mulf %428, %426 : vector<2x384xf32>
    %430 = arith.addf %412, %429 : vector<2x384xf32>
    %c1_174 = arith.constant 1 : index
    %c18_175 = arith.constant 18 : index
    %431 = memref.load %arg2[%c1_174, %c18_175] : memref<4x25xf32, #tpu.memory_space<smem>>
    %432 = vector.broadcast %431 : f32 to vector<2x384xf32>
    %433 = arith.mulf %432, %426 : vector<2x384xf32>
    %434 = arith.addf %416, %433 : vector<2x384xf32>
    %c2_176 = arith.constant 2 : index
    %c18_177 = arith.constant 18 : index
    %435 = memref.load %arg2[%c2_176, %c18_177] : memref<4x25xf32, #tpu.memory_space<smem>>
    %436 = vector.broadcast %435 : f32 to vector<2x384xf32>
    %437 = arith.mulf %436, %426 : vector<2x384xf32>
    %438 = arith.addf %420, %437 : vector<2x384xf32>
    %c3_178 = arith.constant 3 : index
    %c18_179 = arith.constant 18 : index
    %439 = memref.load %arg2[%c3_178, %c18_179] : memref<4x25xf32, #tpu.memory_space<smem>>
    %440 = vector.broadcast %439 : f32 to vector<2x384xf32>
    %441 = arith.mulf %440, %426 : vector<2x384xf32>
    %442 = arith.addf %424, %441 : vector<2x384xf32>
    %c0_180 = arith.constant 0 : index
    %c0_181 = arith.constant 0 : index
    %c64 = arith.constant 64 : index
    %443 = vector.load %arg1[%c0_180, %c0_181, %c64] : memref<1x2x512xf32, #tpu.memory_space<vmem>>, vector<1x2x384xf32>
    %444 = vector.shape_cast %443 : vector<1x2x384xf32> to vector<2x384xf32>
    %c0_182 = arith.constant 0 : index
    %c19 = arith.constant 19 : index
    %445 = memref.load %arg2[%c0_182, %c19] : memref<4x25xf32, #tpu.memory_space<smem>>
    %446 = vector.broadcast %445 : f32 to vector<2x384xf32>
    %447 = arith.mulf %446, %444 : vector<2x384xf32>
    %448 = arith.addf %430, %447 : vector<2x384xf32>
    %c1_183 = arith.constant 1 : index
    %c19_184 = arith.constant 19 : index
    %449 = memref.load %arg2[%c1_183, %c19_184] : memref<4x25xf32, #tpu.memory_space<smem>>
    %450 = vector.broadcast %449 : f32 to vector<2x384xf32>
    %451 = arith.mulf %450, %444 : vector<2x384xf32>
    %452 = arith.addf %434, %451 : vector<2x384xf32>
    %c2_185 = arith.constant 2 : index
    %c19_186 = arith.constant 19 : index
    %453 = memref.load %arg2[%c2_185, %c19_186] : memref<4x25xf32, #tpu.memory_space<smem>>
    %454 = vector.broadcast %453 : f32 to vector<2x384xf32>
    %455 = arith.mulf %454, %444 : vector<2x384xf32>
    %456 = arith.addf %438, %455 : vector<2x384xf32>
    %c3_187 = arith.constant 3 : index
    %c19_188 = arith.constant 19 : index
    %457 = memref.load %arg2[%c3_187, %c19_188] : memref<4x25xf32, #tpu.memory_space<smem>>
    %458 = vector.broadcast %457 : f32 to vector<2x384xf32>
    %459 = arith.mulf %458, %444 : vector<2x384xf32>
    %460 = arith.addf %442, %459 : vector<2x384xf32>
    %c0_189 = arith.constant 0 : index
    %c0_190 = arith.constant 0 : index
    %c80 = arith.constant 80 : index
    %461 = vector.load %arg1[%c0_189, %c0_190, %c80] : memref<1x2x512xf32, #tpu.memory_space<vmem>>, vector<1x2x384xf32>
    %462 = vector.shape_cast %461 : vector<1x2x384xf32> to vector<2x384xf32>
    %c0_191 = arith.constant 0 : index
    %c20_192 = arith.constant 20 : index
    %463 = memref.load %arg2[%c0_191, %c20_192] : memref<4x25xf32, #tpu.memory_space<smem>>
    %464 = vector.broadcast %463 : f32 to vector<2x384xf32>
    %465 = arith.mulf %464, %462 : vector<2x384xf32>
    %466 = arith.addf %448, %465 : vector<2x384xf32>
    %c1_193 = arith.constant 1 : index
    %c20_194 = arith.constant 20 : index
    %467 = memref.load %arg2[%c1_193, %c20_194] : memref<4x25xf32, #tpu.memory_space<smem>>
    %468 = vector.broadcast %467 : f32 to vector<2x384xf32>
    %469 = arith.mulf %468, %462 : vector<2x384xf32>
    %470 = arith.addf %452, %469 : vector<2x384xf32>
    %c2_195 = arith.constant 2 : index
    %c20_196 = arith.constant 20 : index
    %471 = memref.load %arg2[%c2_195, %c20_196] : memref<4x25xf32, #tpu.memory_space<smem>>
    %472 = vector.broadcast %471 : f32 to vector<2x384xf32>
    %473 = arith.mulf %472, %462 : vector<2x384xf32>
    %474 = arith.addf %456, %473 : vector<2x384xf32>
    %c3_197 = arith.constant 3 : index
    %c20_198 = arith.constant 20 : index
    %475 = memref.load %arg2[%c3_197, %c20_198] : memref<4x25xf32, #tpu.memory_space<smem>>
    %476 = vector.broadcast %475 : f32 to vector<2x384xf32>
    %477 = arith.mulf %476, %462 : vector<2x384xf32>
    %478 = arith.addf %460, %477 : vector<2x384xf32>
    %c0_199 = arith.constant 0 : index
    %c0_200 = arith.constant 0 : index
    %c81 = arith.constant 81 : index
    %479 = vector.load %arg1[%c0_199, %c0_200, %c81] : memref<1x2x512xf32, #tpu.memory_space<vmem>>, vector<1x2x384xf32>
    %480 = vector.shape_cast %479 : vector<1x2x384xf32> to vector<2x384xf32>
    %c0_201 = arith.constant 0 : index
    %c21_202 = arith.constant 21 : index
    %481 = memref.load %arg2[%c0_201, %c21_202] : memref<4x25xf32, #tpu.memory_space<smem>>
    %482 = vector.broadcast %481 : f32 to vector<2x384xf32>
    %483 = arith.mulf %482, %480 : vector<2x384xf32>
    %484 = arith.addf %466, %483 : vector<2x384xf32>
    %c1_203 = arith.constant 1 : index
    %c21_204 = arith.constant 21 : index
    %485 = memref.load %arg2[%c1_203, %c21_204] : memref<4x25xf32, #tpu.memory_space<smem>>
    %486 = vector.broadcast %485 : f32 to vector<2x384xf32>
    %487 = arith.mulf %486, %480 : vector<2x384xf32>
    %488 = arith.addf %470, %487 : vector<2x384xf32>
    %c2_205 = arith.constant 2 : index
    %c21_206 = arith.constant 21 : index
    %489 = memref.load %arg2[%c2_205, %c21_206] : memref<4x25xf32, #tpu.memory_space<smem>>
    %490 = vector.broadcast %489 : f32 to vector<2x384xf32>
    %491 = arith.mulf %490, %480 : vector<2x384xf32>
    %492 = arith.addf %474, %491 : vector<2x384xf32>
    %c3_207 = arith.constant 3 : index
    %c21_208 = arith.constant 21 : index
    %493 = memref.load %arg2[%c3_207, %c21_208] : memref<4x25xf32, #tpu.memory_space<smem>>
    %494 = vector.broadcast %493 : f32 to vector<2x384xf32>
    %495 = arith.mulf %494, %480 : vector<2x384xf32>
    %496 = arith.addf %478, %495 : vector<2x384xf32>
    %c0_209 = arith.constant 0 : index
    %c0_210 = arith.constant 0 : index
    %c82 = arith.constant 82 : index
    %497 = vector.load %arg1[%c0_209, %c0_210, %c82] : memref<1x2x512xf32, #tpu.memory_space<vmem>>, vector<1x2x384xf32>
    %498 = vector.shape_cast %497 : vector<1x2x384xf32> to vector<2x384xf32>
    %c0_211 = arith.constant 0 : index
    %c22_212 = arith.constant 22 : index
    %499 = memref.load %arg2[%c0_211, %c22_212] : memref<4x25xf32, #tpu.memory_space<smem>>
    %500 = vector.broadcast %499 : f32 to vector<2x384xf32>
    %501 = arith.mulf %500, %498 : vector<2x384xf32>
    %502 = arith.addf %484, %501 : vector<2x384xf32>
    %c1_213 = arith.constant 1 : index
    %c22_214 = arith.constant 22 : index
    %503 = memref.load %arg2[%c1_213, %c22_214] : memref<4x25xf32, #tpu.memory_space<smem>>
    %504 = vector.broadcast %503 : f32 to vector<2x384xf32>
    %505 = arith.mulf %504, %498 : vector<2x384xf32>
    %506 = arith.addf %488, %505 : vector<2x384xf32>
    %c2_215 = arith.constant 2 : index
    %c22_216 = arith.constant 22 : index
    %507 = memref.load %arg2[%c2_215, %c22_216] : memref<4x25xf32, #tpu.memory_space<smem>>
    %508 = vector.broadcast %507 : f32 to vector<2x384xf32>
    %509 = arith.mulf %508, %498 : vector<2x384xf32>
    %510 = arith.addf %492, %509 : vector<2x384xf32>
    %c3_217 = arith.constant 3 : index
    %c22_218 = arith.constant 22 : index
    %511 = memref.load %arg2[%c3_217, %c22_218] : memref<4x25xf32, #tpu.memory_space<smem>>
    %512 = vector.broadcast %511 : f32 to vector<2x384xf32>
    %513 = arith.mulf %512, %498 : vector<2x384xf32>
    %514 = arith.addf %496, %513 : vector<2x384xf32>
    %c0_219 = arith.constant 0 : index
    %c0_220 = arith.constant 0 : index
    %c83 = arith.constant 83 : index
    %515 = vector.load %arg1[%c0_219, %c0_220, %c83] : memref<1x2x512xf32, #tpu.memory_space<vmem>>, vector<1x2x384xf32>
    %516 = vector.shape_cast %515 : vector<1x2x384xf32> to vector<2x384xf32>
    %c0_221 = arith.constant 0 : index
    %c23_222 = arith.constant 23 : index
    %517 = memref.load %arg2[%c0_221, %c23_222] : memref<4x25xf32, #tpu.memory_space<smem>>
    %518 = vector.broadcast %517 : f32 to vector<2x384xf32>
    %519 = arith.mulf %518, %516 : vector<2x384xf32>
    %520 = arith.addf %502, %519 : vector<2x384xf32>
    %c1_223 = arith.constant 1 : index
    %c23_224 = arith.constant 23 : index
    %521 = memref.load %arg2[%c1_223, %c23_224] : memref<4x25xf32, #tpu.memory_space<smem>>
    %522 = vector.broadcast %521 : f32 to vector<2x384xf32>
    %523 = arith.mulf %522, %516 : vector<2x384xf32>
    %524 = arith.addf %506, %523 : vector<2x384xf32>
    %c2_225 = arith.constant 2 : index
    %c23_226 = arith.constant 23 : index
    %525 = memref.load %arg2[%c2_225, %c23_226] : memref<4x25xf32, #tpu.memory_space<smem>>
    %526 = vector.broadcast %525 : f32 to vector<2x384xf32>
    %527 = arith.mulf %526, %516 : vector<2x384xf32>
    %528 = arith.addf %510, %527 : vector<2x384xf32>
    %c3_227 = arith.constant 3 : index
    %c23_228 = arith.constant 23 : index
    %529 = memref.load %arg2[%c3_227, %c23_228] : memref<4x25xf32, #tpu.memory_space<smem>>
    %530 = vector.broadcast %529 : f32 to vector<2x384xf32>
    %531 = arith.mulf %530, %516 : vector<2x384xf32>
    %532 = arith.addf %514, %531 : vector<2x384xf32>
    %c0_229 = arith.constant 0 : index
    %c0_230 = arith.constant 0 : index
    %c84 = arith.constant 84 : index
    %533 = vector.load %arg1[%c0_229, %c0_230, %c84] : memref<1x2x512xf32, #tpu.memory_space<vmem>>, vector<1x2x384xf32>
    %534 = vector.shape_cast %533 : vector<1x2x384xf32> to vector<2x384xf32>
    %c0_231 = arith.constant 0 : index
    %c24_232 = arith.constant 24 : index
    %535 = memref.load %arg2[%c0_231, %c24_232] : memref<4x25xf32, #tpu.memory_space<smem>>
    %536 = vector.broadcast %535 : f32 to vector<2x384xf32>
    %537 = arith.mulf %536, %534 : vector<2x384xf32>
    %538 = arith.addf %520, %537 : vector<2x384xf32>
    %c1_233 = arith.constant 1 : index
    %c24_234 = arith.constant 24 : index
    %539 = memref.load %arg2[%c1_233, %c24_234] : memref<4x25xf32, #tpu.memory_space<smem>>
    %540 = vector.broadcast %539 : f32 to vector<2x384xf32>
    %541 = arith.mulf %540, %534 : vector<2x384xf32>
    %542 = arith.addf %524, %541 : vector<2x384xf32>
    %c2_235 = arith.constant 2 : index
    %c24_236 = arith.constant 24 : index
    %543 = memref.load %arg2[%c2_235, %c24_236] : memref<4x25xf32, #tpu.memory_space<smem>>
    %544 = vector.broadcast %543 : f32 to vector<2x384xf32>
    %545 = arith.mulf %544, %534 : vector<2x384xf32>
    %546 = arith.addf %528, %545 : vector<2x384xf32>
    %c3_237 = arith.constant 3 : index
    %c24_238 = arith.constant 24 : index
    %547 = memref.load %arg2[%c3_237, %c24_238] : memref<4x25xf32, #tpu.memory_space<smem>>
    %548 = vector.broadcast %547 : f32 to vector<2x384xf32>
    %549 = arith.mulf %548, %534 : vector<2x384xf32>
    %550 = arith.addf %532, %549 : vector<2x384xf32>
    %cst = arith.constant 0.000000e+00 : f32
    %551 = vector.broadcast %cst : f32 to vector<4x2x128xf32>
    %c0_239 = arith.constant 0 : index
    %c0_240 = arith.constant 0 : index
    %c0_241 = arith.constant 0 : index
    %552 = vector.load %arg7[%c0_239, %c0_240, %c0_241] : memref<4x2x640xf32, #tpu.memory_space<vmem>>, vector<4x2x128xf32>
    tpu.vector_store %arg7[%c0_239, %c0_240, %c0_241], %551 {strides = array<i32>} : memref<4x2x640xf32, #tpu.memory_space<vmem>>, vector<4x2x128xf32>,
    %cst_242 = arith.constant 0.000000e+00 : f32
    %553 = vector.broadcast %cst_242 : f32 to vector<4x2x128xf32>
    %c0_243 = arith.constant 0 : index
    %c0_244 = arith.constant 0 : index
    %c512 = arith.constant 512 : index
    %554 = vector.load %arg7[%c0_243, %c0_244, %c512] : memref<4x2x640xf32, #tpu.memory_space<vmem>>, vector<4x2x128xf32>
    tpu.vector_store %arg7[%c0_243, %c0_244, %c512], %553 {strides = array<i32>} : memref<4x2x640xf32, #tpu.memory_space<vmem>>, vector<4x2x128xf32>,
    %cst_245 = arith.constant 0.000000e+00 : f32
    %555 = vector.broadcast %cst_245 : f32 to vector<2x384xf32>
    %556 = arith.maximumf %538, %555 : vector<2x384xf32>
    %cst_246 = arith.constant 0.000000e+00 : f32
    %557 = vector.shape_cast %92 : vector<1x384xi1> to vector<1x384xi1>
    %558 = vector.broadcast %557 : vector<1x384xi1> to vector<2x384xi1>
    %559 = vector.broadcast %cst_246 : f32 to vector<2x384xf32>
    %560 = arith.select %558, %556, %559 : vector<2x384xi1>, vector<2x384xf32>
    %c0_247 = arith.constant 0 : index
    %c0_248 = arith.constant 0 : index
    %c128 = arith.constant 128 : index
    %561 = vector.load %arg7[%c0_247, %c0_248, %c128] : memref<4x2x640xf32, #tpu.memory_space<vmem>>, vector<1x2x384xf32>
    %562 = vector.shape_cast %561 : vector<1x2x384xf32> to vector<2x384xf32>
    %563 = vector.shape_cast %560 : vector<2x384xf32> to vector<1x2x384xf32>
    tpu.vector_store %arg7[%c0_247, %c0_248, %c128], %563 {strides = array<i32>} : memref<4x2x640xf32, #tpu.memory_space<vmem>>, vector<1x2x384xf32>,
    %cst_249 = arith.constant 0.000000e+00 : f32
    %564 = vector.broadcast %cst_249 : f32 to vector<2x384xf32>
    %565 = arith.maximumf %542, %564 : vector<2x384xf32>
    %cst_250 = arith.constant 0.000000e+00 : f32
    %566 = vector.shape_cast %92 : vector<1x384xi1> to vector<1x384xi1>
    %567 = vector.broadcast %566 : vector<1x384xi1> to vector<2x384xi1>
    %568 = vector.broadcast %cst_250 : f32 to vector<2x384xf32>
    %569 = arith.select %567, %565, %568 : vector<2x384xi1>, vector<2x384xf32>
    %c1_251 = arith.constant 1 : index
    %c0_252 = arith.constant 0 : index
    %c128_253 = arith.constant 128 : index
    %570 = vector.load %arg7[%c1_251, %c0_252, %c128_253] : memref<4x2x640xf32, #tpu.memory_space<vmem>>, vector<1x2x384xf32>
    %571 = vector.shape_cast %570 : vector<1x2x384xf32> to vector<2x384xf32>
    %572 = vector.shape_cast %569 : vector<2x384xf32> to vector<1x2x384xf32>
    tpu.vector_store %arg7[%c1_251, %c0_252, %c128_253], %572 {strides = array<i32>} : memref<4x2x640xf32, #tpu.memory_space<vmem>>, vector<1x2x384xf32>,
    %cst_254 = arith.constant 0.000000e+00 : f32
    %573 = vector.broadcast %cst_254 : f32 to vector<2x384xf32>
    %574 = arith.maximumf %546, %573 : vector<2x384xf32>
    %cst_255 = arith.constant 0.000000e+00 : f32
    %575 = vector.shape_cast %92 : vector<1x384xi1> to vector<1x384xi1>
    %576 = vector.broadcast %575 : vector<1x384xi1> to vector<2x384xi1>
    %577 = vector.broadcast %cst_255 : f32 to vector<2x384xf32>
    %578 = arith.select %576, %574, %577 : vector<2x384xi1>, vector<2x384xf32>
    %c2_256 = arith.constant 2 : index
    %c0_257 = arith.constant 0 : index
    %c128_258 = arith.constant 128 : index
    %579 = vector.load %arg7[%c2_256, %c0_257, %c128_258] : memref<4x2x640xf32, #tpu.memory_space<vmem>>, vector<1x2x384xf32>
    %580 = vector.shape_cast %579 : vector<1x2x384xf32> to vector<2x384xf32>
    %581 = vector.shape_cast %578 : vector<2x384xf32> to vector<1x2x384xf32>
    tpu.vector_store %arg7[%c2_256, %c0_257, %c128_258], %581 {strides = array<i32>} : memref<4x2x640xf32, #tpu.memory_space<vmem>>, vector<1x2x384xf32>,
    %cst_259 = arith.constant 0.000000e+00 : f32
    %582 = vector.broadcast %cst_259 : f32 to vector<2x384xf32>
    %583 = arith.maximumf %550, %582 : vector<2x384xf32>
    %cst_260 = arith.constant 0.000000e+00 : f32
    %584 = vector.shape_cast %92 : vector<1x384xi1> to vector<1x384xi1>
    %585 = vector.broadcast %584 : vector<1x384xi1> to vector<2x384xi1>
    %586 = vector.broadcast %cst_260 : f32 to vector<2x384xf32>
    %587 = arith.select %585, %583, %586 : vector<2x384xi1>, vector<2x384xf32>
    %c3_261 = arith.constant 3 : index
    %c0_262 = arith.constant 0 : index
    %c128_263 = arith.constant 128 : index
    %588 = vector.load %arg7[%c3_261, %c0_262, %c128_263] : memref<4x2x640xf32, #tpu.memory_space<vmem>>, vector<1x2x384xf32>
    %589 = vector.shape_cast %588 : vector<1x2x384xf32> to vector<2x384xf32>
    %590 = vector.shape_cast %587 : vector<2x384xf32> to vector<1x2x384xf32>
    tpu.vector_store %arg7[%c3_261, %c0_262, %c128_263], %590 {strides = array<i32>} : memref<4x2x640xf32, #tpu.memory_space<vmem>>, vector<1x2x384xf32>,
    %c0_264 = arith.constant 0 : index
    %591 = memref.load %arg5[%c0_264] : memref<1xf32, #tpu.memory_space<smem>>
    %592 = vector.broadcast %591 : f32 to vector<2x384xf32>
    %c0_265 = arith.constant 0 : index
    %c0_266 = arith.constant 0 : index
    %593 = memref.load %arg4[%c0_265, %c0_266] : memref<4x25xf32, #tpu.memory_space<smem>>
    %c0_267 = arith.constant 0 : index
    %c0_268 = arith.constant 0 : index
    %c86 = arith.constant 86 : index
    %594 = vector.load %arg7[%c0_267, %c0_268, %c86] : memref<4x2x640xf32, #tpu.memory_space<vmem>>, vector<1x2x384xf32>
    %595 = vector.shape_cast %594 : vector<1x2x384xf32> to vector<2x384xf32>
    %596 = vector.broadcast %593 : f32 to vector<2x384xf32>
    %597 = arith.mulf %596, %595 : vector<2x384xf32>
    %c0_269 = arith.constant 0 : index
    %c1_270 = arith.constant 1 : index
    %598 = memref.load %arg4[%c0_269, %c1_270] : memref<4x25xf32, #tpu.memory_space<smem>>
    %c0_271 = arith.constant 0 : index
    %c0_272 = arith.constant 0 : index
    %c87 = arith.constant 87 : index
    %599 = vector.load %arg7[%c0_271, %c0_272, %c87] : memref<4x2x640xf32, #tpu.memory_space<vmem>>, vector<1x2x384xf32>
    %600 = vector.shape_cast %599 : vector<1x2x384xf32> to vector<2x384xf32>
    %601 = vector.broadcast %598 : f32 to vector<2x384xf32>
    %602 = arith.mulf %601, %600 : vector<2x384xf32>
    %603 = arith.addf %597, %602 : vector<2x384xf32>
    %c0_273 = arith.constant 0 : index
    %c2_274 = arith.constant 2 : index
    %604 = memref.load %arg4[%c0_273, %c2_274] : memref<4x25xf32, #tpu.memory_space<smem>>
    %c0_275 = arith.constant 0 : index
    %c0_276 = arith.constant 0 : index
    %c88 = arith.constant 88 : index
    %605 = vector.load %arg7[%c0_275, %c0_276, %c88] : memref<4x2x640xf32, #tpu.memory_space<vmem>>, vector<1x2x384xf32>
    %606 = vector.shape_cast %605 : vector<1x2x384xf32> to vector<2x384xf32>
    %607 = vector.broadcast %604 : f32 to vector<2x384xf32>
    %608 = arith.mulf %607, %606 : vector<2x384xf32>
    %609 = arith.addf %603, %608 : vector<2x384xf32>
    %c0_277 = arith.constant 0 : index
    %c3_278 = arith.constant 3 : index
    %610 = memref.load %arg4[%c0_277, %c3_278] : memref<4x25xf32, #tpu.memory_space<smem>>
    %c0_279 = arith.constant 0 : index
    %c0_280 = arith.constant 0 : index
    %c89 = arith.constant 89 : index
    %611 = vector.load %arg7[%c0_279, %c0_280, %c89] : memref<4x2x640xf32, #tpu.memory_space<vmem>>, vector<1x2x384xf32>
    %612 = vector.shape_cast %611 : vector<1x2x384xf32> to vector<2x384xf32>
    %613 = vector.broadcast %610 : f32 to vector<2x384xf32>
    %614 = arith.mulf %613, %612 : vector<2x384xf32>
    %615 = arith.addf %609, %614 : vector<2x384xf32>
    %c0_281 = arith.constant 0 : index
    %c4_282 = arith.constant 4 : index
    %616 = memref.load %arg4[%c0_281, %c4_282] : memref<4x25xf32, #tpu.memory_space<smem>>
    %c0_283 = arith.constant 0 : index
    %c0_284 = arith.constant 0 : index
    %c90 = arith.constant 90 : index
    %617 = vector.load %arg7[%c0_283, %c0_284, %c90] : memref<4x2x640xf32, #tpu.memory_space<vmem>>, vector<1x2x384xf32>
    %618 = vector.shape_cast %617 : vector<1x2x384xf32> to vector<2x384xf32>
    %619 = vector.broadcast %616 : f32 to vector<2x384xf32>
    %620 = arith.mulf %619, %618 : vector<2x384xf32>
    %621 = arith.addf %615, %620 : vector<2x384xf32>
    %c0_285 = arith.constant 0 : index
    %c5_286 = arith.constant 5 : index
    %622 = memref.load %arg4[%c0_285, %c5_286] : memref<4x25xf32, #tpu.memory_space<smem>>
    %c0_287 = arith.constant 0 : index
    %c0_288 = arith.constant 0 : index
    %c106 = arith.constant 106 : index
    %623 = vector.load %arg7[%c0_287, %c0_288, %c106] : memref<4x2x640xf32, #tpu.memory_space<vmem>>, vector<1x2x384xf32>
    %624 = vector.shape_cast %623 : vector<1x2x384xf32> to vector<2x384xf32>
    %625 = vector.broadcast %622 : f32 to vector<2x384xf32>
    %626 = arith.mulf %625, %624 : vector<2x384xf32>
    %627 = arith.addf %621, %626 : vector<2x384xf32>
    %c0_289 = arith.constant 0 : index
    %c6_290 = arith.constant 6 : index
    %628 = memref.load %arg4[%c0_289, %c6_290] : memref<4x25xf32, #tpu.memory_space<smem>>
    %c0_291 = arith.constant 0 : index
    %c0_292 = arith.constant 0 : index
    %c107 = arith.constant 107 : index
    %629 = vector.load %arg7[%c0_291, %c0_292, %c107] : memref<4x2x640xf32, #tpu.memory_space<vmem>>, vector<1x2x384xf32>
    %630 = vector.shape_cast %629 : vector<1x2x384xf32> to vector<2x384xf32>
    %631 = vector.broadcast %628 : f32 to vector<2x384xf32>
    %632 = arith.mulf %631, %630 : vector<2x384xf32>
    %633 = arith.addf %627, %632 : vector<2x384xf32>
    %c0_293 = arith.constant 0 : index
    %c7_294 = arith.constant 7 : index
    %634 = memref.load %arg4[%c0_293, %c7_294] : memref<4x25xf32, #tpu.memory_space<smem>>
    %c0_295 = arith.constant 0 : index
    %c0_296 = arith.constant 0 : index
    %c108 = arith.constant 108 : index
    %635 = vector.load %arg7[%c0_295, %c0_296, %c108] : memref<4x2x640xf32, #tpu.memory_space<vmem>>, vector<1x2x384xf32>
    %636 = vector.shape_cast %635 : vector<1x2x384xf32> to vector<2x384xf32>
    %637 = vector.broadcast %634 : f32 to vector<2x384xf32>
    %638 = arith.mulf %637, %636 : vector<2x384xf32>
    %639 = arith.addf %633, %638 : vector<2x384xf32>
    %c0_297 = arith.constant 0 : index
    %c8_298 = arith.constant 8 : index
    %640 = memref.load %arg4[%c0_297, %c8_298] : memref<4x25xf32, #tpu.memory_space<smem>>
    %c0_299 = arith.constant 0 : index
    %c0_300 = arith.constant 0 : index
    %c109 = arith.constant 109 : index
    %641 = vector.load %arg7[%c0_299, %c0_300, %c109] : memref<4x2x640xf32, #tpu.memory_space<vmem>>, vector<1x2x384xf32>
    %642 = vector.shape_cast %641 : vector<1x2x384xf32> to vector<2x384xf32>
    %643 = vector.broadcast %640 : f32 to vector<2x384xf32>
    %644 = arith.mulf %643, %642 : vector<2x384xf32>
    %645 = arith.addf %639, %644 : vector<2x384xf32>
    %c0_301 = arith.constant 0 : index
    %c9_302 = arith.constant 9 : index
    %646 = memref.load %arg4[%c0_301, %c9_302] : memref<4x25xf32, #tpu.memory_space<smem>>
    %c0_303 = arith.constant 0 : index
    %c0_304 = arith.constant 0 : index
    %c110 = arith.constant 110 : index
    %647 = vector.load %arg7[%c0_303, %c0_304, %c110] : memref<4x2x640xf32, #tpu.memory_space<vmem>>, vector<1x2x384xf32>
    %648 = vector.shape_cast %647 : vector<1x2x384xf32> to vector<2x384xf32>
    %649 = vector.broadcast %646 : f32 to vector<2x384xf32>
    %650 = arith.mulf %649, %648 : vector<2x384xf32>
    %651 = arith.addf %645, %650 : vector<2x384xf32>
    %c0_305 = arith.constant 0 : index
    %c10_306 = arith.constant 10 : index
    %652 = memref.load %arg4[%c0_305, %c10_306] : memref<4x25xf32, #tpu.memory_space<smem>>
    %c0_307 = arith.constant 0 : index
    %c0_308 = arith.constant 0 : index
    %c126 = arith.constant 126 : index
    %653 = vector.load %arg7[%c0_307, %c0_308, %c126] : memref<4x2x640xf32, #tpu.memory_space<vmem>>, vector<1x2x384xf32>
    %654 = vector.shape_cast %653 : vector<1x2x384xf32> to vector<2x384xf32>
    %655 = vector.broadcast %652 : f32 to vector<2x384xf32>
    %656 = arith.mulf %655, %654 : vector<2x384xf32>
    %657 = arith.addf %651, %656 : vector<2x384xf32>
    %c0_309 = arith.constant 0 : index
    %c11_310 = arith.constant 11 : index
    %658 = memref.load %arg4[%c0_309, %c11_310] : memref<4x25xf32, #tpu.memory_space<smem>>
    %c0_311 = arith.constant 0 : index
    %c0_312 = arith.constant 0 : index
    %c127 = arith.constant 127 : index
    %659 = vector.load %arg7[%c0_311, %c0_312, %c127] : memref<4x2x640xf32, #tpu.memory_space<vmem>>, vector<1x2x384xf32>
    %660 = vector.shape_cast %659 : vector<1x2x384xf32> to vector<2x384xf32>
    %661 = vector.broadcast %658 : f32 to vector<2x384xf32>
    %662 = arith.mulf %661, %660 : vector<2x384xf32>
    %663 = arith.addf %657, %662 : vector<2x384xf32>
    %c0_313 = arith.constant 0 : index
    %c12_314 = arith.constant 12 : index
    %664 = memref.load %arg4[%c0_313, %c12_314] : memref<4x25xf32, #tpu.memory_space<smem>>
    %c0_315 = arith.constant 0 : index
    %c0_316 = arith.constant 0 : index
    %c128_317 = arith.constant 128 : index
    %665 = vector.load %arg7[%c0_315, %c0_316, %c128_317] : memref<4x2x640xf32, #tpu.memory_space<vmem>>, vector<1x2x384xf32>
    %666 = vector.shape_cast %665 : vector<1x2x384xf32> to vector<2x384xf32>
    %667 = vector.broadcast %664 : f32 to vector<2x384xf32>
    %668 = arith.mulf %667, %666 : vector<2x384xf32>
    %669 = arith.addf %663, %668 : vector<2x384xf32>
    %c0_318 = arith.constant 0 : index
    %c13_319 = arith.constant 13 : index
    %670 = memref.load %arg4[%c0_318, %c13_319] : memref<4x25xf32, #tpu.memory_space<smem>>
    %c0_320 = arith.constant 0 : index
    %c0_321 = arith.constant 0 : index
    %c129 = arith.constant 129 : index
    %671 = vector.load %arg7[%c0_320, %c0_321, %c129] : memref<4x2x640xf32, #tpu.memory_space<vmem>>, vector<1x2x384xf32>
    %672 = vector.shape_cast %671 : vector<1x2x384xf32> to vector<2x384xf32>
    %673 = vector.broadcast %670 : f32 to vector<2x384xf32>
    %674 = arith.mulf %673, %672 : vector<2x384xf32>
    %675 = arith.addf %669, %674 : vector<2x384xf32>
    %c0_322 = arith.constant 0 : index
    %c14_323 = arith.constant 14 : index
    %676 = memref.load %arg4[%c0_322, %c14_323] : memref<4x25xf32, #tpu.memory_space<smem>>
    %c0_324 = arith.constant 0 : index
    %c0_325 = arith.constant 0 : index
    %c130 = arith.constant 130 : index
    %677 = vector.load %arg7[%c0_324, %c0_325, %c130] : memref<4x2x640xf32, #tpu.memory_space<vmem>>, vector<1x2x384xf32>
    %678 = vector.shape_cast %677 : vector<1x2x384xf32> to vector<2x384xf32>
    %679 = vector.broadcast %676 : f32 to vector<2x384xf32>
    %680 = arith.mulf %679, %678 : vector<2x384xf32>
    %681 = arith.addf %675, %680 : vector<2x384xf32>
    %c0_326 = arith.constant 0 : index
    %c15_327 = arith.constant 15 : index
    %682 = memref.load %arg4[%c0_326, %c15_327] : memref<4x25xf32, #tpu.memory_space<smem>>
    %c0_328 = arith.constant 0 : index
    %c0_329 = arith.constant 0 : index
    %c146 = arith.constant 146 : index
    %683 = vector.load %arg7[%c0_328, %c0_329, %c146] : memref<4x2x640xf32, #tpu.memory_space<vmem>>, vector<1x2x384xf32>
    %684 = vector.shape_cast %683 : vector<1x2x384xf32> to vector<2x384xf32>
    %685 = vector.broadcast %682 : f32 to vector<2x384xf32>
    %686 = arith.mulf %685, %684 : vector<2x384xf32>
    %687 = arith.addf %681, %686 : vector<2x384xf32>
    %c0_330 = arith.constant 0 : index
    %c16_331 = arith.constant 16 : index
    %688 = memref.load %arg4[%c0_330, %c16_331] : memref<4x25xf32, #tpu.memory_space<smem>>
    %c0_332 = arith.constant 0 : index
    %c0_333 = arith.constant 0 : index
    %c147 = arith.constant 147 : index
    %689 = vector.load %arg7[%c0_332, %c0_333, %c147] : memref<4x2x640xf32, #tpu.memory_space<vmem>>, vector<1x2x384xf32>
    %690 = vector.shape_cast %689 : vector<1x2x384xf32> to vector<2x384xf32>
    %691 = vector.broadcast %688 : f32 to vector<2x384xf32>
    %692 = arith.mulf %691, %690 : vector<2x384xf32>
    %693 = arith.addf %687, %692 : vector<2x384xf32>
    %c0_334 = arith.constant 0 : index
    %c17_335 = arith.constant 17 : index
    %694 = memref.load %arg4[%c0_334, %c17_335] : memref<4x25xf32, #tpu.memory_space<smem>>
    %c0_336 = arith.constant 0 : index
    %c0_337 = arith.constant 0 : index
    %c148 = arith.constant 148 : index
    %695 = vector.load %arg7[%c0_336, %c0_337, %c148] : memref<4x2x640xf32, #tpu.memory_space<vmem>>, vector<1x2x384xf32>
    %696 = vector.shape_cast %695 : vector<1x2x384xf32> to vector<2x384xf32>
    %697 = vector.broadcast %694 : f32 to vector<2x384xf32>
    %698 = arith.mulf %697, %696 : vector<2x384xf32>
    %699 = arith.addf %693, %698 : vector<2x384xf32>
    %c0_338 = arith.constant 0 : index
    %c18_339 = arith.constant 18 : index
    %700 = memref.load %arg4[%c0_338, %c18_339] : memref<4x25xf32, #tpu.memory_space<smem>>
    %c0_340 = arith.constant 0 : index
    %c0_341 = arith.constant 0 : index
    %c149 = arith.constant 149 : index
    %701 = vector.load %arg7[%c0_340, %c0_341, %c149] : memref<4x2x640xf32, #tpu.memory_space<vmem>>, vector<1x2x384xf32>
    %702 = vector.shape_cast %701 : vector<1x2x384xf32> to vector<2x384xf32>
    %703 = vector.broadcast %700 : f32 to vector<2x384xf32>
    %704 = arith.mulf %703, %702 : vector<2x384xf32>
    %705 = arith.addf %699, %704 : vector<2x384xf32>
    %c0_342 = arith.constant 0 : index
    %c19_343 = arith.constant 19 : index
    %706 = memref.load %arg4[%c0_342, %c19_343] : memref<4x25xf32, #tpu.memory_space<smem>>
    %c0_344 = arith.constant 0 : index
    %c0_345 = arith.constant 0 : index
    %c150 = arith.constant 150 : index
    %707 = vector.load %arg7[%c0_344, %c0_345, %c150] : memref<4x2x640xf32, #tpu.memory_space<vmem>>, vector<1x2x384xf32>
    %708 = vector.shape_cast %707 : vector<1x2x384xf32> to vector<2x384xf32>
    %709 = vector.broadcast %706 : f32 to vector<2x384xf32>
    %710 = arith.mulf %709, %708 : vector<2x384xf32>
    %711 = arith.addf %705, %710 : vector<2x384xf32>
    %c0_346 = arith.constant 0 : index
    %c20_347 = arith.constant 20 : index
    %712 = memref.load %arg4[%c0_346, %c20_347] : memref<4x25xf32, #tpu.memory_space<smem>>
    %c0_348 = arith.constant 0 : index
    %c0_349 = arith.constant 0 : index
    %c166 = arith.constant 166 : index
    %713 = vector.load %arg7[%c0_348, %c0_349, %c166] : memref<4x2x640xf32, #tpu.memory_space<vmem>>, vector<1x2x384xf32>
    %714 = vector.shape_cast %713 : vector<1x2x384xf32> to vector<2x384xf32>
    %715 = vector.broadcast %712 : f32 to vector<2x384xf32>
    %716 = arith.mulf %715, %714 : vector<2x384xf32>
    %717 = arith.addf %711, %716 : vector<2x384xf32>
    %c0_350 = arith.constant 0 : index
    %c21_351 = arith.constant 21 : index
    %718 = memref.load %arg4[%c0_350, %c21_351] : memref<4x25xf32, #tpu.memory_space<smem>>
    %c0_352 = arith.constant 0 : index
    %c0_353 = arith.constant 0 : index
    %c167 = arith.constant 167 : index
    %719 = vector.load %arg7[%c0_352, %c0_353, %c167] : memref<4x2x640xf32, #tpu.memory_space<vmem>>, vector<1x2x384xf32>
    %720 = vector.shape_cast %719 : vector<1x2x384xf32> to vector<2x384xf32>
    %721 = vector.broadcast %718 : f32 to vector<2x384xf32>
    %722 = arith.mulf %721, %720 : vector<2x384xf32>
    %723 = arith.addf %717, %722 : vector<2x384xf32>
    %c0_354 = arith.constant 0 : index
    %c22_355 = arith.constant 22 : index
    %724 = memref.load %arg4[%c0_354, %c22_355] : memref<4x25xf32, #tpu.memory_space<smem>>
    %c0_356 = arith.constant 0 : index
    %c0_357 = arith.constant 0 : index
    %c168 = arith.constant 168 : index
    %725 = vector.load %arg7[%c0_356, %c0_357, %c168] : memref<4x2x640xf32, #tpu.memory_space<vmem>>, vector<1x2x384xf32>
    %726 = vector.shape_cast %725 : vector<1x2x384xf32> to vector<2x384xf32>
    %727 = vector.broadcast %724 : f32 to vector<2x384xf32>
    %728 = arith.mulf %727, %726 : vector<2x384xf32>
    %729 = arith.addf %723, %728 : vector<2x384xf32>
    %c0_358 = arith.constant 0 : index
    %c23_359 = arith.constant 23 : index
    %730 = memref.load %arg4[%c0_358, %c23_359] : memref<4x25xf32, #tpu.memory_space<smem>>
    %c0_360 = arith.constant 0 : index
    %c0_361 = arith.constant 0 : index
    %c169 = arith.constant 169 : index
    %731 = vector.load %arg7[%c0_360, %c0_361, %c169] : memref<4x2x640xf32, #tpu.memory_space<vmem>>, vector<1x2x384xf32>
    %732 = vector.shape_cast %731 : vector<1x2x384xf32> to vector<2x384xf32>
    %733 = vector.broadcast %730 : f32 to vector<2x384xf32>
    %734 = arith.mulf %733, %732 : vector<2x384xf32>
    %735 = arith.addf %729, %734 : vector<2x384xf32>
    %c0_362 = arith.constant 0 : index
    %c24_363 = arith.constant 24 : index
    %736 = memref.load %arg4[%c0_362, %c24_363] : memref<4x25xf32, #tpu.memory_space<smem>>
    %c0_364 = arith.constant 0 : index
    %c0_365 = arith.constant 0 : index
    %c170 = arith.constant 170 : index
    %737 = vector.load %arg7[%c0_364, %c0_365, %c170] : memref<4x2x640xf32, #tpu.memory_space<vmem>>, vector<1x2x384xf32>
    %738 = vector.shape_cast %737 : vector<1x2x384xf32> to vector<2x384xf32>
    %739 = vector.broadcast %736 : f32 to vector<2x384xf32>
    %740 = arith.mulf %739, %738 : vector<2x384xf32>
    %741 = arith.addf %735, %740 : vector<2x384xf32>
    %742 = arith.addf %592, %741 : vector<2x384xf32>
    %c1_366 = arith.constant 1 : index
    %c0_367 = arith.constant 0 : index
    %743 = memref.load %arg4[%c1_366, %c0_367] : memref<4x25xf32, #tpu.memory_space<smem>>
    %c1_368 = arith.constant 1 : index
    %c0_369 = arith.constant 0 : index
    %c86_370 = arith.constant 86 : index
    %744 = vector.load %arg7[%c1_368, %c0_369, %c86_370] : memref<4x2x640xf32, #tpu.memory_space<vmem>>, vector<1x2x384xf32>
    %745 = vector.shape_cast %744 : vector<1x2x384xf32> to vector<2x384xf32>
    %746 = vector.broadcast %743 : f32 to vector<2x384xf32>
    %747 = arith.mulf %746, %745 : vector<2x384xf32>
    %c1_371 = arith.constant 1 : index
    %c1_372 = arith.constant 1 : index
    %748 = memref.load %arg4[%c1_371, %c1_372] : memref<4x25xf32, #tpu.memory_space<smem>>
    %c1_373 = arith.constant 1 : index
    %c0_374 = arith.constant 0 : index
    %c87_375 = arith.constant 87 : index
    %749 = vector.load %arg7[%c1_373, %c0_374, %c87_375] : memref<4x2x640xf32, #tpu.memory_space<vmem>>, vector<1x2x384xf32>
    %750 = vector.shape_cast %749 : vector<1x2x384xf32> to vector<2x384xf32>
    %751 = vector.broadcast %748 : f32 to vector<2x384xf32>
    %752 = arith.mulf %751, %750 : vector<2x384xf32>
    %753 = arith.addf %747, %752 : vector<2x384xf32>
    %c1_376 = arith.constant 1 : index
    %c2_377 = arith.constant 2 : index
    %754 = memref.load %arg4[%c1_376, %c2_377] : memref<4x25xf32, #tpu.memory_space<smem>>
    %c1_378 = arith.constant 1 : index
    %c0_379 = arith.constant 0 : index
    %c88_380 = arith.constant 88 : index
    %755 = vector.load %arg7[%c1_378, %c0_379, %c88_380] : memref<4x2x640xf32, #tpu.memory_space<vmem>>, vector<1x2x384xf32>
    %756 = vector.shape_cast %755 : vector<1x2x384xf32> to vector<2x384xf32>
    %757 = vector.broadcast %754 : f32 to vector<2x384xf32>
    %758 = arith.mulf %757, %756 : vector<2x384xf32>
    %759 = arith.addf %753, %758 : vector<2x384xf32>
    %c1_381 = arith.constant 1 : index
    %c3_382 = arith.constant 3 : index
    %760 = memref.load %arg4[%c1_381, %c3_382] : memref<4x25xf32, #tpu.memory_space<smem>>
    %c1_383 = arith.constant 1 : index
    %c0_384 = arith.constant 0 : index
    %c89_385 = arith.constant 89 : index
    %761 = vector.load %arg7[%c1_383, %c0_384, %c89_385] : memref<4x2x640xf32, #tpu.memory_space<vmem>>, vector<1x2x384xf32>
    %762 = vector.shape_cast %761 : vector<1x2x384xf32> to vector<2x384xf32>
    %763 = vector.broadcast %760 : f32 to vector<2x384xf32>
    %764 = arith.mulf %763, %762 : vector<2x384xf32>
    %765 = arith.addf %759, %764 : vector<2x384xf32>
    %c1_386 = arith.constant 1 : index
    %c4_387 = arith.constant 4 : index
    %766 = memref.load %arg4[%c1_386, %c4_387] : memref<4x25xf32, #tpu.memory_space<smem>>
    %c1_388 = arith.constant 1 : index
    %c0_389 = arith.constant 0 : index
    %c90_390 = arith.constant 90 : index
    %767 = vector.load %arg7[%c1_388, %c0_389, %c90_390] : memref<4x2x640xf32, #tpu.memory_space<vmem>>, vector<1x2x384xf32>
    %768 = vector.shape_cast %767 : vector<1x2x384xf32> to vector<2x384xf32>
    %769 = vector.broadcast %766 : f32 to vector<2x384xf32>
    %770 = arith.mulf %769, %768 : vector<2x384xf32>
    %771 = arith.addf %765, %770 : vector<2x384xf32>
    %c1_391 = arith.constant 1 : index
    %c5_392 = arith.constant 5 : index
    %772 = memref.load %arg4[%c1_391, %c5_392] : memref<4x25xf32, #tpu.memory_space<smem>>
    %c1_393 = arith.constant 1 : index
    %c0_394 = arith.constant 0 : index
    %c106_395 = arith.constant 106 : index
    %773 = vector.load %arg7[%c1_393, %c0_394, %c106_395] : memref<4x2x640xf32, #tpu.memory_space<vmem>>, vector<1x2x384xf32>
    %774 = vector.shape_cast %773 : vector<1x2x384xf32> to vector<2x384xf32>
    %775 = vector.broadcast %772 : f32 to vector<2x384xf32>
    %776 = arith.mulf %775, %774 : vector<2x384xf32>
    %777 = arith.addf %771, %776 : vector<2x384xf32>
    %c1_396 = arith.constant 1 : index
    %c6_397 = arith.constant 6 : index
    %778 = memref.load %arg4[%c1_396, %c6_397] : memref<4x25xf32, #tpu.memory_space<smem>>
    %c1_398 = arith.constant 1 : index
    %c0_399 = arith.constant 0 : index
    %c107_400 = arith.constant 107 : index
    %779 = vector.load %arg7[%c1_398, %c0_399, %c107_400] : memref<4x2x640xf32, #tpu.memory_space<vmem>>, vector<1x2x384xf32>
    %780 = vector.shape_cast %779 : vector<1x2x384xf32> to vector<2x384xf32>
    %781 = vector.broadcast %778 : f32 to vector<2x384xf32>
    %782 = arith.mulf %781, %780 : vector<2x384xf32>
    %783 = arith.addf %777, %782 : vector<2x384xf32>
    %c1_401 = arith.constant 1 : index
    %c7_402 = arith.constant 7 : index
    %784 = memref.load %arg4[%c1_401, %c7_402] : memref<4x25xf32, #tpu.memory_space<smem>>
    %c1_403 = arith.constant 1 : index
    %c0_404 = arith.constant 0 : index
    %c108_405 = arith.constant 108 : index
    %785 = vector.load %arg7[%c1_403, %c0_404, %c108_405] : memref<4x2x640xf32, #tpu.memory_space<vmem>>, vector<1x2x384xf32>
    %786 = vector.shape_cast %785 : vector<1x2x384xf32> to vector<2x384xf32>
    %787 = vector.broadcast %784 : f32 to vector<2x384xf32>
    %788 = arith.mulf %787, %786 : vector<2x384xf32>
    %789 = arith.addf %783, %788 : vector<2x384xf32>
    %c1_406 = arith.constant 1 : index
    %c8_407 = arith.constant 8 : index
    %790 = memref.load %arg4[%c1_406, %c8_407] : memref<4x25xf32, #tpu.memory_space<smem>>
    %c1_408 = arith.constant 1 : index
    %c0_409 = arith.constant 0 : index
    %c109_410 = arith.constant 109 : index
    %791 = vector.load %arg7[%c1_408, %c0_409, %c109_410] : memref<4x2x640xf32, #tpu.memory_space<vmem>>, vector<1x2x384xf32>
    %792 = vector.shape_cast %791 : vector<1x2x384xf32> to vector<2x384xf32>
    %793 = vector.broadcast %790 : f32 to vector<2x384xf32>
    %794 = arith.mulf %793, %792 : vector<2x384xf32>
    %795 = arith.addf %789, %794 : vector<2x384xf32>
    %c1_411 = arith.constant 1 : index
    %c9_412 = arith.constant 9 : index
    %796 = memref.load %arg4[%c1_411, %c9_412] : memref<4x25xf32, #tpu.memory_space<smem>>
    %c1_413 = arith.constant 1 : index
    %c0_414 = arith.constant 0 : index
    %c110_415 = arith.constant 110 : index
    %797 = vector.load %arg7[%c1_413, %c0_414, %c110_415] : memref<4x2x640xf32, #tpu.memory_space<vmem>>, vector<1x2x384xf32>
    %798 = vector.shape_cast %797 : vector<1x2x384xf32> to vector<2x384xf32>
    %799 = vector.broadcast %796 : f32 to vector<2x384xf32>
    %800 = arith.mulf %799, %798 : vector<2x384xf32>
    %801 = arith.addf %795, %800 : vector<2x384xf32>
    %c1_416 = arith.constant 1 : index
    %c10_417 = arith.constant 10 : index
    %802 = memref.load %arg4[%c1_416, %c10_417] : memref<4x25xf32, #tpu.memory_space<smem>>
    %c1_418 = arith.constant 1 : index
    %c0_419 = arith.constant 0 : index
    %c126_420 = arith.constant 126 : index
    %803 = vector.load %arg7[%c1_418, %c0_419, %c126_420] : memref<4x2x640xf32, #tpu.memory_space<vmem>>, vector<1x2x384xf32>
    %804 = vector.shape_cast %803 : vector<1x2x384xf32> to vector<2x384xf32>
    %805 = vector.broadcast %802 : f32 to vector<2x384xf32>
    %806 = arith.mulf %805, %804 : vector<2x384xf32>
    %807 = arith.addf %801, %806 : vector<2x384xf32>
    %c1_421 = arith.constant 1 : index
    %c11_422 = arith.constant 11 : index
    %808 = memref.load %arg4[%c1_421, %c11_422] : memref<4x25xf32, #tpu.memory_space<smem>>
    %c1_423 = arith.constant 1 : index
    %c0_424 = arith.constant 0 : index
    %c127_425 = arith.constant 127 : index
    %809 = vector.load %arg7[%c1_423, %c0_424, %c127_425] : memref<4x2x640xf32, #tpu.memory_space<vmem>>, vector<1x2x384xf32>
    %810 = vector.shape_cast %809 : vector<1x2x384xf32> to vector<2x384xf32>
    %811 = vector.broadcast %808 : f32 to vector<2x384xf32>
    %812 = arith.mulf %811, %810 : vector<2x384xf32>
    %813 = arith.addf %807, %812 : vector<2x384xf32>
    %c1_426 = arith.constant 1 : index
    %c12_427 = arith.constant 12 : index
    %814 = memref.load %arg4[%c1_426, %c12_427] : memref<4x25xf32, #tpu.memory_space<smem>>
    %c1_428 = arith.constant 1 : index
    %c0_429 = arith.constant 0 : index
    %c128_430 = arith.constant 128 : index
    %815 = vector.load %arg7[%c1_428, %c0_429, %c128_430] : memref<4x2x640xf32, #tpu.memory_space<vmem>>, vector<1x2x384xf32>
    %816 = vector.shape_cast %815 : vector<1x2x384xf32> to vector<2x384xf32>
    %817 = vector.broadcast %814 : f32 to vector<2x384xf32>
    %818 = arith.mulf %817, %816 : vector<2x384xf32>
    %819 = arith.addf %813, %818 : vector<2x384xf32>
    %c1_431 = arith.constant 1 : index
    %c13_432 = arith.constant 13 : index
    %820 = memref.load %arg4[%c1_431, %c13_432] : memref<4x25xf32, #tpu.memory_space<smem>>
    %c1_433 = arith.constant 1 : index
    %c0_434 = arith.constant 0 : index
    %c129_435 = arith.constant 129 : index
    %821 = vector.load %arg7[%c1_433, %c0_434, %c129_435] : memref<4x2x640xf32, #tpu.memory_space<vmem>>, vector<1x2x384xf32>
    %822 = vector.shape_cast %821 : vector<1x2x384xf32> to vector<2x384xf32>
    %823 = vector.broadcast %820 : f32 to vector<2x384xf32>
    %824 = arith.mulf %823, %822 : vector<2x384xf32>
    %825 = arith.addf %819, %824 : vector<2x384xf32>
    %c1_436 = arith.constant 1 : index
    %c14_437 = arith.constant 14 : index
    %826 = memref.load %arg4[%c1_436, %c14_437] : memref<4x25xf32, #tpu.memory_space<smem>>
    %c1_438 = arith.constant 1 : index
    %c0_439 = arith.constant 0 : index
    %c130_440 = arith.constant 130 : index
    %827 = vector.load %arg7[%c1_438, %c0_439, %c130_440] : memref<4x2x640xf32, #tpu.memory_space<vmem>>, vector<1x2x384xf32>
    %828 = vector.shape_cast %827 : vector<1x2x384xf32> to vector<2x384xf32>
    %829 = vector.broadcast %826 : f32 to vector<2x384xf32>
    %830 = arith.mulf %829, %828 : vector<2x384xf32>
    %831 = arith.addf %825, %830 : vector<2x384xf32>
    %c1_441 = arith.constant 1 : index
    %c15_442 = arith.constant 15 : index
    %832 = memref.load %arg4[%c1_441, %c15_442] : memref<4x25xf32, #tpu.memory_space<smem>>
    %c1_443 = arith.constant 1 : index
    %c0_444 = arith.constant 0 : index
    %c146_445 = arith.constant 146 : index
    %833 = vector.load %arg7[%c1_443, %c0_444, %c146_445] : memref<4x2x640xf32, #tpu.memory_space<vmem>>, vector<1x2x384xf32>
    %834 = vector.shape_cast %833 : vector<1x2x384xf32> to vector<2x384xf32>
    %835 = vector.broadcast %832 : f32 to vector<2x384xf32>
    %836 = arith.mulf %835, %834 : vector<2x384xf32>
    %837 = arith.addf %831, %836 : vector<2x384xf32>
    %c1_446 = arith.constant 1 : index
    %c16_447 = arith.constant 16 : index
    %838 = memref.load %arg4[%c1_446, %c16_447] : memref<4x25xf32, #tpu.memory_space<smem>>
    %c1_448 = arith.constant 1 : index
    %c0_449 = arith.constant 0 : index
    %c147_450 = arith.constant 147 : index
    %839 = vector.load %arg7[%c1_448, %c0_449, %c147_450] : memref<4x2x640xf32, #tpu.memory_space<vmem>>, vector<1x2x384xf32>
    %840 = vector.shape_cast %839 : vector<1x2x384xf32> to vector<2x384xf32>
    %841 = vector.broadcast %838 : f32 to vector<2x384xf32>
    %842 = arith.mulf %841, %840 : vector<2x384xf32>
    %843 = arith.addf %837, %842 : vector<2x384xf32>
    %c1_451 = arith.constant 1 : index
    %c17_452 = arith.constant 17 : index
    %844 = memref.load %arg4[%c1_451, %c17_452] : memref<4x25xf32, #tpu.memory_space<smem>>
    %c1_453 = arith.constant 1 : index
    %c0_454 = arith.constant 0 : index
    %c148_455 = arith.constant 148 : index
    %845 = vector.load %arg7[%c1_453, %c0_454, %c148_455] : memref<4x2x640xf32, #tpu.memory_space<vmem>>, vector<1x2x384xf32>
    %846 = vector.shape_cast %845 : vector<1x2x384xf32> to vector<2x384xf32>
    %847 = vector.broadcast %844 : f32 to vector<2x384xf32>
    %848 = arith.mulf %847, %846 : vector<2x384xf32>
    %849 = arith.addf %843, %848 : vector<2x384xf32>
    %c1_456 = arith.constant 1 : index
    %c18_457 = arith.constant 18 : index
    %850 = memref.load %arg4[%c1_456, %c18_457] : memref<4x25xf32, #tpu.memory_space<smem>>
    %c1_458 = arith.constant 1 : index
    %c0_459 = arith.constant 0 : index
    %c149_460 = arith.constant 149 : index
    %851 = vector.load %arg7[%c1_458, %c0_459, %c149_460] : memref<4x2x640xf32, #tpu.memory_space<vmem>>, vector<1x2x384xf32>
    %852 = vector.shape_cast %851 : vector<1x2x384xf32> to vector<2x384xf32>
    %853 = vector.broadcast %850 : f32 to vector<2x384xf32>
    %854 = arith.mulf %853, %852 : vector<2x384xf32>
    %855 = arith.addf %849, %854 : vector<2x384xf32>
    %c1_461 = arith.constant 1 : index
    %c19_462 = arith.constant 19 : index
    %856 = memref.load %arg4[%c1_461, %c19_462] : memref<4x25xf32, #tpu.memory_space<smem>>
    %c1_463 = arith.constant 1 : index
    %c0_464 = arith.constant 0 : index
    %c150_465 = arith.constant 150 : index
    %857 = vector.load %arg7[%c1_463, %c0_464, %c150_465] : memref<4x2x640xf32, #tpu.memory_space<vmem>>, vector<1x2x384xf32>
    %858 = vector.shape_cast %857 : vector<1x2x384xf32> to vector<2x384xf32>
    %859 = vector.broadcast %856 : f32 to vector<2x384xf32>
    %860 = arith.mulf %859, %858 : vector<2x384xf32>
    %861 = arith.addf %855, %860 : vector<2x384xf32>
    %c1_466 = arith.constant 1 : index
    %c20_467 = arith.constant 20 : index
    %862 = memref.load %arg4[%c1_466, %c20_467] : memref<4x25xf32, #tpu.memory_space<smem>>
    %c1_468 = arith.constant 1 : index
    %c0_469 = arith.constant 0 : index
    %c166_470 = arith.constant 166 : index
    %863 = vector.load %arg7[%c1_468, %c0_469, %c166_470] : memref<4x2x640xf32, #tpu.memory_space<vmem>>, vector<1x2x384xf32>
    %864 = vector.shape_cast %863 : vector<1x2x384xf32> to vector<2x384xf32>
    %865 = vector.broadcast %862 : f32 to vector<2x384xf32>
    %866 = arith.mulf %865, %864 : vector<2x384xf32>
    %867 = arith.addf %861, %866 : vector<2x384xf32>
    %c1_471 = arith.constant 1 : index
    %c21_472 = arith.constant 21 : index
    %868 = memref.load %arg4[%c1_471, %c21_472] : memref<4x25xf32, #tpu.memory_space<smem>>
    %c1_473 = arith.constant 1 : index
    %c0_474 = arith.constant 0 : index
    %c167_475 = arith.constant 167 : index
    %869 = vector.load %arg7[%c1_473, %c0_474, %c167_475] : memref<4x2x640xf32, #tpu.memory_space<vmem>>, vector<1x2x384xf32>
    %870 = vector.shape_cast %869 : vector<1x2x384xf32> to vector<2x384xf32>
    %871 = vector.broadcast %868 : f32 to vector<2x384xf32>
    %872 = arith.mulf %871, %870 : vector<2x384xf32>
    %873 = arith.addf %867, %872 : vector<2x384xf32>
    %c1_476 = arith.constant 1 : index
    %c22_477 = arith.constant 22 : index
    %874 = memref.load %arg4[%c1_476, %c22_477] : memref<4x25xf32, #tpu.memory_space<smem>>
    %c1_478 = arith.constant 1 : index
    %c0_479 = arith.constant 0 : index
    %c168_480 = arith.constant 168 : index
    %875 = vector.load %arg7[%c1_478, %c0_479, %c168_480] : memref<4x2x640xf32, #tpu.memory_space<vmem>>, vector<1x2x384xf32>
    %876 = vector.shape_cast %875 : vector<1x2x384xf32> to vector<2x384xf32>
    %877 = vector.broadcast %874 : f32 to vector<2x384xf32>
    %878 = arith.mulf %877, %876 : vector<2x384xf32>
    %879 = arith.addf %873, %878 : vector<2x384xf32>
    %c1_481 = arith.constant 1 : index
    %c23_482 = arith.constant 23 : index
    %880 = memref.load %arg4[%c1_481, %c23_482] : memref<4x25xf32, #tpu.memory_space<smem>>
    %c1_483 = arith.constant 1 : index
    %c0_484 = arith.constant 0 : index
    %c169_485 = arith.constant 169 : index
    %881 = vector.load %arg7[%c1_483, %c0_484, %c169_485] : memref<4x2x640xf32, #tpu.memory_space<vmem>>, vector<1x2x384xf32>
    %882 = vector.shape_cast %881 : vector<1x2x384xf32> to vector<2x384xf32>
    %883 = vector.broadcast %880 : f32 to vector<2x384xf32>
    %884 = arith.mulf %883, %882 : vector<2x384xf32>
    %885 = arith.addf %879, %884 : vector<2x384xf32>
    %c1_486 = arith.constant 1 : index
    %c24_487 = arith.constant 24 : index
    %886 = memref.load %arg4[%c1_486, %c24_487] : memref<4x25xf32, #tpu.memory_space<smem>>
    %c1_488 = arith.constant 1 : index
    %c0_489 = arith.constant 0 : index
    %c170_490 = arith.constant 170 : index
    %887 = vector.load %arg7[%c1_488, %c0_489, %c170_490] : memref<4x2x640xf32, #tpu.memory_space<vmem>>, vector<1x2x384xf32>
    %888 = vector.shape_cast %887 : vector<1x2x384xf32> to vector<2x384xf32>
    %889 = vector.broadcast %886 : f32 to vector<2x384xf32>
    %890 = arith.mulf %889, %888 : vector<2x384xf32>
    %891 = arith.addf %885, %890 : vector<2x384xf32>
    %892 = arith.addf %742, %891 : vector<2x384xf32>
    %c2_491 = arith.constant 2 : index
    %c0_492 = arith.constant 0 : index
    %893 = memref.load %arg4[%c2_491, %c0_492] : memref<4x25xf32, #tpu.memory_space<smem>>
    %c2_493 = arith.constant 2 : index
    %c0_494 = arith.constant 0 : index
    %c86_495 = arith.constant 86 : index
    %894 = vector.load %arg7[%c2_493, %c0_494, %c86_495] : memref<4x2x640xf32, #tpu.memory_space<vmem>>, vector<1x2x384xf32>
    %895 = vector.shape_cast %894 : vector<1x2x384xf32> to vector<2x384xf32>
    %896 = vector.broadcast %893 : f32 to vector<2x384xf32>
    %897 = arith.mulf %896, %895 : vector<2x384xf32>
    %c2_496 = arith.constant 2 : index
    %c1_497 = arith.constant 1 : index
    %898 = memref.load %arg4[%c2_496, %c1_497] : memref<4x25xf32, #tpu.memory_space<smem>>
    %c2_498 = arith.constant 2 : index
    %c0_499 = arith.constant 0 : index
    %c87_500 = arith.constant 87 : index
    %899 = vector.load %arg7[%c2_498, %c0_499, %c87_500] : memref<4x2x640xf32, #tpu.memory_space<vmem>>, vector<1x2x384xf32>
    %900 = vector.shape_cast %899 : vector<1x2x384xf32> to vector<2x384xf32>
    %901 = vector.broadcast %898 : f32 to vector<2x384xf32>
    %902 = arith.mulf %901, %900 : vector<2x384xf32>
    %903 = arith.addf %897, %902 : vector<2x384xf32>
    %c2_501 = arith.constant 2 : index
    %c2_502 = arith.constant 2 : index
    %904 = memref.load %arg4[%c2_501, %c2_502] : memref<4x25xf32, #tpu.memory_space<smem>>
    %c2_503 = arith.constant 2 : index
    %c0_504 = arith.constant 0 : index
    %c88_505 = arith.constant 88 : index
    %905 = vector.load %arg7[%c2_503, %c0_504, %c88_505] : memref<4x2x640xf32, #tpu.memory_space<vmem>>, vector<1x2x384xf32>
    %906 = vector.shape_cast %905 : vector<1x2x384xf32> to vector<2x384xf32>
    %907 = vector.broadcast %904 : f32 to vector<2x384xf32>
    %908 = arith.mulf %907, %906 : vector<2x384xf32>
    %909 = arith.addf %903, %908 : vector<2x384xf32>
    %c2_506 = arith.constant 2 : index
    %c3_507 = arith.constant 3 : index
    %910 = memref.load %arg4[%c2_506, %c3_507] : memref<4x25xf32, #tpu.memory_space<smem>>
    %c2_508 = arith.constant 2 : index
    %c0_509 = arith.constant 0 : index
    %c89_510 = arith.constant 89 : index
    %911 = vector.load %arg7[%c2_508, %c0_509, %c89_510] : memref<4x2x640xf32, #tpu.memory_space<vmem>>, vector<1x2x384xf32>
    %912 = vector.shape_cast %911 : vector<1x2x384xf32> to vector<2x384xf32>
    %913 = vector.broadcast %910 : f32 to vector<2x384xf32>
    %914 = arith.mulf %913, %912 : vector<2x384xf32>
    %915 = arith.addf %909, %914 : vector<2x384xf32>
    %c2_511 = arith.constant 2 : index
    %c4_512 = arith.constant 4 : index
    %916 = memref.load %arg4[%c2_511, %c4_512] : memref<4x25xf32, #tpu.memory_space<smem>>
    %c2_513 = arith.constant 2 : index
    %c0_514 = arith.constant 0 : index
    %c90_515 = arith.constant 90 : index
    %917 = vector.load %arg7[%c2_513, %c0_514, %c90_515] : memref<4x2x640xf32, #tpu.memory_space<vmem>>, vector<1x2x384xf32>
    %918 = vector.shape_cast %917 : vector<1x2x384xf32> to vector<2x384xf32>
    %919 = vector.broadcast %916 : f32 to vector<2x384xf32>
    %920 = arith.mulf %919, %918 : vector<2x384xf32>
    %921 = arith.addf %915, %920 : vector<2x384xf32>
    %c2_516 = arith.constant 2 : index
    %c5_517 = arith.constant 5 : index
    %922 = memref.load %arg4[%c2_516, %c5_517] : memref<4x25xf32, #tpu.memory_space<smem>>
    %c2_518 = arith.constant 2 : index
    %c0_519 = arith.constant 0 : index
    %c106_520 = arith.constant 106 : index
    %923 = vector.load %arg7[%c2_518, %c0_519, %c106_520] : memref<4x2x640xf32, #tpu.memory_space<vmem>>, vector<1x2x384xf32>
    %924 = vector.shape_cast %923 : vector<1x2x384xf32> to vector<2x384xf32>
    %925 = vector.broadcast %922 : f32 to vector<2x384xf32>
    %926 = arith.mulf %925, %924 : vector<2x384xf32>
    %927 = arith.addf %921, %926 : vector<2x384xf32>
    %c2_521 = arith.constant 2 : index
    %c6_522 = arith.constant 6 : index
    %928 = memref.load %arg4[%c2_521, %c6_522] : memref<4x25xf32, #tpu.memory_space<smem>>
    %c2_523 = arith.constant 2 : index
    %c0_524 = arith.constant 0 : index
    %c107_525 = arith.constant 107 : index
    %929 = vector.load %arg7[%c2_523, %c0_524, %c107_525] : memref<4x2x640xf32, #tpu.memory_space<vmem>>, vector<1x2x384xf32>
    %930 = vector.shape_cast %929 : vector<1x2x384xf32> to vector<2x384xf32>
    %931 = vector.broadcast %928 : f32 to vector<2x384xf32>
    %932 = arith.mulf %931, %930 : vector<2x384xf32>
    %933 = arith.addf %927, %932 : vector<2x384xf32>
    %c2_526 = arith.constant 2 : index
    %c7_527 = arith.constant 7 : index
    %934 = memref.load %arg4[%c2_526, %c7_527] : memref<4x25xf32, #tpu.memory_space<smem>>
    %c2_528 = arith.constant 2 : index
    %c0_529 = arith.constant 0 : index
    %c108_530 = arith.constant 108 : index
    %935 = vector.load %arg7[%c2_528, %c0_529, %c108_530] : memref<4x2x640xf32, #tpu.memory_space<vmem>>, vector<1x2x384xf32>
    %936 = vector.shape_cast %935 : vector<1x2x384xf32> to vector<2x384xf32>
    %937 = vector.broadcast %934 : f32 to vector<2x384xf32>
    %938 = arith.mulf %937, %936 : vector<2x384xf32>
    %939 = arith.addf %933, %938 : vector<2x384xf32>
    %c2_531 = arith.constant 2 : index
    %c8_532 = arith.constant 8 : index
    %940 = memref.load %arg4[%c2_531, %c8_532] : memref<4x25xf32, #tpu.memory_space<smem>>
    %c2_533 = arith.constant 2 : index
    %c0_534 = arith.constant 0 : index
    %c109_535 = arith.constant 109 : index
    %941 = vector.load %arg7[%c2_533, %c0_534, %c109_535] : memref<4x2x640xf32, #tpu.memory_space<vmem>>, vector<1x2x384xf32>
    %942 = vector.shape_cast %941 : vector<1x2x384xf32> to vector<2x384xf32>
    %943 = vector.broadcast %940 : f32 to vector<2x384xf32>
    %944 = arith.mulf %943, %942 : vector<2x384xf32>
    %945 = arith.addf %939, %944 : vector<2x384xf32>
    %c2_536 = arith.constant 2 : index
    %c9_537 = arith.constant 9 : index
    %946 = memref.load %arg4[%c2_536, %c9_537] : memref<4x25xf32, #tpu.memory_space<smem>>
    %c2_538 = arith.constant 2 : index
    %c0_539 = arith.constant 0 : index
    %c110_540 = arith.constant 110 : index
    %947 = vector.load %arg7[%c2_538, %c0_539, %c110_540] : memref<4x2x640xf32, #tpu.memory_space<vmem>>, vector<1x2x384xf32>
    %948 = vector.shape_cast %947 : vector<1x2x384xf32> to vector<2x384xf32>
    %949 = vector.broadcast %946 : f32 to vector<2x384xf32>
    %950 = arith.mulf %949, %948 : vector<2x384xf32>
    %951 = arith.addf %945, %950 : vector<2x384xf32>
    %c2_541 = arith.constant 2 : index
    %c10_542 = arith.constant 10 : index
    %952 = memref.load %arg4[%c2_541, %c10_542] : memref<4x25xf32, #tpu.memory_space<smem>>
    %c2_543 = arith.constant 2 : index
    %c0_544 = arith.constant 0 : index
    %c126_545 = arith.constant 126 : index
    %953 = vector.load %arg7[%c2_543, %c0_544, %c126_545] : memref<4x2x640xf32, #tpu.memory_space<vmem>>, vector<1x2x384xf32>
    %954 = vector.shape_cast %953 : vector<1x2x384xf32> to vector<2x384xf32>
    %955 = vector.broadcast %952 : f32 to vector<2x384xf32>
    %956 = arith.mulf %955, %954 : vector<2x384xf32>
    %957 = arith.addf %951, %956 : vector<2x384xf32>
    %c2_546 = arith.constant 2 : index
    %c11_547 = arith.constant 11 : index
    %958 = memref.load %arg4[%c2_546, %c11_547] : memref<4x25xf32, #tpu.memory_space<smem>>
    %c2_548 = arith.constant 2 : index
    %c0_549 = arith.constant 0 : index
    %c127_550 = arith.constant 127 : index
    %959 = vector.load %arg7[%c2_548, %c0_549, %c127_550] : memref<4x2x640xf32, #tpu.memory_space<vmem>>, vector<1x2x384xf32>
    %960 = vector.shape_cast %959 : vector<1x2x384xf32> to vector<2x384xf32>
    %961 = vector.broadcast %958 : f32 to vector<2x384xf32>
    %962 = arith.mulf %961, %960 : vector<2x384xf32>
    %963 = arith.addf %957, %962 : vector<2x384xf32>
    %c2_551 = arith.constant 2 : index
    %c12_552 = arith.constant 12 : index
    %964 = memref.load %arg4[%c2_551, %c12_552] : memref<4x25xf32, #tpu.memory_space<smem>>
    %c2_553 = arith.constant 2 : index
    %c0_554 = arith.constant 0 : index
    %c128_555 = arith.constant 128 : index
    %965 = vector.load %arg7[%c2_553, %c0_554, %c128_555] : memref<4x2x640xf32, #tpu.memory_space<vmem>>, vector<1x2x384xf32>
    %966 = vector.shape_cast %965 : vector<1x2x384xf32> to vector<2x384xf32>
    %967 = vector.broadcast %964 : f32 to vector<2x384xf32>
    %968 = arith.mulf %967, %966 : vector<2x384xf32>
    %969 = arith.addf %963, %968 : vector<2x384xf32>
    %c2_556 = arith.constant 2 : index
    %c13_557 = arith.constant 13 : index
    %970 = memref.load %arg4[%c2_556, %c13_557] : memref<4x25xf32, #tpu.memory_space<smem>>
    %c2_558 = arith.constant 2 : index
    %c0_559 = arith.constant 0 : index
    %c129_560 = arith.constant 129 : index
    %971 = vector.load %arg7[%c2_558, %c0_559, %c129_560] : memref<4x2x640xf32, #tpu.memory_space<vmem>>, vector<1x2x384xf32>
    %972 = vector.shape_cast %971 : vector<1x2x384xf32> to vector<2x384xf32>
    %973 = vector.broadcast %970 : f32 to vector<2x384xf32>
    %974 = arith.mulf %973, %972 : vector<2x384xf32>
    %975 = arith.addf %969, %974 : vector<2x384xf32>
    %c2_561 = arith.constant 2 : index
    %c14_562 = arith.constant 14 : index
    %976 = memref.load %arg4[%c2_561, %c14_562] : memref<4x25xf32, #tpu.memory_space<smem>>
    %c2_563 = arith.constant 2 : index
    %c0_564 = arith.constant 0 : index
    %c130_565 = arith.constant 130 : index
    %977 = vector.load %arg7[%c2_563, %c0_564, %c130_565] : memref<4x2x640xf32, #tpu.memory_space<vmem>>, vector<1x2x384xf32>
    %978 = vector.shape_cast %977 : vector<1x2x384xf32> to vector<2x384xf32>
    %979 = vector.broadcast %976 : f32 to vector<2x384xf32>
    %980 = arith.mulf %979, %978 : vector<2x384xf32>
    %981 = arith.addf %975, %980 : vector<2x384xf32>
    %c2_566 = arith.constant 2 : index
    %c15_567 = arith.constant 15 : index
    %982 = memref.load %arg4[%c2_566, %c15_567] : memref<4x25xf32, #tpu.memory_space<smem>>
    %c2_568 = arith.constant 2 : index
    %c0_569 = arith.constant 0 : index
    %c146_570 = arith.constant 146 : index
    %983 = vector.load %arg7[%c2_568, %c0_569, %c146_570] : memref<4x2x640xf32, #tpu.memory_space<vmem>>, vector<1x2x384xf32>
    %984 = vector.shape_cast %983 : vector<1x2x384xf32> to vector<2x384xf32>
    %985 = vector.broadcast %982 : f32 to vector<2x384xf32>
    %986 = arith.mulf %985, %984 : vector<2x384xf32>
    %987 = arith.addf %981, %986 : vector<2x384xf32>
    %c2_571 = arith.constant 2 : index
    %c16_572 = arith.constant 16 : index
    %988 = memref.load %arg4[%c2_571, %c16_572] : memref<4x25xf32, #tpu.memory_space<smem>>
    %c2_573 = arith.constant 2 : index
    %c0_574 = arith.constant 0 : index
    %c147_575 = arith.constant 147 : index
    %989 = vector.load %arg7[%c2_573, %c0_574, %c147_575] : memref<4x2x640xf32, #tpu.memory_space<vmem>>, vector<1x2x384xf32>
    %990 = vector.shape_cast %989 : vector<1x2x384xf32> to vector<2x384xf32>
    %991 = vector.broadcast %988 : f32 to vector<2x384xf32>
    %992 = arith.mulf %991, %990 : vector<2x384xf32>
    %993 = arith.addf %987, %992 : vector<2x384xf32>
    %c2_576 = arith.constant 2 : index
    %c17_577 = arith.constant 17 : index
    %994 = memref.load %arg4[%c2_576, %c17_577] : memref<4x25xf32, #tpu.memory_space<smem>>
    %c2_578 = arith.constant 2 : index
    %c0_579 = arith.constant 0 : index
    %c148_580 = arith.constant 148 : index
    %995 = vector.load %arg7[%c2_578, %c0_579, %c148_580] : memref<4x2x640xf32, #tpu.memory_space<vmem>>, vector<1x2x384xf32>
    %996 = vector.shape_cast %995 : vector<1x2x384xf32> to vector<2x384xf32>
    %997 = vector.broadcast %994 : f32 to vector<2x384xf32>
    %998 = arith.mulf %997, %996 : vector<2x384xf32>
    %999 = arith.addf %993, %998 : vector<2x384xf32>
    %c2_581 = arith.constant 2 : index
    %c18_582 = arith.constant 18 : index
    %1000 = memref.load %arg4[%c2_581, %c18_582] : memref<4x25xf32, #tpu.memory_space<smem>>
    %c2_583 = arith.constant 2 : index
    %c0_584 = arith.constant 0 : index
    %c149_585 = arith.constant 149 : index
    %1001 = vector.load %arg7[%c2_583, %c0_584, %c149_585] : memref<4x2x640xf32, #tpu.memory_space<vmem>>, vector<1x2x384xf32>
    %1002 = vector.shape_cast %1001 : vector<1x2x384xf32> to vector<2x384xf32>
    %1003 = vector.broadcast %1000 : f32 to vector<2x384xf32>
    %1004 = arith.mulf %1003, %1002 : vector<2x384xf32>
    %1005 = arith.addf %999, %1004 : vector<2x384xf32>
    %c2_586 = arith.constant 2 : index
    %c19_587 = arith.constant 19 : index
    %1006 = memref.load %arg4[%c2_586, %c19_587] : memref<4x25xf32, #tpu.memory_space<smem>>
    %c2_588 = arith.constant 2 : index
    %c0_589 = arith.constant 0 : index
    %c150_590 = arith.constant 150 : index
    %1007 = vector.load %arg7[%c2_588, %c0_589, %c150_590] : memref<4x2x640xf32, #tpu.memory_space<vmem>>, vector<1x2x384xf32>
    %1008 = vector.shape_cast %1007 : vector<1x2x384xf32> to vector<2x384xf32>
    %1009 = vector.broadcast %1006 : f32 to vector<2x384xf32>
    %1010 = arith.mulf %1009, %1008 : vector<2x384xf32>
    %1011 = arith.addf %1005, %1010 : vector<2x384xf32>
    %c2_591 = arith.constant 2 : index
    %c20_592 = arith.constant 20 : index
    %1012 = memref.load %arg4[%c2_591, %c20_592] : memref<4x25xf32, #tpu.memory_space<smem>>
    %c2_593 = arith.constant 2 : index
    %c0_594 = arith.constant 0 : index
    %c166_595 = arith.constant 166 : index
    %1013 = vector.load %arg7[%c2_593, %c0_594, %c166_595] : memref<4x2x640xf32, #tpu.memory_space<vmem>>, vector<1x2x384xf32>
    %1014 = vector.shape_cast %1013 : vector<1x2x384xf32> to vector<2x384xf32>
    %1015 = vector.broadcast %1012 : f32 to vector<2x384xf32>
    %1016 = arith.mulf %1015, %1014 : vector<2x384xf32>
    %1017 = arith.addf %1011, %1016 : vector<2x384xf32>
    %c2_596 = arith.constant 2 : index
    %c21_597 = arith.constant 21 : index
    %1018 = memref.load %arg4[%c2_596, %c21_597] : memref<4x25xf32, #tpu.memory_space<smem>>
    %c2_598 = arith.constant 2 : index
    %c0_599 = arith.constant 0 : index
    %c167_600 = arith.constant 167 : index
    %1019 = vector.load %arg7[%c2_598, %c0_599, %c167_600] : memref<4x2x640xf32, #tpu.memory_space<vmem>>, vector<1x2x384xf32>
    %1020 = vector.shape_cast %1019 : vector<1x2x384xf32> to vector<2x384xf32>
    %1021 = vector.broadcast %1018 : f32 to vector<2x384xf32>
    %1022 = arith.mulf %1021, %1020 : vector<2x384xf32>
    %1023 = arith.addf %1017, %1022 : vector<2x384xf32>
    %c2_601 = arith.constant 2 : index
    %c22_602 = arith.constant 22 : index
    %1024 = memref.load %arg4[%c2_601, %c22_602] : memref<4x25xf32, #tpu.memory_space<smem>>
    %c2_603 = arith.constant 2 : index
    %c0_604 = arith.constant 0 : index
    %c168_605 = arith.constant 168 : index
    %1025 = vector.load %arg7[%c2_603, %c0_604, %c168_605] : memref<4x2x640xf32, #tpu.memory_space<vmem>>, vector<1x2x384xf32>
    %1026 = vector.shape_cast %1025 : vector<1x2x384xf32> to vector<2x384xf32>
    %1027 = vector.broadcast %1024 : f32 to vector<2x384xf32>
    %1028 = arith.mulf %1027, %1026 : vector<2x384xf32>
    %1029 = arith.addf %1023, %1028 : vector<2x384xf32>
    %c2_606 = arith.constant 2 : index
    %c23_607 = arith.constant 23 : index
    %1030 = memref.load %arg4[%c2_606, %c23_607] : memref<4x25xf32, #tpu.memory_space<smem>>
    %c2_608 = arith.constant 2 : index
    %c0_609 = arith.constant 0 : index
    %c169_610 = arith.constant 169 : index
    %1031 = vector.load %arg7[%c2_608, %c0_609, %c169_610] : memref<4x2x640xf32, #tpu.memory_space<vmem>>, vector<1x2x384xf32>
    %1032 = vector.shape_cast %1031 : vector<1x2x384xf32> to vector<2x384xf32>
    %1033 = vector.broadcast %1030 : f32 to vector<2x384xf32>
    %1034 = arith.mulf %1033, %1032 : vector<2x384xf32>
    %1035 = arith.addf %1029, %1034 : vector<2x384xf32>
    %c2_611 = arith.constant 2 : index
    %c24_612 = arith.constant 24 : index
    %1036 = memref.load %arg4[%c2_611, %c24_612] : memref<4x25xf32, #tpu.memory_space<smem>>
    %c2_613 = arith.constant 2 : index
    %c0_614 = arith.constant 0 : index
    %c170_615 = arith.constant 170 : index
    %1037 = vector.load %arg7[%c2_613, %c0_614, %c170_615] : memref<4x2x640xf32, #tpu.memory_space<vmem>>, vector<1x2x384xf32>
    %1038 = vector.shape_cast %1037 : vector<1x2x384xf32> to vector<2x384xf32>
    %1039 = vector.broadcast %1036 : f32 to vector<2x384xf32>
    %1040 = arith.mulf %1039, %1038 : vector<2x384xf32>
    %1041 = arith.addf %1035, %1040 : vector<2x384xf32>
    %1042 = arith.addf %892, %1041 : vector<2x384xf32>
    %c3_616 = arith.constant 3 : index
    %c0_617 = arith.constant 0 : index
    %1043 = memref.load %arg4[%c3_616, %c0_617] : memref<4x25xf32, #tpu.memory_space<smem>>
    %c3_618 = arith.constant 3 : index
    %c0_619 = arith.constant 0 : index
    %c86_620 = arith.constant 86 : index
    %1044 = vector.load %arg7[%c3_618, %c0_619, %c86_620] : memref<4x2x640xf32, #tpu.memory_space<vmem>>, vector<1x2x384xf32>
    %1045 = vector.shape_cast %1044 : vector<1x2x384xf32> to vector<2x384xf32>
    %1046 = vector.broadcast %1043 : f32 to vector<2x384xf32>
    %1047 = arith.mulf %1046, %1045 : vector<2x384xf32>
    %c3_621 = arith.constant 3 : index
    %c1_622 = arith.constant 1 : index
    %1048 = memref.load %arg4[%c3_621, %c1_622] : memref<4x25xf32, #tpu.memory_space<smem>>
    %c3_623 = arith.constant 3 : index
    %c0_624 = arith.constant 0 : index
    %c87_625 = arith.constant 87 : index
    %1049 = vector.load %arg7[%c3_623, %c0_624, %c87_625] : memref<4x2x640xf32, #tpu.memory_space<vmem>>, vector<1x2x384xf32>
    %1050 = vector.shape_cast %1049 : vector<1x2x384xf32> to vector<2x384xf32>
    %1051 = vector.broadcast %1048 : f32 to vector<2x384xf32>
    %1052 = arith.mulf %1051, %1050 : vector<2x384xf32>
    %1053 = arith.addf %1047, %1052 : vector<2x384xf32>
    %c3_626 = arith.constant 3 : index
    %c2_627 = arith.constant 2 : index
    %1054 = memref.load %arg4[%c3_626, %c2_627] : memref<4x25xf32, #tpu.memory_space<smem>>
    %c3_628 = arith.constant 3 : index
    %c0_629 = arith.constant 0 : index
    %c88_630 = arith.constant 88 : index
    %1055 = vector.load %arg7[%c3_628, %c0_629, %c88_630] : memref<4x2x640xf32, #tpu.memory_space<vmem>>, vector<1x2x384xf32>
    %1056 = vector.shape_cast %1055 : vector<1x2x384xf32> to vector<2x384xf32>
    %1057 = vector.broadcast %1054 : f32 to vector<2x384xf32>
    %1058 = arith.mulf %1057, %1056 : vector<2x384xf32>
    %1059 = arith.addf %1053, %1058 : vector<2x384xf32>
    %c3_631 = arith.constant 3 : index
    %c3_632 = arith.constant 3 : index
    %1060 = memref.load %arg4[%c3_631, %c3_632] : memref<4x25xf32, #tpu.memory_space<smem>>
    %c3_633 = arith.constant 3 : index
    %c0_634 = arith.constant 0 : index
    %c89_635 = arith.constant 89 : index
    %1061 = vector.load %arg7[%c3_633, %c0_634, %c89_635] : memref<4x2x640xf32, #tpu.memory_space<vmem>>, vector<1x2x384xf32>
    %1062 = vector.shape_cast %1061 : vector<1x2x384xf32> to vector<2x384xf32>
    %1063 = vector.broadcast %1060 : f32 to vector<2x384xf32>
    %1064 = arith.mulf %1063, %1062 : vector<2x384xf32>
    %1065 = arith.addf %1059, %1064 : vector<2x384xf32>
    %c3_636 = arith.constant 3 : index
    %c4_637 = arith.constant 4 : index
    %1066 = memref.load %arg4[%c3_636, %c4_637] : memref<4x25xf32, #tpu.memory_space<smem>>
    %c3_638 = arith.constant 3 : index
    %c0_639 = arith.constant 0 : index
    %c90_640 = arith.constant 90 : index
    %1067 = vector.load %arg7[%c3_638, %c0_639, %c90_640] : memref<4x2x640xf32, #tpu.memory_space<vmem>>, vector<1x2x384xf32>
    %1068 = vector.shape_cast %1067 : vector<1x2x384xf32> to vector<2x384xf32>
    %1069 = vector.broadcast %1066 : f32 to vector<2x384xf32>
    %1070 = arith.mulf %1069, %1068 : vector<2x384xf32>
    %1071 = arith.addf %1065, %1070 : vector<2x384xf32>
    %c3_641 = arith.constant 3 : index
    %c5_642 = arith.constant 5 : index
    %1072 = memref.load %arg4[%c3_641, %c5_642] : memref<4x25xf32, #tpu.memory_space<smem>>
    %c3_643 = arith.constant 3 : index
    %c0_644 = arith.constant 0 : index
    %c106_645 = arith.constant 106 : index
    %1073 = vector.load %arg7[%c3_643, %c0_644, %c106_645] : memref<4x2x640xf32, #tpu.memory_space<vmem>>, vector<1x2x384xf32>
    %1074 = vector.shape_cast %1073 : vector<1x2x384xf32> to vector<2x384xf32>
    %1075 = vector.broadcast %1072 : f32 to vector<2x384xf32>
    %1076 = arith.mulf %1075, %1074 : vector<2x384xf32>
    %1077 = arith.addf %1071, %1076 : vector<2x384xf32>
    %c3_646 = arith.constant 3 : index
    %c6_647 = arith.constant 6 : index
    %1078 = memref.load %arg4[%c3_646, %c6_647] : memref<4x25xf32, #tpu.memory_space<smem>>
    %c3_648 = arith.constant 3 : index
    %c0_649 = arith.constant 0 : index
    %c107_650 = arith.constant 107 : index
    %1079 = vector.load %arg7[%c3_648, %c0_649, %c107_650] : memref<4x2x640xf32, #tpu.memory_space<vmem>>, vector<1x2x384xf32>
    %1080 = vector.shape_cast %1079 : vector<1x2x384xf32> to vector<2x384xf32>
    %1081 = vector.broadcast %1078 : f32 to vector<2x384xf32>
    %1082 = arith.mulf %1081, %1080 : vector<2x384xf32>
    %1083 = arith.addf %1077, %1082 : vector<2x384xf32>
    %c3_651 = arith.constant 3 : index
    %c7_652 = arith.constant 7 : index
    %1084 = memref.load %arg4[%c3_651, %c7_652] : memref<4x25xf32, #tpu.memory_space<smem>>
    %c3_653 = arith.constant 3 : index
    %c0_654 = arith.constant 0 : index
    %c108_655 = arith.constant 108 : index
    %1085 = vector.load %arg7[%c3_653, %c0_654, %c108_655] : memref<4x2x640xf32, #tpu.memory_space<vmem>>, vector<1x2x384xf32>
    %1086 = vector.shape_cast %1085 : vector<1x2x384xf32> to vector<2x384xf32>
    %1087 = vector.broadcast %1084 : f32 to vector<2x384xf32>
    %1088 = arith.mulf %1087, %1086 : vector<2x384xf32>
    %1089 = arith.addf %1083, %1088 : vector<2x384xf32>
    %c3_656 = arith.constant 3 : index
    %c8_657 = arith.constant 8 : index
    %1090 = memref.load %arg4[%c3_656, %c8_657] : memref<4x25xf32, #tpu.memory_space<smem>>
    %c3_658 = arith.constant 3 : index
    %c0_659 = arith.constant 0 : index
    %c109_660 = arith.constant 109 : index
    %1091 = vector.load %arg7[%c3_658, %c0_659, %c109_660] : memref<4x2x640xf32, #tpu.memory_space<vmem>>, vector<1x2x384xf32>
    %1092 = vector.shape_cast %1091 : vector<1x2x384xf32> to vector<2x384xf32>
    %1093 = vector.broadcast %1090 : f32 to vector<2x384xf32>
    %1094 = arith.mulf %1093, %1092 : vector<2x384xf32>
    %1095 = arith.addf %1089, %1094 : vector<2x384xf32>
    %c3_661 = arith.constant 3 : index
    %c9_662 = arith.constant 9 : index
    %1096 = memref.load %arg4[%c3_661, %c9_662] : memref<4x25xf32, #tpu.memory_space<smem>>
    %c3_663 = arith.constant 3 : index
    %c0_664 = arith.constant 0 : index
    %c110_665 = arith.constant 110 : index
    %1097 = vector.load %arg7[%c3_663, %c0_664, %c110_665] : memref<4x2x640xf32, #tpu.memory_space<vmem>>, vector<1x2x384xf32>
    %1098 = vector.shape_cast %1097 : vector<1x2x384xf32> to vector<2x384xf32>
    %1099 = vector.broadcast %1096 : f32 to vector<2x384xf32>
    %1100 = arith.mulf %1099, %1098 : vector<2x384xf32>
    %1101 = arith.addf %1095, %1100 : vector<2x384xf32>
    %c3_666 = arith.constant 3 : index
    %c10_667 = arith.constant 10 : index
    %1102 = memref.load %arg4[%c3_666, %c10_667] : memref<4x25xf32, #tpu.memory_space<smem>>
    %c3_668 = arith.constant 3 : index
    %c0_669 = arith.constant 0 : index
    %c126_670 = arith.constant 126 : index
    %1103 = vector.load %arg7[%c3_668, %c0_669, %c126_670] : memref<4x2x640xf32, #tpu.memory_space<vmem>>, vector<1x2x384xf32>
    %1104 = vector.shape_cast %1103 : vector<1x2x384xf32> to vector<2x384xf32>
    %1105 = vector.broadcast %1102 : f32 to vector<2x384xf32>
    %1106 = arith.mulf %1105, %1104 : vector<2x384xf32>
    %1107 = arith.addf %1101, %1106 : vector<2x384xf32>
    %c3_671 = arith.constant 3 : index
    %c11_672 = arith.constant 11 : index
    %1108 = memref.load %arg4[%c3_671, %c11_672] : memref<4x25xf32, #tpu.memory_space<smem>>
    %c3_673 = arith.constant 3 : index
    %c0_674 = arith.constant 0 : index
    %c127_675 = arith.constant 127 : index
    %1109 = vector.load %arg7[%c3_673, %c0_674, %c127_675] : memref<4x2x640xf32, #tpu.memory_space<vmem>>, vector<1x2x384xf32>
    %1110 = vector.shape_cast %1109 : vector<1x2x384xf32> to vector<2x384xf32>
    %1111 = vector.broadcast %1108 : f32 to vector<2x384xf32>
    %1112 = arith.mulf %1111, %1110 : vector<2x384xf32>
    %1113 = arith.addf %1107, %1112 : vector<2x384xf32>
    %c3_676 = arith.constant 3 : index
    %c12_677 = arith.constant 12 : index
    %1114 = memref.load %arg4[%c3_676, %c12_677] : memref<4x25xf32, #tpu.memory_space<smem>>
    %c3_678 = arith.constant 3 : index
    %c0_679 = arith.constant 0 : index
    %c128_680 = arith.constant 128 : index
    %1115 = vector.load %arg7[%c3_678, %c0_679, %c128_680] : memref<4x2x640xf32, #tpu.memory_space<vmem>>, vector<1x2x384xf32>
    %1116 = vector.shape_cast %1115 : vector<1x2x384xf32> to vector<2x384xf32>
    %1117 = vector.broadcast %1114 : f32 to vector<2x384xf32>
    %1118 = arith.mulf %1117, %1116 : vector<2x384xf32>
    %1119 = arith.addf %1113, %1118 : vector<2x384xf32>
    %c3_681 = arith.constant 3 : index
    %c13_682 = arith.constant 13 : index
    %1120 = memref.load %arg4[%c3_681, %c13_682] : memref<4x25xf32, #tpu.memory_space<smem>>
    %c3_683 = arith.constant 3 : index
    %c0_684 = arith.constant 0 : index
    %c129_685 = arith.constant 129 : index
    %1121 = vector.load %arg7[%c3_683, %c0_684, %c129_685] : memref<4x2x640xf32, #tpu.memory_space<vmem>>, vector<1x2x384xf32>
    %1122 = vector.shape_cast %1121 : vector<1x2x384xf32> to vector<2x384xf32>
    %1123 = vector.broadcast %1120 : f32 to vector<2x384xf32>
    %1124 = arith.mulf %1123, %1122 : vector<2x384xf32>
    %1125 = arith.addf %1119, %1124 : vector<2x384xf32>
    %c3_686 = arith.constant 3 : index
    %c14_687 = arith.constant 14 : index
    %1126 = memref.load %arg4[%c3_686, %c14_687] : memref<4x25xf32, #tpu.memory_space<smem>>
    %c3_688 = arith.constant 3 : index
    %c0_689 = arith.constant 0 : index
    %c130_690 = arith.constant 130 : index
    %1127 = vector.load %arg7[%c3_688, %c0_689, %c130_690] : memref<4x2x640xf32, #tpu.memory_space<vmem>>, vector<1x2x384xf32>
    %1128 = vector.shape_cast %1127 : vector<1x2x384xf32> to vector<2x384xf32>
    %1129 = vector.broadcast %1126 : f32 to vector<2x384xf32>
    %1130 = arith.mulf %1129, %1128 : vector<2x384xf32>
    %1131 = arith.addf %1125, %1130 : vector<2x384xf32>
    %c3_691 = arith.constant 3 : index
    %c15_692 = arith.constant 15 : index
    %1132 = memref.load %arg4[%c3_691, %c15_692] : memref<4x25xf32, #tpu.memory_space<smem>>
    %c3_693 = arith.constant 3 : index
    %c0_694 = arith.constant 0 : index
    %c146_695 = arith.constant 146 : index
    %1133 = vector.load %arg7[%c3_693, %c0_694, %c146_695] : memref<4x2x640xf32, #tpu.memory_space<vmem>>, vector<1x2x384xf32>
    %1134 = vector.shape_cast %1133 : vector<1x2x384xf32> to vector<2x384xf32>
    %1135 = vector.broadcast %1132 : f32 to vector<2x384xf32>
    %1136 = arith.mulf %1135, %1134 : vector<2x384xf32>
    %1137 = arith.addf %1131, %1136 : vector<2x384xf32>
    %c3_696 = arith.constant 3 : index
    %c16_697 = arith.constant 16 : index
    %1138 = memref.load %arg4[%c3_696, %c16_697] : memref<4x25xf32, #tpu.memory_space<smem>>
    %c3_698 = arith.constant 3 : index
    %c0_699 = arith.constant 0 : index
    %c147_700 = arith.constant 147 : index
    %1139 = vector.load %arg7[%c3_698, %c0_699, %c147_700] : memref<4x2x640xf32, #tpu.memory_space<vmem>>, vector<1x2x384xf32>
    %1140 = vector.shape_cast %1139 : vector<1x2x384xf32> to vector<2x384xf32>
    %1141 = vector.broadcast %1138 : f32 to vector<2x384xf32>
    %1142 = arith.mulf %1141, %1140 : vector<2x384xf32>
    %1143 = arith.addf %1137, %1142 : vector<2x384xf32>
    %c3_701 = arith.constant 3 : index
    %c17_702 = arith.constant 17 : index
    %1144 = memref.load %arg4[%c3_701, %c17_702] : memref<4x25xf32, #tpu.memory_space<smem>>
    %c3_703 = arith.constant 3 : index
    %c0_704 = arith.constant 0 : index
    %c148_705 = arith.constant 148 : index
    %1145 = vector.load %arg7[%c3_703, %c0_704, %c148_705] : memref<4x2x640xf32, #tpu.memory_space<vmem>>, vector<1x2x384xf32>
    %1146 = vector.shape_cast %1145 : vector<1x2x384xf32> to vector<2x384xf32>
    %1147 = vector.broadcast %1144 : f32 to vector<2x384xf32>
    %1148 = arith.mulf %1147, %1146 : vector<2x384xf32>
    %1149 = arith.addf %1143, %1148 : vector<2x384xf32>
    %c3_706 = arith.constant 3 : index
    %c18_707 = arith.constant 18 : index
    %1150 = memref.load %arg4[%c3_706, %c18_707] : memref<4x25xf32, #tpu.memory_space<smem>>
    %c3_708 = arith.constant 3 : index
    %c0_709 = arith.constant 0 : index
    %c149_710 = arith.constant 149 : index
    %1151 = vector.load %arg7[%c3_708, %c0_709, %c149_710] : memref<4x2x640xf32, #tpu.memory_space<vmem>>, vector<1x2x384xf32>
    %1152 = vector.shape_cast %1151 : vector<1x2x384xf32> to vector<2x384xf32>
    %1153 = vector.broadcast %1150 : f32 to vector<2x384xf32>
    %1154 = arith.mulf %1153, %1152 : vector<2x384xf32>
    %1155 = arith.addf %1149, %1154 : vector<2x384xf32>
    %c3_711 = arith.constant 3 : index
    %c19_712 = arith.constant 19 : index
    %1156 = memref.load %arg4[%c3_711, %c19_712] : memref<4x25xf32, #tpu.memory_space<smem>>
    %c3_713 = arith.constant 3 : index
    %c0_714 = arith.constant 0 : index
    %c150_715 = arith.constant 150 : index
    %1157 = vector.load %arg7[%c3_713, %c0_714, %c150_715] : memref<4x2x640xf32, #tpu.memory_space<vmem>>, vector<1x2x384xf32>
    %1158 = vector.shape_cast %1157 : vector<1x2x384xf32> to vector<2x384xf32>
    %1159 = vector.broadcast %1156 : f32 to vector<2x384xf32>
    %1160 = arith.mulf %1159, %1158 : vector<2x384xf32>
    %1161 = arith.addf %1155, %1160 : vector<2x384xf32>
    %c3_716 = arith.constant 3 : index
    %c20_717 = arith.constant 20 : index
    %1162 = memref.load %arg4[%c3_716, %c20_717] : memref<4x25xf32, #tpu.memory_space<smem>>
    %c3_718 = arith.constant 3 : index
    %c0_719 = arith.constant 0 : index
    %c166_720 = arith.constant 166 : index
    %1163 = vector.load %arg7[%c3_718, %c0_719, %c166_720] : memref<4x2x640xf32, #tpu.memory_space<vmem>>, vector<1x2x384xf32>
    %1164 = vector.shape_cast %1163 : vector<1x2x384xf32> to vector<2x384xf32>
    %1165 = vector.broadcast %1162 : f32 to vector<2x384xf32>
    %1166 = arith.mulf %1165, %1164 : vector<2x384xf32>
    %1167 = arith.addf %1161, %1166 : vector<2x384xf32>
    %c3_721 = arith.constant 3 : index
    %c21_722 = arith.constant 21 : index
    %1168 = memref.load %arg4[%c3_721, %c21_722] : memref<4x25xf32, #tpu.memory_space<smem>>
    %c3_723 = arith.constant 3 : index
    %c0_724 = arith.constant 0 : index
    %c167_725 = arith.constant 167 : index
    %1169 = vector.load %arg7[%c3_723, %c0_724, %c167_725] : memref<4x2x640xf32, #tpu.memory_space<vmem>>, vector<1x2x384xf32>
    %1170 = vector.shape_cast %1169 : vector<1x2x384xf32> to vector<2x384xf32>
    %1171 = vector.broadcast %1168 : f32 to vector<2x384xf32>
    %1172 = arith.mulf %1171, %1170 : vector<2x384xf32>
    %1173 = arith.addf %1167, %1172 : vector<2x384xf32>
    %c3_726 = arith.constant 3 : index
    %c22_727 = arith.constant 22 : index
    %1174 = memref.load %arg4[%c3_726, %c22_727] : memref<4x25xf32, #tpu.memory_space<smem>>
    %c3_728 = arith.constant 3 : index
    %c0_729 = arith.constant 0 : index
    %c168_730 = arith.constant 168 : index
    %1175 = vector.load %arg7[%c3_728, %c0_729, %c168_730] : memref<4x2x640xf32, #tpu.memory_space<vmem>>, vector<1x2x384xf32>
    %1176 = vector.shape_cast %1175 : vector<1x2x384xf32> to vector<2x384xf32>
    %1177 = vector.broadcast %1174 : f32 to vector<2x384xf32>
    %1178 = arith.mulf %1177, %1176 : vector<2x384xf32>
    %1179 = arith.addf %1173, %1178 : vector<2x384xf32>
    %c3_731 = arith.constant 3 : index
    %c23_732 = arith.constant 23 : index
    %1180 = memref.load %arg4[%c3_731, %c23_732] : memref<4x25xf32, #tpu.memory_space<smem>>
    %c3_733 = arith.constant 3 : index
    %c0_734 = arith.constant 0 : index
    %c169_735 = arith.constant 169 : index
    %1181 = vector.load %arg7[%c3_733, %c0_734, %c169_735] : memref<4x2x640xf32, #tpu.memory_space<vmem>>, vector<1x2x384xf32>
    %1182 = vector.shape_cast %1181 : vector<1x2x384xf32> to vector<2x384xf32>
    %1183 = vector.broadcast %1180 : f32 to vector<2x384xf32>
    %1184 = arith.mulf %1183, %1182 : vector<2x384xf32>
    %1185 = arith.addf %1179, %1184 : vector<2x384xf32>
    %c3_736 = arith.constant 3 : index
    %c24_737 = arith.constant 24 : index
    %1186 = memref.load %arg4[%c3_736, %c24_737] : memref<4x25xf32, #tpu.memory_space<smem>>
    %c3_738 = arith.constant 3 : index
    %c0_739 = arith.constant 0 : index
    %c170_740 = arith.constant 170 : index
    %1187 = vector.load %arg7[%c3_738, %c0_739, %c170_740] : memref<4x2x640xf32, #tpu.memory_space<vmem>>, vector<1x2x384xf32>
    %1188 = vector.shape_cast %1187 : vector<1x2x384xf32> to vector<2x384xf32>
    %1189 = vector.broadcast %1186 : f32 to vector<2x384xf32>
    %1190 = arith.mulf %1189, %1188 : vector<2x384xf32>
    %1191 = arith.addf %1185, %1190 : vector<2x384xf32>
    %1192 = arith.addf %1042, %1191 : vector<2x384xf32>
    %cst_741 = arith.constant 0.000000e+00 : f32
    %1193 = vector.broadcast %cst_741 : f32 to vector<2x384xf32>
    %1194 = arith.maximumf %1192, %1193 : vector<2x384xf32>
    %c0_742 = arith.constant 0 : index
    %c0_743 = arith.constant 0 : index
    %c0_744 = arith.constant 0 : index
    %1195 = vector.load %arg6[%c0_742, %c0_743, %c0_744] : memref<1x2x384xf32, #tpu.memory_space<vmem>>, vector<1x2x384xf32>
    %1196 = vector.shape_cast %1195 : vector<1x2x384xf32> to vector<2x384xf32>
    %1197 = vector.shape_cast %1194 : vector<2x384xf32> to vector<1x2x384xf32>
    tpu.vector_store %arg6[%c0_742, %c0_743, %c0_744], %1197 {strides = array<i32>} : memref<1x2x384xf32, #tpu.memory_space<vmem>>, vector<1x2x384xf32>,
    return
  }
  func.func @transform_0(%arg0: i32) -> (i32, i32, i32) {
    %c0_i32 = arith.constant 0 : i32
    %c0_i32_0 = arith.constant 0 : i32
    %c0_i32_1 = arith.constant 0 : i32
    return %arg0, %c0_i32, %c0_i32_0 : i32, i32, i32
  }
  func.func @transform_1(%arg0: i32) -> (i32, i32) {
    %c0_i32 = arith.constant 0 : i32
    %c0_i32_0 = arith.constant 0 : i32
    %c0_i32_1 = arith.constant 0 : i32
    return %c0_i32, %c0_i32_0 : i32, i32
  }
  func.func @transform_2(%arg0: i32) -> i32 {
    %c0_i32 = arith.constant 0 : i32
    %c0_i32_0 = arith.constant 0 : i32
    return %c0_i32 : i32
  }
  func.func @transform_3(%arg0: i32) -> (i32, i32) {
    %c0_i32 = arith.constant 0 : i32
    %c0_i32_0 = arith.constant 0 : i32
    %c0_i32_1 = arith.constant 0 : i32
    return %c0_i32, %c0_i32_0 : i32, i32
  }
  func.func @transform_4(%arg0: i32) -> i32 {
    %c0_i32 = arith.constant 0 : i32
    %c0_i32_0 = arith.constant 0 : i32
    return %c0_i32 : i32
  }
  func.func @transform_5(%arg0: i32) -> (i32, i32, i32) {
    %c0_i32 = arith.constant 0 : i32
    %c0_i32_0 = arith.constant 0 : i32
    %c0_i32_1 = arith.constant 0 : i32
    return %arg0, %c0_i32, %c0_i32_0 : i32, i32, i32
  }
}

</mosaic_0001>

<bundles_post_ra>
// kernel: _forward_impl.1
= control target key start
LH: loop header
LB: loop body
LE: loop exit
PB: predicated region body
PF: predicated region fallthrough
CT: control target
= control target key end

     0   :  { %11 = vsyncpa [#allocation5], 0  ;;  %s4257_s0 = inlined_call_operand.vmem [shape: f32[1,2,512], index: 0, kind: input, shape index: {}]   ;;  %s4258_s1 = inlined_call_operand.vmem [shape: f32[4,25], index: 1, kind: input, shape index: {}]   ;;  %s4259_s2 = inlined_call_operand.vmem [shape: f32[4], index: 2, kind: input, shape index: {}]   ;;  %s4260_s3 = inlined_call_operand.vmem [shape: f32[4,25], index: 3, kind: input, shape index: {}]   ;;  %s4261_s4 = inlined_call_operand.<no memory space> [shape: f32[1], index: 4, kind: input, shape index: {}]   ;;  %s4262_s5 = inlined_call_operand.vmem [shape: f32[1,2,384], index: 5, kind: output, shape index: {}]  }
   0x1   :  { %12 = vsyncpa [#allocation7], 0  ;;  %s31_s20 = sshll.u32 %s4259_s2, 4  ;;  %s21_s23 = sshll.u32 %s4258_s1, 4  ;;  %s32_s20 = int_to_ptr.vmem [resolvable:$true] %s31_s20  ;;  %s22_s23 = int_to_ptr.vmem [resolvable:$true] %s21_s23 }
   0x2   :  { %s2688_s24 = scalar_lea.vmem %s32_s20, 16  ;;  %p2693_p1 = scmp.lt.s32.totalorder %s32_s20, %s32_s20 }
   0x3   :  { %p2689_p0 = scmp.ne.s32.totalorder %s32_s20, %s2688_s24  ;;  %p2694_p2 = scmp.lt.s32.totalorder %s2688_s24, %s2688_s24 }
   0x5   :  { %p2695_p3 = por %p2694_p2, %p2693_p1 }
   0x7   :  { %p2696_p4 = pnand %p2695_p3, %p2689_p0 }
   0x9   :  { %2699 = shalt.err (!%p2696_p4)
}
   0xa   :  { %s2728_s25 = smov [#allocation6]   ;;  %s2700_s26 = scalar_lea.vmem %s22_s23, 64 }
   0xb   :  { %34 = dma.vmem_to_smem %s32_s20, 16, %s2728_s25, [#allocation7]  }
   0xc   :  { %p2701_p5 = scmp.ne.s32.totalorder %s22_s23, %s2700_s26  ;;  %p2705_p6 = scmp.lt.s32.totalorder %s22_s23, %s22_s23 }
   0xd   :  { %p2706_p7 = scmp.lt.s32.totalorder %s2700_s26, %s2700_s26 }
   0xf   :  { %p2707_p8 = por %p2706_p7, %p2705_p6 }
  0x11   :  { %p2708_p9 = pnand %p2707_p8, %p2701_p5 }
  0x13   :  { %2711 = shalt.err (!%p2708_p9)
}
  0x14   :  { %s2729_s2 = smov [#allocation4]   ;;  %s41_s28 = sshll.u32 %s4260_s3, 4  ;;  %s42_s28 = int_to_ptr.vmem [resolvable:$true] %s41_s28 }
  0x15   :  { %24 = dma.vmem_to_smem %s22_s23, 64, %s2729_s2, [#allocation5]  }
  0x16   :  { %s2712_s29 = scalar_lea.vmem %s42_s28, 64  ;;  %p2717_p11 = scmp.lt.s32.totalorder %s42_s28, %s42_s28 }
  0x17   :  { %p2713_p10 = scmp.ne.s32.totalorder %s42_s28, %s2712_s29  ;;  %p2718_p12 = scmp.lt.s32.totalorder %s2712_s29, %s2712_s29 }
  0x19   :  { %p2719_p13 = por %p2718_p12, %p2717_p11 }
  0x1b   :  { %p2720_p0 = pnand %p2719_p13, %p2713_p10 }
  0x1d   :  { %2723 = shalt.err (!%p2720_p0)
}
  0x1e   :  { %s2730_s30 = smov [#allocation8]  }
  0x1f   :  { %44 = dma.vmem_to_smem %s42_s28, 64, %s2730_s30, [#allocation7]  }
  0x20   :  { %2724 = dma.done.wait [#allocation5], 64  }
  0x21   :  { %2725 = vsyncadd [#allocation5], 4294967232 }
  0x22   :  { %2726 = dma.done.wait [#allocation7], 80  }
  0x23   :  { %2727 = vsyncadd [#allocation7], 4294967216 }
  0x24   :  { %56 = sfence }
  0x25   :  { %s2464_s6 = sld [smem:[#allocation4 + $0x101]]  ;;  %v2801_v0 = vld [vmem:[%s4257_s0] sm:$0xff]  ;;  %s2731_s15 = smov 127   ;;  %vm4298_vm0 = vcmask 1039360   ;;  %vm4296_vm1 = vcmask 1031168   ;;  %vm4295_vm2 = vcmask 1022976  }
  0x26   :  { %s2462_s7 = sld [smem:[#allocation4 + $0x1]]  ;;  %s2732_s20 = smov 126   ;;  %vm4294_vm3 = vcmask 1014784   ;;  %vm4293_vm4 = vcmask 883712   ;;  %vm4291_vm5 = vcmask 875520   ;;  %vm4292_vm6 = vcmask 867328  }
  0x27   :  { %s2465_s8 = sld [smem:[#allocation4 + $0x181]]  ;;  %s2733_s25 = smov 125   ;;  %vm4297_vm7 = vcmask 859136   ;;  %vm4299_vm8 = vcmask 850944   ;;  %vm4300_vm11 = vcmask 719872   ;;  %vm4301_vm14 = vcmask 711680  }
  0x28   :  { %s2463_s9 = sld [smem:[#allocation4 + $0x81]]  ;;  %s2734_s28 = smov 124  }
  0x29   :  { %s2467_s11 = sld [smem:[#allocation4 + $0x82]] }
  0x2a   :  { %s2466_s12 = sld [smem:[#allocation4 + $0x2]] }
  0x2b   :  { %v292_v1 = vstv %s2464_s6  ;;  %s2469_s13 = sld [smem:[#allocation4 + $0x182]] }
  0x2c   :  { %v293_v2 = vmul.f32 %v292_v1, %v2801_v0  ;;  %v271_v3 = vstv %s2462_s7  ;;  %s2468_s14 = sld [smem:[#allocation4 + $0x102]] }
  0x2d   :  { %v272_v4 = vmul.f32 %v271_v3, %v2801_v0  ;;  %v302_v5 = vstv %s2465_s8  ;;  %s2471_s16 = sld [smem:[#allocation4 + $0x83]]  ;;  %s2735_s8 = smov 108  }
  0x2e   :  { %295 = vrot.lane.b32.xlu1 %v293_v2, %s2731_s15  ;;  %v303_v6 = vmul.f32 %v302_v5, %v2801_v0  ;;  %v282_v7 = vstv %s2463_s9  ;;  %s2470_s17 = sld [smem:[#allocation4 + $0x3]] }
  0x2f   :  { %274 = vrot.lane.b32.xlu0 %v272_v4, %s2731_s15  ;;  %v283_v8 = vmul.f32 %v282_v7, %v2801_v0  ;;  %v323_v9 = vstv %s2467_s11  ;;  %s2473_s18 = sld [smem:[#allocation4 + $0x183]] }
  0x30   :  { %v312_v10 = vstv %s2466_s12  ;;  %v324_v11 = vmul.f32 %v323_v9, %v2801_v0  ;;  %s2472_s19 = sld [smem:[#allocation4 + $0x103]]  ;;  %s2736_s12 = smov 107  }
  0x31   :  { %v313_v12 = vmul.f32 %v312_v10, %v2801_v0  ;;  %v343_v13 = vstv %s2469_s13  ;;  %s2475_s21 = sld [smem:[#allocation4 + $0x84]] }
  0x32   :  { %305 = vrot.lane.b32.xlu1 %v303_v6, %s2731_s15  ;;  %v333_v14 = vstv %s2468_s14  ;;  %v344_v15 = vmul.f32 %v343_v13, %v2801_v0  ;;  %s2474_s22 = sld [smem:[#allocation4 + $0x4]] }
  0x33   :  { %285 = vrot.lane.b32.xlu0 %v283_v8, %s2731_s15  ;;  %v334_v16 = vmul.f32 %v333_v14, %v2801_v0  ;;  %v364_v17 = vstv %s2471_s16  ;;  %s2477_s23 = sld [smem:[#allocation4 + $0x184]] }
  0x34   :  { %v353_v18 = vstv %s2470_s17  ;;  %v365_v19 = vmul.f32 %v364_v17, %v2801_v0  ;;  %s2476_s24 = sld [smem:[#allocation4 + $0x104]] }
  0x35   :  { %v354_v20 = vmul.f32 %v353_v18, %v2801_v0  ;;  %v384_v21 = vstv %s2473_s18  ;;  %s2479_s26 = sld [smem:[#allocation4 + $0x85]]  ;;  %s2737_s18 = smov 106  }
  0x36   :  { %326 = vrot.lane.b32.xlu1 %v324_v11, %s2732_s20  ;;  %v374_v22 = vstv %s2472_s19  ;;  %v385_v23 = vmul.f32 %v384_v21, %v2801_v0  ;;  %s2478_s2 = sld [smem:[#allocation4 + $0x5]] }
  0x37   :  { %315 = vrot.lane.b32.xlu0 %v313_v12, %s2732_s20  ;;  %v375_v24 = vmul.f32 %v374_v22, %v2801_v0  ;;  %v405_v25 = vstv %s2475_s21  ;;  %s2481_s1 = sld [smem:[#allocation4 + $0x185]] }
  0x38   :  { %v394_v26 = vstv %s2474_s22  ;;  %v406_v27 = vmul.f32 %v405_v25, %v2801_v0  ;;  %s2480_s27 = sld [smem:[#allocation4 + $0x105]] }
  0x39   :  { %v395_v28 = vmul.f32 %v394_v26, %v2801_v0  ;;  %v425_v29 = vstv %s2477_s23  ;;  %s2483_s29 = sld [smem:[#allocation4 + $0x86]] }
  0x3a   :  { %346 = vrot.lane.b32.xlu1 %v344_v15, %s2732_s20  ;;  %v415_v30 = vstv %s2476_s24  ;;  %v426_v31 = vmul.f32 %v425_v29, %v2801_v0  ;;  %s2482_s30 = sld [smem:[#allocation4 + $0x6]]  ;;  %s2738_s24 = smov 105  }
  0x3b   :  { %336 = vrot.lane.b32.xlu0 %v334_v16, %s2732_s20  ;;  %v416_v32 = vmul.f32 %v415_v30, %v2801_v0  ;;  %v446_v33 = vstv %s2479_s26  ;;  %s2485_s6 = sld [smem:[#allocation4 + $0x186]] }
  0x3c   :  { %v435_v34 = vstv %s2478_s2  ;;  %v447_v35 = vmul.f32 %v446_v33, %v2801_v0  ;;  %s2484_s7 = sld [smem:[#allocation4 + $0x106]] }
  0x3d   :  { %v436_v36 = vmul.f32 %v435_v34, %v2801_v0  ;;  %v466_v37 = vstv %s2481_s1  ;;  %s2487_s9 = sld [smem:[#allocation4 + $0x87]] }
  0x3e   :  { %367 = vrot.lane.b32.xlu1 %v365_v19, %s2733_s25  ;;  %v456_v38 = vstv %s2480_s27  ;;  %v467_v39 = vmul.f32 %v466_v37, %v2801_v0  ;;  %s2486_s3 = sld [smem:[#allocation4 + $0x7]] }
  0x3f   :  { %356 = vrot.lane.b32.xlu0 %v354_v20, %s2733_s25  ;;  %v457_v40 = vmul.f32 %v456_v38, %v2801_v0  ;;  %v487_v41 = vstv %s2483_s29  ;;  %s2489_s10 = sld [smem:[#allocation4 + $0x187]]  ;;  %s2739_s29 = smov 104  }
  0x40   :  { %v476_v42 = vstv %s2482_s30  ;;  %v488_v43 = vmul.f32 %v487_v41, %v2801_v0  ;;  %s2488_s11 = sld [smem:[#allocation4 + $0x107]] }
  0x41   :  { %v477_v44 = vmul.f32 %v476_v42, %v2801_v0  ;;  %v507_v45 = vstv %s2485_s6  ;;  %s2491_s13 = sld [smem:[#allocation4 + $0x88]] }
  0x42   :  { %387 = vrot.lane.b32.xlu1 %v385_v23, %s2733_s25  ;;  %v497_v46 = vstv %s2484_s7  ;;  %v508_v47 = vmul.f32 %v507_v45, %v2801_v0  ;;  %s2490_s14 = sld [smem:[#allocation4 + $0x8]] }
  0x43   :  { %377 = vrot.lane.b32.xlu0 %v375_v24, %s2733_s25  ;;  %v498_v48 = vmul.f32 %v497_v46, %v2801_v0  ;;  %v528_v49 = vstv %s2487_s9  ;;  %s2493_s16 = sld [smem:[#allocation4 + $0x188]] }
  0x44   :  { %v517_v50 = vstv %s2486_s3  ;;  %v529_v51 = vmul.f32 %v528_v49, %v2801_v0  ;;  %s2492_s17 = sld [smem:[#allocation4 + $0x108]]  ;;  %s2740_s3 = smov 88  }
  0x45   :  { %v518_v52 = vmul.f32 %v517_v50, %v2801_v0  ;;  %v548_v53 = vstv %s2489_s10  ;;  %s2495_s19 = sld [smem:[#allocation4 + $0x89]] }
  0x46   :  { %408 = vrot.lane.b32.xlu1 %v406_v27, %s2734_s28  ;;  %v538_v54 = vstv %s2488_s11  ;;  %v549_v55 = vmul.f32 %v548_v53, %v2801_v0  ;;  %s2494_s21 = sld [smem:[#allocation4 + $0x9]] }
  0x47   :  { %397 = vrot.lane.b32.xlu0 %v395_v28, %s2734_s28  ;;  %v539_v56 = vmul.f32 %v538_v54, %v2801_v0  ;;  %v569_v57 = vstv %s2491_s13  ;;  %s2497_s22 = sld [smem:[#allocation4 + $0x189]] }
  0x48   :  { %v558_v58 = vstv %s2490_s14  ;;  %v570_v59 = vmul.f32 %v569_v57, %v2801_v0  ;;  %s2496_s23 = sld [smem:[#allocation4 + $0x109]] }
  0x49   :  { %v559_v60 = vmul.f32 %v558_v58, %v2801_v0  ;;  %v589_v61 = vstv %s2493_s16  ;;  %s2499_s26 = sld [smem:[#allocation4 + $0x8a]]  ;;  %s2741_s16 = smov 87  }
  0x4a   :  { %428 = vrot.lane.b32.xlu1 %v426_v31, %s2734_s28  ;;  %v579_v62 = vstv %s2492_s17  ;;  %v590_v63 = vmul.f32 %v589_v61, %v2801_v0  ;;  %s2498_s2 = sld [smem:[#allocation4 + $0xa]] }
  0x4b   :  { %418 = vrot.lane.b32.xlu0 %v416_v32, %s2734_s28  ;;  %v580_v1 = vmul.f32 %v579_v62, %v2801_v0  ;;  %v610_v2 = vstv %s2495_s19  ;;  %s2501_s1 = sld [smem:[#allocation4 + $0x18a]] }
  0x4c   :  { %v599_v3 = vstv %s2494_s21  ;;  %v611_v4 = vmul.f32 %v610_v2, %v2801_v0  ;;  %s2500_s27 = sld [smem:[#allocation4 + $0x10a]] }
  0x4d   :  { %v600_v5 = vmul.f32 %v599_v3, %v2801_v0  ;;  %v630_v6 = vstv %s2497_s22  ;;  %s2503_s30 = sld [smem:[#allocation4 + $0x8b]] }
  0x4e   :  { %449 = vrot.lane.b32.xlu1 %v447_v35, %s2735_s8  ;;  %v620_v7 = vstv %s2496_s23  ;;  %v631_v8 = vmul.f32 %v630_v6, %v2801_v0  ;;  %s2502_s6 = sld [smem:[#allocation4 + $0xb]]  ;;  %s2742_s23 = smov 86  }
  0x4f   :  { %438 = vrot.lane.b32.xlu0 %v436_v36, %s2735_s8  ;;  %v621_v9 = vmul.f32 %v620_v7, %v2801_v0  ;;  %v651_v10 = vstv %s2499_s26  ;;  %s2505_s7 = sld [smem:[#allocation4 + $0x18b]] }
  0x50   :  { %v640_v11 = vstv %s2498_s2  ;;  %v652_v12 = vmul.f32 %v651_v10, %v2801_v0  ;;  %s2504_s9 = sld [smem:[#allocation4 + $0x10b]] }
  0x51   :  { %v641_v13 = vmul.f32 %v640_v11, %v2801_v0  ;;  %v671_v14 = vstv %s2501_s1  ;;  %s2507_s10 = sld [smem:[#allocation4 + $0x8c]] }
  0x52   :  { %469 = vrot.lane.b32.xlu1 %v467_v39, %s2735_s8  ;;  %v661_v15 = vstv %s2500_s27  ;;  %v672_v16 = vmul.f32 %v671_v14, %v2801_v0  ;;  %s2506_s11 = sld [smem:[#allocation4 + $0xc]] }
  0x53   :  { %459 = vrot.lane.b32.xlu0 %v457_v40, %s2735_s8  ;;  %v662_v17 = vmul.f32 %v661_v15, %v2801_v0  ;;  %v692_v18 = vstv %s2503_s30  ;;  %s2509_s13 = sld [smem:[#allocation4 + $0x18c]]  ;;  %s2743_s30 = smov 85  }
  0x54   :  { %v681_v19 = vstv %s2502_s6  ;;  %v693_v20 = vmul.f32 %v692_v18, %v2801_v0  ;;  %s2508_s14 = sld [smem:[#allocation4 + $0x10c]] }
  0x55   :  { %v682_v21 = vmul.f32 %v681_v19, %v2801_v0  ;;  %v712_v22 = vstv %s2505_s7  ;;  %s2511_s17 = sld [smem:[#allocation4 + $0x8d]] }
  0x56   :  { %490 = vrot.lane.b32.xlu1 %v488_v43, %s2736_s12  ;;  %v702_v23 = vstv %s2504_s9  ;;  %v713_v24 = vmul.f32 %v712_v22, %v2801_v0  ;;  %s2510_s19 = sld [smem:[#allocation4 + $0xd]]  ;;  %s2744_s9 = smov 84  }
  0x57   :  { %479 = vrot.lane.b32.xlu0 %v477_v44, %s2736_s12  ;;  %v703_v25 = vmul.f32 %v702_v23, %v2801_v0  ;;  %v733_v26 = vstv %s2507_s10  ;;  %s2512_s21 = sld [smem:[#allocation4 + $0x10d]] }
  0x58   :  { %v722_v27 = vstv %s2506_s11  ;;  %v734_v28 = vmul.f32 %v733_v26, %v2801_v0  ;;  %s2514_s22 = sld [smem:[#allocation4 + $0xe]] }
  0x59   :  { %v723_v29 = vmul.f32 %v722_v27, %v2801_v0  ;;  %v753_v30 = vstv %s2509_s13  ;;  %s2518_s26 = sld [smem:[#allocation4 + $0xf]]  ;;  %s2745_s13 = smov 68  }
  0x5a   :  { %510 = vrot.lane.b32.xlu1 %v508_v47, %s2736_s12  ;;  %v743_v31 = vstv %s2508_s14  ;;  %v754_v32 = vmul.f32 %v753_v30, %v2801_v0  ;;  %s2515_s2 = sld [smem:[#allocation4 + $0x8e]] }
  0x5b   :  { %500 = vrot.lane.b32.xlu0 %v498_v48, %s2736_s12  ;;  %v744_v33 = vmul.f32 %v743_v31, %v2801_v0  ;;  %v774_v34 = vstv %s2511_s17  ;;  %s2516_s1 = sld [smem:[#allocation4 + $0x10e]] }
  0x5c   :  { %v763_v35 = vstv %s2510_s19  ;;  %v775_v36 = vmul.f32 %v774_v34, %v2801_v0  ;;  %s2513_s27 = sld [smem:[#allocation4 + $0x18d]] }
  0x5d   :  { %v764_v37 = vmul.f32 %v763_v35, %v2801_v0  ;;  %v784_v38 = vstv %s2512_s21  ;;  %s2522_s6 = sld [smem:[#allocation4 + $0x10]] }
  0x5e   :  { %531 = vrot.lane.b32.xlu1 %v529_v51, %s2737_s18  ;;  %v804_v39 = vstv %s2514_s22  ;;  %v785_v40 = vmul.f32 %v784_v38, %v2801_v0  ;;  %s2519_s7 = sld [smem:[#allocation4 + $0x8f]]  ;;  %s2746_s22 = smov 67  }
  0x5f   :  { %520 = vrot.lane.b32.xlu0 %v518_v52, %s2737_s18  ;;  %v805_v41 = vmul.f32 %v804_v39, %v2801_v0  ;;  %v845_v42 = vstv %s2518_s26  ;;  %s2520_s10 = sld [smem:[#allocation4 + $0x10f]] }
  0x60   :  { %v815_v43 = vstv %s2515_s2  ;;  %v846_v44 = vmul.f32 %v845_v42, %v2801_v0  ;;  %s2517_s11 = sld [smem:[#allocation4 + $0x18e]] }
  0x61   :  { %v816_v45 = vmul.f32 %v815_v43, %v2801_v0  ;;  %v825_v46 = vstv %s2516_s1  ;;  %s2526_s14 = sld [smem:[#allocation4 + $0x11]] }
  0x62   :  { %551 = vrot.lane.b32.xlu1 %v549_v55, %s2737_s18  ;;  %v794_v47 = vstv %s2513_s27  ;;  %v826_v48 = vmul.f32 %v825_v46, %v2801_v0  ;;  %s2523_s17 = sld [smem:[#allocation4 + $0x90]] }
  0x63   :  { %541 = vrot.lane.b32.xlu0 %v539_v56, %s2737_s18  ;;  %v795_v49 = vmul.f32 %v794_v47, %v2801_v0  ;;  %v886_v50 = vstv %s2522_s6  ;;  %s2524_s19 = sld [smem:[#allocation4 + $0x110]]  ;;  %s2747_s6 = smov 66  }
  0x64   :  { %v856_v51 = vstv %s2519_s7  ;;  %v887_v52 = vmul.f32 %v886_v50, %v2801_v0  ;;  %s2521_s21 = sld [smem:[#allocation4 + $0x18f]] }
  0x65   :  { %v857_v53 = vmul.f32 %v856_v51, %v2801_v0  ;;  %v866_v54 = vstv %s2520_s10  ;;  %s2530_s26 = sld [smem:[#allocation4 + $0x12]] }
  0x66   :  { %572 = vrot.lane.b32.xlu1 %v570_v59, %s2738_s24  ;;  %v835_v55 = vstv %s2517_s11  ;;  %v867_v56 = vmul.f32 %v866_v54, %v2801_v0  ;;  %s2527_s2 = sld [smem:[#allocation4 + $0x91]] }
  0x67   :  { %561 = vrot.lane.b32.xlu0 %v559_v60, %s2738_s24  ;;  %v836_v57 = vmul.f32 %v835_v55, %v2801_v0  ;;  %v927_v58 = vstv %s2526_s14  ;;  %s2528_s1 = sld [smem:[#allocation4 + $0x111]] }
  0x68   :  { %v897_v60 = vstv %s2523_s17  ;;  %v928_v62 = vmul.f32 %v927_v58, %v2801_v0  ;;  %s2525_s27 = sld [smem:[#allocation4 + $0x190]]  ;;  %s2748_s17 = smov 65  }
  0x69   :  { %s2534_s7 = sld [smem:[#allocation4 + $0x13]] }
  0x6a   :  { %592 = vrot.lane.b32.xlu1 %v590_v63, %s2738_s24  ;;  %v898_v63 = vmul.f32 %v897_v60, %v2801_v0  ;;  %v876_v3 = vstv %s2521_s21  ;;  %s2531_s10 = sld [smem:[#allocation4 + $0x92]] }
  0x6b   :  { %582 = vrot.lane.b32.xlu0 %v580_v1, %s2738_s24  ;;  %v907_v1 = vstv %s2524_s19  ;;  %v877_v6 = vmul.f32 %v876_v3, %v2801_v0  ;;  %v968_v7 = vstv %s2530_s26  ;;  %s2532_s11 = sld [smem:[#allocation4 + $0x112]] }
  0x6c   :  { %v969_v11 = vmul.f32 %v968_v7, %v2801_v0  ;;  %s2529_s14 = sld [smem:[#allocation4 + $0x191]] }
  0x6d   :  { %s2538_s19 = sld [smem:[#allocation4 + $0x14]] }
  0x6e   :  { %613 = vrot.lane.b32.xlu1 %v611_v4, %s2739_s29  ;;  %v917_v15 = vstv %s2525_s27  ;;  %s2535_s21 = sld [smem:[#allocation4 + $0x93]] }
  0x6f   :  { %602 = vrot.lane.b32.xlu0 %v600_v5, %s2739_s29  ;;  %v908_v5 = vmul.f32 %v907_v1, %v2801_v0  ;;  %v918_v18 = vmul.f32 %v917_v15, %v2801_v0  ;;  %v1009_v19 = vstv %s2534_s7  ;;  %s2536_s26 = sld [smem:[#allocation4 + $0x113]] }
  0x70   :  { %v1010_v23 = vmul.f32 %v1009_v19, %v2801_v0  ;;  %s2542_s27 = sld [smem:[#allocation4 + $0x15]] }
  0x71   :  { %s2539_s7 = sld [smem:[#allocation4 + $0x94]] }
  0x72   :  { %633 = vrot.lane.b32.xlu1 %v631_v8, %s2739_s29  ;;  %v958_v27 = vstv %s2529_s14  ;;  %s4265_s14 = smov 48  }
  0x73   :  { %623 = vrot.lane.b32.xlu0 %v621_v9, %s2739_s29  ;;  %v938_v9 = vstv %s2527_s2  ;;  %s2533_s2 = sld [smem:[#allocation4 + $0x192]]  ;;  %v959_v30 = vmul.f32 %v958_v27, %v2801_v0  ;;  %v1050_v31 = vstv %s2538_s19 }
  0x74   :  { %v1051_v35 = vmul.f32 %v1050_v31, %v2801_v0  ;;  %s2546_s19 = sld [smem:[#allocation4 + $0x16]] }
  0x76   :  { %654 = vrot.lane.b32.xlu1 %v652_v12, %s2740_s3  ;;  %v939_v12 = vmul.f32 %v938_v9, %v2801_v0  ;;  %v1091_v43 = vstv %s2542_s27  ;;  %s4273_s27 = smov 47  }
  0x77   :  { %643 = vrot.lane.b32.xlu0 %v641_v13, %s2740_s3  ;;  %v948_v13 = vstv %s2528_s1  ;;  %s4263_s1 = smov 64   ;;  %v1092_v47 = vmul.f32 %v1091_v43, %v2801_v0 }
  0x79   :  { %v999_v39 = vstv %s2533_s2  ;;  %s2541_s2 = sld [smem:[#allocation4 + $0x194]] }
  0x7a   :  { %674 = vrot.lane.b32.xlu1 %v672_v16, %s2740_s3  ;;  %v1000_v42 = vmul.f32 %v999_v39, %v2801_v0  ;;  %v1132_v55 = vstv %s2546_s19  ;;  %s2545_s19 = sld [smem:[#allocation4 + $0x195]] }
  0x7b   :  { %664 = vrot.lane.b32.xlu0 %v662_v17, %s2740_s3  ;;  %v949_v17 = vmul.f32 %v948_v13, %v2801_v0  ;;  %v1133_v60 = vmul.f32 %v1132_v55, %v2801_v0 }
  0x7e   :  { %695 = vrot.lane.b32.xlu1 %v693_v20, %s2741_s16 }
  0x7f   :  { %684 = vrot.lane.b32.xlu0 %v682_v21, %s2741_s16  ;;  %v979_v21 = vstv %s2531_s10  ;;  %s2540_s10 = sld [smem:[#allocation4 + $0x114]]  ;;  %v1081_v3 = vstv %s2541_s2 }
  0x80   :  { %v1082_v7 = vmul.f32 %v1081_v3, %v2801_v0  ;;  %s2552_s2 = sld [smem:[#allocation4 + $0x117]] }
  0x82   :  { %715 = vrot.lane.b32.xlu1 %v713_v24, %s2741_s16  ;;  %v980_v24 = vmul.f32 %v979_v21, %v2801_v0  ;;  %v1122_v21 = vstv %s2545_s19  ;;  %s3041_s19 = sld [smem:[#allocation4 + $0x198]] }
  0x83   :  { %705 = vrot.lane.b32.xlu0 %v703_v25, %s2741_s16  ;;  %v989_v25 = vstv %s2532_s11  ;;  %s2537_s11 = sld [smem:[#allocation4 + $0x193]] }
  0x86   :  { %736 = vrot.lane.b32.xlu1 %v734_v28, %s2742_s23 }
  0x87   :  { %725 = vrot.lane.b32.xlu0 %v723_v29, %s2742_s23  ;;  %v990_v29 = vmul.f32 %v989_v25, %v2801_v0  ;;  %v1123_v25 = vmul.f32 %v1122_v21, %v2801_v0 }
  0x89   :  { %v1040_v51 = vstv %s2537_s11  ;;  %s2548_s11 = sld [smem:[#allocation4 + $0x116]] }
  0x8a   :  { %756 = vrot.lane.b32.xlu1 %v754_v32, %s2742_s23  ;;  %v1041_v54 = vmul.f32 %v1040_v51, %v2801_v0 }
  0x8b   :  { %746 = vrot.lane.b32.xlu0 %v744_v33, %s2742_s23  ;;  %v1020_v33 = vstv %s2535_s21  ;;  %s2543_s21 = sld [smem:[#allocation4 + $0x95]] }
  0x8e   :  { %777 = vrot.lane.b32.xlu1 %v775_v36, %s2743_s30  ;;  %v1021_v36 = vmul.f32 %v1020_v33, %v2801_v0 }
  0x8f   :  { %766 = vrot.lane.b32.xlu0 %v764_v37, %s2743_s30  ;;  %v1030_v37 = vstv %s2536_s26  ;;  %s2544_s26 = sld [smem:[#allocation4 + $0x115]] }
  0x92   :  { %787 = vrot.lane.b32.xlu1 %v785_v40, %s2743_s30 }
  0x93   :  { %807 = vrot.lane.b32.xlu0 %v805_v41, %s2744_s9  ;;  %v1031_v41 = vmul.f32 %v1030_v37, %v2801_v0 }
  0x96   :  { %848 = vrot.lane.b32.xlu1 %v846_v44, %s2745_s13 }
  0x97   :  { %818 = vrot.lane.b32.xlu0 %v816_v45, %s2744_s9  ;;  %v1061_v45 = vstv %s2539_s7  ;;  %s2550_s7 = sld [smem:[#allocation4 + $0x17]] }
  0x9a   :  { %828 = vrot.lane.b32.xlu1 %v826_v48, %s2744_s9  ;;  %v1062_v48 = vmul.f32 %v1061_v45, %v2801_v0 }
  0x9b   :  { %797 = vrot.lane.b32.xlu0 %v795_v49, %s2743_s30  ;;  %v1071_v49 = vstv %s2540_s10  ;;  %s2547_s10 = sld [smem:[#allocation4 + $0x96]] }
  0x9d   :  { %v1173_v9 = vstv %s2550_s7  ;;  %s2549_s7 = sld [smem:[#allocation4 + $0x196]] }
  0x9e   :  { %889 = vrot.lane.b32.xlu1 %v887_v52, %s2746_s22  ;;  %v1174_v15 = vmul.f32 %v1173_v9, %v2801_v0 }
  0x9f   :  { %859 = vrot.lane.b32.xlu0 %v857_v53, %s2745_s13  ;;  %v1072_v53 = vmul.f32 %v1071_v49, %v2801_v0 }
  0xa0   :  { %v2921_v59 = vpop.permute.xlu1 %295 }
  0xa1   :  { %v2923_v61 = vpop.permute.xlu0 %274 }
  0xa2   :  { %869 = vrot.lane.b32.xlu1 %v867_v56, %s2745_s13 }
  0xa3   :  { %838 = vrot.lane.b32.xlu0 %v836_v57, %s2744_s9  ;;  %v1102_v57 = vstv %s2543_s21  ;;  %s4271_s21 = smov 46   ;;  %v1163_v39 = vstv %s2549_s7  ;;  %s2460_s7 = sld [smem:[#allocation4 + $0x100]] }
  0xa4   :  { %v2929_v2 = vpop.permute.xlu1 %305  ;;  %v1164_v43 = vmul.f32 %v1163_v39, %v2801_v0 }
  0xa5   :  { %v2931_v4 = vpop.permute.xlu0 %285 }
  0xa6   :  { %930 = vrot.lane.b32.xlu1 %v928_v62, %s2747_s6  ;;  %v1103_v62 = vmul.f32 %v1102_v57, %v2801_v0 }
  0xa7   :  { %900 = vrot.lane.b32.xlu0 %v898_v63, %s2746_s22  ;;  %v1112_v63 = vstv %s2544_s26  ;;  %s2551_s26 = sld [smem:[#allocation4 + $0x97]] }
  0xa8   :  { %v2937_v8 = vpop.permute.xlu1 %326 }
  0xa9   :  { %v2939_v10 = vpop.permute.xlu0 %315 }
  0xaa   :  { %910 = vrot.lane.b32.xlu1 %v908_v5, %s2746_s22 }
  0xab   :  { %879 = vrot.lane.b32.xlu0 %v877_v6, %s2745_s13  ;;  %v1113_v6 = vmul.f32 %v1112_v63, %v2801_v0 }
  0xac   :  { %v2945_v14 = vpop.permute.xlu1 %346 }
  0xad   :  { %v2947_v16 = vpop.permute.xlu0 %336 }
  0xae   :  { %971 = vrot.lane.b32.xlu1 %v969_v11, %s2748_s17 }
  0xaf   :  { %941 = vrot.lane.b32.xlu0 %v939_v12, %s2747_s6  ;;  %v1143_v12 = vstv %s2547_s10  ;;  %s4269_s10 = smov 45  }
  0xb0   :  { %v2953_v20 = vpop.permute.xlu1 %367 }
  0xb1   :  { %v2955_v22 = vpop.permute.xlu0 %356 }
  0xb2   :  { %951 = vrot.lane.b32.xlu1 %v949_v17, %s2747_s6  ;;  %v1144_v17 = vmul.f32 %v1143_v12, %v2801_v0 }
  0xb3   :  { %920 = vrot.lane.b32.xlu0 %v918_v18, %s2746_s22  ;;  %v1153_v18 = vstv %s2548_s11  ;;  %s2555_s11 = sld [smem:[#allocation4 + $0x98]] }
  0xb4   :  { %v2961_v26 = vpop.permute.xlu1 %387 }
  0xb5   :  { %v2963_v28 = vpop.permute.xlu0 %377 }
  0xb6   :  { %1012 = vrot.lane.b32.xlu1 %v1010_v23, %s4263_s1 }
  0xb7   :  { %982 = vrot.lane.b32.xlu0 %v980_v24, %s2748_s17  ;;  %v1154_v24 = vmul.f32 %v1153_v18, %v2801_v0 }
  0xb8   :  { %v2969_v32 = vpop.permute.xlu1 %408 }
  0xb9   :  { %v2971_v34 = vpop.permute.xlu0 %397 }
  0xba   :  { %992 = vrot.lane.b32.xlu1 %v990_v29, %s2748_s17 }
  0xbb   :  { %961 = vrot.lane.b32.xlu0 %v959_v30, %s2747_s6  ;;  %v1184_v30 = vstv %s2551_s26  ;;  %s4267_s26 = smov 44  }
  0xbc   :  { %v2977_v38 = vpop.permute.xlu1 %428 }
  0xbd   :  { %v2979_v40 = vpop.permute.xlu0 %418 }
  0xbe   :  { %1053 = vrot.lane.b32.xlu1 %v1051_v35, %s4265_s14  ;;  %v1185_v35 = vmul.f32 %v1184_v30, %v2801_v0 }
  0xbf   :  { %1023 = vrot.lane.b32.xlu0 %v1021_v36, %s4263_s1  ;;  %v1194_v36 = vstv %s2552_s2  ;;  %s2459_s2 = sld [smem:[#allocation4 + $0x80]] }
  0xc0   :  { %v2985_v44 = vpop.permute.xlu1 %449 }
  0xc1   :  { %v2987_v46 = vpop.permute.xlu0 %438 }
  0xc2   :  { %1033 = vrot.lane.b32.xlu1 %v1031_v41, %s4263_s1 }
  0xc3   :  { %1002 = vrot.lane.b32.xlu0 %v1000_v42, %s2748_s17  ;;  %v1195_v42 = vmul.f32 %v1194_v36, %v2801_v0 }
  0xc4   :  { %v2993_v50 = vpop.permute.xlu1 %469 }
  0xc5   :  { %v2995_v52 = vpop.permute.xlu0 %459 }
  0xc6   :  { %1094 = vrot.lane.b32.xlu1 %v1092_v47, %s4273_s27 }
  0xc7   :  { %1064 = vrot.lane.b32.xlu0 %v1062_v48, %s4265_s14  ;;  %v1225_v48 = vstv %s2555_s11  ;;  %s244_s11 = sld [smem:[#allocation6]] }
  0xc8   :  { %v3001_v56 = vpop.permute.xlu1 %490 }
  0xc9   :  { %v3003_v58 = vpop.permute.xlu0 %479 }
  0xca   :  { %1074 = vrot.lane.b32.xlu1 %v1072_v53, %s4265_s14  ;;  %v1226_v53 = vmul.f32 %v1225_v48, %v2801_v0  ;;  %v262_v48 = vstv %s2460_s7  ;;  %s2564_s7 = sld [smem:[#allocation8 + $0x7]] }
  0xcb   :  { %1043 = vrot.lane.b32.xlu0 %v1041_v54, %s4263_s1  ;;  %s2554_s1 = sld [smem:[#allocation4 + $0x18]]  ;;  %v1245_v54 = vstv %s3041_s19 }
  0xcc   :  { %v3009_v1 = vpop.permute.xlu1 %510  ;;  %v1246_v63 = vmul.f32 %v1245_v54, %v2801_v0  ;;  %s2461_s19 = sld [smem:[#allocation4 + $0x180]] }
  0xcd   :  { %v3011_v5 = vpop.permute.xlu0 %500 }
  0xce   :  { %1135 = vrot.lane.b32.xlu1 %v1133_v60, %s4271_s21  ;;  %v2755_v60 = vmov 0.0  }
  0xcf   :  { %1105 = vrot.lane.b32.xlu0 %v1103_v62, %s4273_s27  ;;  %1254 = vst [vmem:[#allocation2] sm:$0x3] %v2755_v60  ;;  %1255 = vst [vmem:[#allocation2 + $0xa] sm:$0x3] %v2755_v60 }
  0xd0   :  { %v3017_v11 = vpop.permute.xlu1 %531  ;;  %1256 = vst [vmem:[#allocation2 + $0x14] sm:$0x3] %v2755_v60  ;;  %1257 = vst [vmem:[#allocation2 + $0x1e] sm:$0x3] %v2755_v60 }
  0xd1   :  { %v3019_v13 = vpop.permute.xlu0 %520  ;;  %v1214_v27 = vstv %s2554_s1  ;;  %s3045_s1 = sld [smem:[#allocation4 + $0x118]]  ;;  %1258 = vst [vmem:[#allocation2 + $0x8] sm:$0x3] %v2755_v60  ;;  %1259 = vst [vmem:[#allocation2 + $0x12] sm:$0x3] %v2755_v60 }
  0xd2   :  { %1115 = vrot.lane.b32.xlu1 %v1113_v6, %s4273_s27  ;;  %v1215_v33 = vmul.f32 %v1214_v27, %v2801_v0  ;;  %1260 = vst [vmem:[#allocation2 + $0x1c] sm:$0x3] %v2755_v60  ;;  %1261 = vst [vmem:[#allocation2 + $0x26] sm:$0x3] %v2755_v60  ;;  %v266_v60 = vstv %s2461_s19  ;;  %s2583_s19 = sld [smem:[#allocation8 + $0x81]] }
  0xd3   :  { %1084 = vrot.lane.b32.xlu0 %v1082_v7, %s4265_s14  ;;  %s2553_s14 = sld [smem:[#allocation4 + $0x197]] }
  0xd4   :  { %v3025_v19 = vpop.permute.xlu1 %551 }
  0xd5   :  { %v3027_v23 = vpop.permute.xlu0 %541 }
  0xd6   :  { %1176 = vrot.lane.b32.xlu1 %v1174_v15, %s4269_s10 }
  0xd7   :  { %1146 = vrot.lane.b32.xlu0 %v1144_v17, %s4271_s21  ;;  %v1235_v57 = vstv %s3045_s1  ;;  %s2456_s1 = sld [smem:[#allocation6 + $0x1]] }
  0xd8   :  { %v3033_v29 = vpop.permute.xlu1 %572  ;;  %v1236_v3 = vmul.f32 %v1235_v57, %v2801_v0  ;;  %v245_v57 = vstv %s244_s11  ;;  %s2584_s11 = sld [smem:[#allocation8 + $0x82]] }
  0xd9   :  { %v3035_v31 = vpop.permute.xlu0 %561  ;;  %v1204_v45 = vstv %s2553_s14  ;;  %s253_s14 = sld [smem:[#allocation4]] }
  0xda   :  { %1156 = vrot.lane.b32.xlu1 %v1154_v24, %s4271_s21  ;;  %v1205_v51 = vmul.f32 %v1204_v45, %v2801_v0 }
  0xdb   :  { %1125 = vrot.lane.b32.xlu0 %v1123_v25, %s4273_s27  ;;  %s3711_s27 = sld [smem:[#allocation8 + $0x1]] }
  0xdc   :  { %v3043_v37 = vpop.permute.xlu1 %592 }
  0xdd   :  { %v3047_v41 = vpop.permute.xlu0 %582 }
  0xde   :  { %1217 = vrot.lane.b32.xlu1 %v1215_v33, %s4267_s26 }
  0xdf   :  { %1187 = vrot.lane.b32.xlu0 %v1185_v35, %s4269_s10  ;;  %v254_v39 = vstv %s253_s14  ;;  %s3742_s14 = sld [smem:[#allocation8 + $0x5]] }
  0xe0   :  { %v3053_v47 = vpop.permute.xlu1 %613 }
  0xe1   :  { %v3055_v49 = vpop.permute.xlu0 %602 }
  0xe2   :  { %1197 = vrot.lane.b32.xlu1 %v1195_v42, %s4269_s10  ;;  %v258_v42 = vstv %s2459_s2  ;;  %s2565_s2 = sld [smem:[#allocation8 + $0x8]] }
  0xe3   :  { %1166 = vrot.lane.b32.xlu0 %v1164_v43, %s4271_s21  ;;  %v252_v43 = vld [vmem:[%s4257_s0] sm:$0x3f]  ;;  %s3706_s0 = sld [smem:[#allocation8 + $0x2]] }
  0xe4   :  { %v3062_v55 = vpop.permute.xlu1 %633  ;;  %s3716_s21 = sld [smem:[#allocation8 + $0x4]] }
  0xe5   :  { %v3065_v62 = vpop.permute.xlu0 %623 }
  0xe6   :  { %1207 = vrot.lane.b32.xlu1 %v1205_v51, %s4269_s10  ;;  %s3107_s10 = sld [smem:[#allocation6 + $0x3]]  ;;  %v255_v51 = vmul.f32 %v254_v39, %v252_v43  ;;  %v267_v39 = vmul.f32 %v266_v60, %v252_v43 }
  0xe7   :  { %1228 = vrot.lane.b32.xlu0 %v1226_v53, %s4267_s26  ;;  %v259_v53 = vmul.f32 %v258_v42, %v252_v43 }
  0xe8   :  { %v3071_v6 = vpop.permute.xlu1 %654 }
  0xe9   :  { %v3073_v7 = vpop.permute.xlu0 %643 }
  0xea   :  { %1248 = vrot.lane.b32.xlu1 %v1246_v63, %s4267_s26  ;;  %v247_v63 = vstv %s2456_s1  ;;  %s2585_s1 = sld [smem:[#allocation8 + $0x83]] }
  0xeb   :  { %1238 = vrot.lane.b32.xlu0 %v1236_v3, %s4267_s26  ;;  %s3101_s26 = sld [smem:[#allocation6 + $0x2]]  ;;  %v287_v3 = vrot.slane %v2931_v4, 2  ;;  %v260_v42 = vadd.f32 %v259_v53, %v247_v63  ;;  %v369_v53 = vrot.slane %v2953_v20, 2 }
  0xec   :  { %v3077_v9 = vpop.permute.xlu1 %674 }
  0xed   :  { %v3079_v12 = vpop.permute.xlu0 %664 }
  0xf0   :  { %v3081_v15 = vpop.permute.xlu1 %695 }
  0xf1   :  { %v3083_v17 = vpop.permute.xlu0 %684 }
  0xf2   :  { %4306 = vst [vmem:[#allocation11_spill] sm:$0xff] %v3083_v17  ;;  %v358_v17 = vrot.slane %v2955_v22, 2 }
  0xf4   :  { %v3085_v18 = vpop.permute.xlu1 %715 }
  0xf5   :  { %4307 = vst [vmem:[#allocation12_spill] sm:$0xff] %v3085_v18  ;;  %v3087_v21 = vpop.permute.xlu0 %705  ;;  %v288_v18 = vsel %vm4298_vm0, %v2931_v4, %v287_v3 }
  0xf6   :  { %4308 = vst [vmem:[#allocation13_spill] sm:$0xff] %v3087_v21  ;;  %v290_v3 = vadd.f32 %v288_v18, %v260_v42 }
  0xf8   :  { %v3089_v0 = vpop.permute.xlu1 %736 }
  0xf9   :  { %4309 = vst [vmem:[#allocation14_spill] sm:$0xff] %v3089_v0  ;;  %v3091_v24 = vpop.permute.xlu0 %725  ;;  %v307_v0 = vrot.slane %v2929_v2, 2 }
  0xfa   :  { %4310 = vst [vmem:[#allocation15_spill] sm:$0xff] %v3091_v24  ;;  %v328_v24 = vrot.slane %v2937_v8, 2 }
  0xfc   :  { %v3093_v25 = vpop.permute.xlu1 %756  ;;  %v329_v21 = vsel %vm4296_vm1, %v2937_v8, %v328_v24  ;;  %v410_v8 = vrot.slane %v2969_v32, 2 }
  0xfd   :  { %4311 = vst [vmem:[#allocation16_spill] sm:$0xff] %v3093_v25  ;;  %v3095_v27 = vpop.permute.xlu0 %746  ;;  %v249_v25 = vstv %s3101_s26  ;;  %s3733_s26 = sld [smem:[#allocation8 + $0x6]] }
  0xfe   :  { %4312 = vst [vmem:[#allocation17_spill] sm:$0xff] %v3095_v27  ;;  %v256_v27 = vadd.f32 %v255_v51, %v245_v57  ;;  %v348_v51 = vrot.slane %v2945_v14, 2 }
 0x100   :  { %v3097_v30 = vpop.permute.xlu1 %777 }
 0x101   :  { %4313 = vst [vmem:[#allocation18_spill] sm:$0xff] %v3097_v30  ;;  %v3099_v33 = vpop.permute.xlu0 %766 }
 0x102   :  { %4314 = vst [vmem:[#allocation19_spill] sm:$0xff] %v3099_v33 }
 0x104   :  { %v3103_v35 = vpop.permute.xlu1 %787 }
 0x105   :  { %4315 = vst [vmem:[#allocation20_spill] sm:$0xff] %v3103_v35  ;;  %v3105_v36 = vpop.permute.xlu0 %807  ;;  %v276_v35 = vrot.slane %v2923_v61, 2 }
 0x106   :  { %4316 = vst [vmem:[#allocation21_spill] sm:$0xff] %v3105_v36  ;;  %v263_v36 = vmul.f32 %v262_v48, %v252_v43  ;;  %v338_v43 = vrot.slane %v2947_v16, 2 }
 0x107   :  { %v278_v48 = vsel %vm4298_vm0, %v2923_v61, %v276_v35 }
 0x108   :  { %v3112_v45 = vpop.permute.xlu1 %848  ;;  %v264_v60 = vadd.f32 %v263_v36, %v249_v25  ;;  %v280_v35 = vadd.f32 %v278_v48, %v256_v27  ;;  %v349_v25 = vsel %vm4296_vm1, %v2945_v14, %v348_v51  ;;  %v339_v18 = vsel %vm4296_vm1, %v2947_v16, %v338_v43 }
 0x109   :  { %4317 = vst [vmem:[#allocation22_spill] sm:$0xff] %v3112_v45  ;;  %v3114_v54 = vpop.permute.xlu0 %818  ;;  %v297_v45 = vrot.slane %v2921_v59, 2  ;;  %v399_v14 = vrot.slane %v2971_v34, 2  ;;  %v360_v16 = vsel %vm4295_vm2, %v2955_v22, %v358_v17  ;;  %v420_v51 = vrot.slane %v2979_v40, 2 }
 0x10a   :  { %4318 = vst [vmem:[#allocation23_spill] sm:$0xff] %v3114_v54  ;;  %v251_v54 = vstv %s3107_s10  ;;  %v451_v22 = vrot.slane %v2985_v44, 2  ;;  %s3721_s10 = sld [smem:[#allocation8 + $0x3]] }
 0x10b   :  { %v298_v4 = vsel %vm4298_vm0, %v2921_v59, %v297_v45  ;;  %v268_v63 = vadd.f32 %v267_v39, %v251_v54  ;;  %v389_v59 = vrot.slane %v2961_v26, 2  ;;  %v430_v54 = vrot.slane %v2977_v38, 2 }
 0x10c   :  { %v3119_v30 = vpop.permute.xlu1 %828  ;;  %v300_v27 = vadd.f32 %v298_v4, %v264_v60  ;;  %v492_v4 = vrot.slane %v3001_v56, 2 }
 0x10d   :  { %4319 = vst [vmem:[#allocation24_spill] sm:$0xff] %v3119_v30  ;;  %v3122_v33 = vpop.permute.xlu0 %797  ;;  %v317_v30 = vrot.slane %v2939_v10, 2  ;;  %v390_v48 = vsel %vm4295_vm2, %v2961_v26, %v389_v59  ;;  %v471_v26 = vrot.slane %v2993_v50, 2  ;;  %v481_v59 = vrot.slane %v3003_v58, 2 }
 0x10e   :  { %4320 = vst [vmem:[#allocation25_spill] sm:$0xff] %v3122_v33  ;;  %v308_v33 = vsel %vm4298_vm0, %v2929_v2, %v307_v0  ;;  %v370_v2 = vsel %vm4295_vm2, %v2953_v20, %v369_v53  ;;  %v379_v0 = vrot.slane %v2963_v28, 2  ;;  %v341_v39 = vadd.f32 %v339_v18, %v300_v27 }
 0x10f   :  { %v401_v53 = vsel %vm4294_vm3, %v2971_v34, %v399_v14  ;;  %v421_v18 = vsel %vm4294_vm3, %v2979_v40, %v420_v51 }
 0x110   :  { %v3135_v57 = vpop.permute.xlu1 %889 }
 0x111   :  { %4321 = vst [vmem:[#allocation26_spill] sm:$0xff] %v3135_v57  ;;  %v3139_v61 = vpop.permute.xlu0 %859  ;;  %v319_v57 = vsel %vm4296_vm1, %v2939_v10, %v317_v30  ;;  %v310_v10 = vadd.f32 %v308_v33, %v268_v63  ;;  %v331_v30 = vadd.f32 %v329_v21, %v290_v3  ;;  %v380_v21 = vsel %vm4295_vm2, %v2963_v28, %v379_v0 }
 0x112   :  { %v321_v45 = vadd.f32 %v319_v57, %v280_v35  ;;  %v411_v33 = vsel %vm4294_vm3, %v2969_v32, %v410_v8  ;;  %v440_v57 = vrot.slane %v2987_v46, 2  ;;  %v431_v28 = vsel %vm4294_vm3, %v2977_v38, %v430_v54 }
 0x113   :  { %v351_v20 = vadd.f32 %v349_v25, %v310_v10  ;;  %v372_v42 = vadd.f32 %v370_v2, %v331_v30  ;;  %v461_v32 = vrot.slane %v2995_v52, 2  ;;  %v57_v63 = vlaneseq }
 0x114   :  { %v3157_v24 = vpop.permute.xlu1 %869  ;;  %v362_v43 = vadd.f32 %v360_v16, %v321_v45  ;;  %v382_v35 = vadd.f32 %v380_v21, %v341_v39  ;;  %v452_v2 = vsel %vm4293_vm4, %v2985_v44, %v451_v22  ;;  %v512_v0 = vrot.slane %v3009_v1, 2 }
 0x115   :  { %v3160_v36 = vpop.permute.xlu0 %838  ;;  %v392_v3 = vadd.f32 %v390_v48, %v351_v20  ;;  %v413_v25 = vadd.f32 %v411_v33, %v372_v42  ;;  %v442_v27 = vsel %vm4293_vm4, %v2987_v46, %v440_v57  ;;  %v472_v10 = vsel %vm4293_vm4, %v2993_v50, %v471_v26 }
 0x116   :  { %v403_v34 = vadd.f32 %v401_v53, %v362_v43  ;;  %v502_v30 = vrot.slane %v3011_v5, 2  ;;  %v462_v40 = vsel %vm4293_vm4, %v2995_v52, %v461_v32  ;;  %v493_v44 = vsel %vm4291_vm5, %v3001_v56, %v492_v4 }
 0x117   :  { %v433_v8 = vadd.f32 %v431_v28, %v392_v3  ;;  %v533_v45 = vrot.slane %v3017_v11, 2  ;;  %v3206_v16 = vand.u32 127, %v57_v63  ;;  %v423_v54 = vadd.f32 %v421_v18, %v382_v35 }
 0x118   :  { %v3173_v17 = vpop.permute.xlu1 %930  ;;  %v454_v46 = vadd.f32 %v452_v2, %v413_v25  ;;  %v483_v50 = vsel %vm4291_vm5, %v3003_v58, %v481_v59  ;;  %v522_v20 = vrot.slane %v3019_v13, 2  ;;  %v444_v39 = vadd.f32 %v442_v27, %v403_v34 }
 0x119   :  { %v3179_v60 = vpop.permute.xlu0 %900  ;;  %v474_v42 = vadd.f32 %v472_v10, %v433_v8  ;;  %v513_v52 = vsel %vm4291_vm5, %v3009_v1, %v512_v0  ;;  %v464_v56 = vadd.f32 %v462_v40, %v423_v54  ;;  %v503_v33 = vsel %vm4291_vm5, %v3011_v5, %v502_v30 }
 0x11a   :  { %v495_v21 = vadd.f32 %v493_v44, %v454_v46  ;;  %v485_v22 = vadd.f32 %v483_v50, %v444_v39  ;;  %v534_v58 = vsel %vm4292_vm6, %v3017_v11, %v533_v45  ;;  %vm64_vm9 = vcmp.ge.s32.totalorder %v3206_v16, 20 }
 0x11b   :  { %vm67_vm10 = vcmp.lt.s32.totalorder %v3206_v16, 36  ;;  %v515_v1 = vadd.f32 %v513_v52, %v474_v42  ;;  %v524_v43 = vsel %vm4292_vm6, %v3019_v13, %v522_v20  ;;  %v553_v53 = vrot.slane %v3025_v19, 2 }
 0x11c   :  { %v3191_v38 = vpop.permute.xlu1 %910  ;;  %v543_v57 = vrot.slane %v3027_v23, 2  ;;  %v505_v5 = vadd.f32 %v503_v33, %v464_v56  ;;  %v574_v26 = vrot.slane %v3033_v29, 2  ;;  %v2756_v32 = vmov 1983009808   ;;  %vm3245_vm13 = vmand %vm64_vm9, %vm67_vm10 }
 0x11d   :  { %v3198_v14 = vpop.permute.xlu0 %879  ;;  %v3230_v4 = vunpack.c.l.s4 %v2756_v32  ;;  %v536_v11 = vadd.f32 %v534_v58, %v495_v21  ;;  %v3235_v35 = vadd.s32 128, %v3206_v16  ;;  %v3238_v13 = vadd.s32 256, %v3206_v16 }
 0x11e   :  { %vm61_vm12 = vcmp.lt.s32.totalorder %v3206_v16, 16  ;;  %v526_v59 = vadd.f32 %v524_v43, %v485_v22  ;;  %v563_v34 = vrot.slane %v3035_v31, 2  ;;  %vm76_vm15 = vcmp.ge.s32.totalorder %v3206_v16, 40 }
 0x11f   :  { %vm79_vm5 = vcmp.lt.s32.totalorder %v3206_v16, 56  ;;  %v554_v18 = vsel %vm4292_vm6, %v3025_v19, %v553_v53  ;;  %v544_v2 = vsel %vm4292_vm6, %v3027_v23, %v543_v57  ;;  %v594_v0 = vrot.slane %v3043_v37, 2  ;;  %vm3269_vm9 = vmor %vm61_vm12, %vm3245_vm13  ;;  %v4330_v57 = vld [vmem:[#allocation11_spill] sm:$0xff] }
 0x120   :  { %v3213_v48 = vpop.permute.xlu1 %971  ;;  %v584_v8 = vrot.slane %v3047_v41, 2  ;;  %v575_v27 = vsel %vm4297_vm7, %v3033_v29, %v574_v26  ;;  %v615_v10 = vrot.slane %v3053_v47, 2  ;;  %v604_v30 = vrot.slane %v3055_v49, 2  ;;  %vm3275_vm6 = vmand %vm76_vm15, %vm79_vm5  ;;  %v4337_v29 = vld [vmem:[#allocation12_spill] sm:$0xff] }
 0x121   :  { %v3217_v51 = vpop.permute.xlu0 %941  ;;  %v1273_v44 = vunpack.c.0.s8 %v3230_v4  ;;  %vm4302_vm10 = vcmask 703488   ;;  %vm88_vm4 = vcmp.ge.s32.totalorder %v3206_v16, 60  ;;  %vm91_vm3 = vcmp.lt.s32.totalorder %v3206_v16, 76  ;;  %vm85_vm13 = vmor %vm3269_vm9, %vm3275_vm6 }
 0x122   :  { %vm100_vm2 = vcmp.ge.s32.totalorder %v3206_v16, 80  ;;  %vm103_vm1 = vcmp.lt.s32.totalorder %v3206_v16, 96  ;;  %v556_v45 = vadd.f32 %v554_v18, %v515_v1  ;;  %v546_v54 = vadd.f32 %v544_v2, %v505_v5  ;;  %v4332_v2 = vld [vmem:[#allocation15_spill] sm:$0xff] }
 0x123   :  { %v565_v46 = vsel %vm4297_vm7, %v3035_v31, %v563_v34  ;;  %v635_v50 = vrot.slane %v3062_v55, 2  ;;  %vm112_vm5 = vcmp.ge.s32.totalorder %v3206_v16, 100  ;;  %v577_v20 = vadd.f32 %v575_v27, %v536_v11  ;;  %v4331_v34 = vld [vmem:[#allocation13_spill] sm:$0xff]  ;;  %vm3357_vm6 = vmand %vm100_vm2, %vm103_vm1 }
 0x124   :  { %v3228_v28 = vpop.permute.xlu1 %951  ;;  %v595_v39 = vsel %vm4297_vm7, %v3043_v37, %v594_v0  ;;  %v585_v42 = vsel %vm4297_vm7, %v3047_v41, %v584_v8  ;;  %v625_v52 = vrot.slane %v3065_v62, 2  ;;  %vm4303_vm12 = vcmask 695296   ;;  %vm3313_vm7 = vmand %vm88_vm4, %vm91_vm3 }
 0x125   :  { %v3232_v3 = vpop.permute.xlu0 %920  ;;  %v616_v56 = vsel %vm4299_vm8, %v3053_v47, %v615_v10  ;;  %v606_v31 = vsel %vm4299_vm8, %v3055_v49, %v604_v30  ;;  %v656_v21 = vrot.slane %v3071_v6, 2  ;;  %v645_v33 = vrot.slane %v3073_v7, 2  ;;  %vm3340_vm4 = vmor %vm85_vm13, %vm3313_vm7 }
 0x126   :  { %v567_v37 = vadd.f32 %v565_v46, %v526_v59  ;;  %v676_v41 = vrot.slane %v3077_v9, 2  ;;  %v666_v58 = vrot.slane %v3079_v12, 2  ;;  %v697_v47 = vrot.slane %v3081_v15, 2  ;;  %v4339_v46 = vld [vmem:[#allocation19_spill] sm:$0xff]  ;;  %vm109_vm13 = vmor %vm3340_vm4, %vm3357_vm6 }
 0x127   :  { %v597_v43 = vadd.f32 %v595_v39, %v556_v45  ;;  %v636_v53 = vsel %vm4299_vm8, %v3062_v55, %v635_v50  ;;  %v686_v5 = vrot.slane %v4330_v57, 2  ;;  %vm115_vm0 = vcmp.lt.s32.totalorder %v3206_v16, 116 }
 0x128   :  { %v3262_v40 = vpop.permute.xlu1 %1012  ;;  %v587_v26 = vadd.f32 %v585_v42, %v546_v54  ;;  %v618_v32 = vadd.f32 %v616_v56, %v577_v20  ;;  %v608_v11 = vadd.f32 %v606_v31, %v567_v37  ;;  %v626_v25 = vsel %vm4299_vm8, %v3065_v62, %v625_v52  ;;  %v4340_v42 = vld [vmem:[#allocation17_spill] sm:$0xff] }
 0x129   :  { %v3273_v23 = vpop.permute.xlu0 %982  ;;  %vm140_vm3 = vcmp.lt.s32.totalorder %v3235_v35, 156  ;;  %v657_v59 = vsel %vm4300_vm11, %v3071_v6, %v656_v21  ;;  %v647_v55 = vsel %vm4300_vm11, %v3073_v7, %v645_v33  ;;  %v707_v18 = vrot.slane %v4331_v34, 2  ;;  %v4341_v21 = vld [vmem:[#allocation18_spill] sm:$0xff]  ;;  %v4342_v37 = vld [vmem:[#allocation21_spill] sm:$0xff] }
 0x12a   :  { %v727_v0 = vrot.slane %v4332_v2, 2  ;;  %vm124_vm8 = vcmp.ge.s32.totalorder %v3206_v16, 120  ;;  %v638_v6 = vadd.f32 %v636_v53, %v597_v43  ;;  %v677_v7 = vsel %vm4300_vm11, %v3077_v9, %v676_v41 }
 0x12b   :  { %v667_v27 = vsel %vm4300_vm11, %v3079_v12, %v666_v58  ;;  %v698_v10 = vsel %vm4301_vm14, %v3081_v15, %v697_v47  ;;  %vm4304_vm15 = vcmask 556032   ;;  %v688_v9 = vsel %vm4301_vm14, %v4330_v57, %v686_v5  ;;  %v4338_v12 = vld [vmem:[#allocation14_spill] sm:$0xff]  ;;  %vm3388_vm11 = vmand %vm112_vm5, %vm115_vm0 }
 0x12c   :  { %v3298_v22 = vpop.permute.xlu1 %992  ;;  %v717_v45 = vrot.slane %v4337_v29, 2  ;;  %v738_v54 = vrot.slane %v4338_v12, 2  ;;  %v768_v15 = vrot.slane %v4339_v46, 2  ;;  %vm128_vm7 = vcmp.lt.s32.totalorder %v3235_v35, 136  ;;  %vm3419_vm0 = vmor %vm109_vm13, %vm3388_vm11 }
 0x12d   :  { %v3307_v49 = vpop.permute.xlu0 %961  ;;  %v628_v50 = vadd.f32 %v626_v25, %v587_v26  ;;  %v659_v20 = vadd.f32 %v657_v59, %v618_v32  ;;  %v649_v39 = vadd.f32 %v647_v55, %v608_v11  ;;  %v748_v52 = vrot.slane %v4340_v42, 2  ;;  %v4345_v11 = vld [vmem:[#allocation16_spill] sm:$0xff]  ;;  %vm3445_vm6 = vmor %vm3419_vm0, %vm124_vm8 }
 0x12e   :  { %vm149_vm1 = vcmp.ge.s32.totalorder %v3235_v35, 160  ;;  %vm152_vm2 = vcmp.lt.s32.totalorder %v3235_v35, 176  ;;  %v708_v56 = vsel %vm4301_vm14, %v4331_v34, %v707_v18  ;;  %v729_v31 = vsel %vm4302_vm10, %v4332_v2, %v727_v0  ;;  %v4346_v2 = vld [vmem:[#allocation20_spill] sm:$0xff] }
 0x12f   :  { %v779_v33 = vrot.slane %v4341_v21, 2  ;;  %v809_v41 = vrot.slane %v4342_v37, 2  ;;  %v679_v47 = vadd.f32 %v677_v7, %v638_v6  ;;  %v669_v1 = vadd.f32 %v667_v27, %v628_v50  ;;  %v4348_v27 = vld [vmem:[#allocation22_spill] sm:$0xff] }
 0x130   :  { %v3331_v8 = vpop.permute.xlu1 %1053  ;;  %v700_v43 = vadd.f32 %v698_v10, %v659_v20  ;;  %v690_v53 = vadd.f32 %v688_v9, %v649_v39  ;;  %v718_v26 = vsel %vm4301_vm14, %v4337_v29, %v717_v45  ;;  %v739_v32 = vsel %vm4302_vm10, %v4338_v12, %v738_v54  ;;  %v4349_v9 = vld [vmem:[#allocation23_spill] sm:$0xff]  ;;  %v4353_v20 = vld [vmem:[#allocation25_spill] sm:$0xff] }
 0x131   :  { %v3351_v30 = vpop.permute.xlu0 %1023  ;;  %v758_v25 = vrot.slane %v4345_v11, 2  ;;  %v770_v59 = vsel %vm4303_vm12, %v4339_v46, %v768_v15  ;;  %vm933_vm9 = vcmask 539648   ;;  %v710_v55 = vadd.f32 %v708_v56, %v669_v1  ;;  %v4352_v15 = vld [vmem:[#allocation24_spill] sm:$0xff] }
 0x132   :  { %v731_v34 = vadd.f32 %v729_v31, %v690_v53  ;;  %v749_v18 = vsel %vm4302_vm10, %v4340_v42, %v748_v52  ;;  %v789_v0 = vrot.slane %v4346_v2, 2  ;;  %vm164_vm5 = vcmp.lt.s32.totalorder %v3235_v35, 196 }
 0x133   :  { %v780_v6 = vsel %vm4303_vm12, %v4341_v21, %v779_v33  ;;  %vm4347_vm14 = vcmask 687104   ;;  %v850_v10 = vrot.slane %v4348_v27, 2  ;;  %v820_v29 = vrot.slane %v4349_v9, 2 }
 0x134   :  { %v3376_v58 = vpop.permute.xlu1 %1033  ;;  %v811_v7 = vsel %vm4347_vm14, %v4342_v37, %v809_v41  ;;  %v741_v54 = vadd.f32 %v739_v32, %v700_v43  ;;  %v772_v46 = vadd.f32 %v770_v59, %v731_v34  ;;  %v830_v50 = vrot.slane %v4352_v15, 2  ;;  %v4357_v41 = vld [vmem:[#allocation26_spill] sm:$0xff] }
 0x135   :  { %v3382_v57 = vpop.permute.xlu0 %1002  ;;  %v799_v39 = vrot.slane %v4353_v20, 2  ;;  %v720_v52 = vadd.f32 %v718_v26, %v679_v47  ;;  %v759_v56 = vsel %vm4302_vm10, %v4345_v11, %v758_v25  ;;  %v751_v62 = vadd.f32 %v749_v18, %v710_v55 }
 0x136   :  { %vm974_vm14 = vcmask 531456   ;;  %vm4354_vm11 = vcmp.ge.s32.totalorder %v3235_v35, 140  ;;  %v1275_v31 = vshrl.u32 %v57_v63, 7  ;;  %v782_v21 = vadd.f32 %v780_v6, %v741_v54 }
 0x137   :  { %vm3433_vm4 = vmand %vm4354_vm11, %vm140_vm3  ;;  %v790_v33 = vsel %vm4303_vm12, %v4346_v2, %v789_v0  ;;  %v813_v37 = vadd.f32 %v811_v7, %v772_v46  ;;  %v891_v47 = vrot.slane %v4357_v41, 2  ;;  %vm173_vm3 = vcmp.ge.s32.totalorder %v3235_v35, 200 }
 0x138   :  { %v3410_v45 = vpop.permute.xlu1 %1094  ;;  %vm176_vm13 = vcmp.lt.s32.totalorder %v3235_v35, 216  ;;  %v852_v63 = vsel %vm4304_vm15, %v4348_v27, %v850_v10  ;;  %vm4360_vm11 = vcmask 687104   ;;  %v861_v53 = vrot.slane %v3139_v61, 2  ;;  %vm3471_vm0 = vmor %vm128_vm7, %vm3433_vm4 }
 0x139   :  { %v3425_v42 = vpop.permute.xlu0 %1064  ;;  %v821_v43 = vsel %vm4360_vm11, %v4349_v9, %v820_v29  ;;  %v871_v16 = vrot.slane %v3157_v24, 2  ;;  %vm4305_vm10 = vcmask 523264   ;;  %vm4361_vm8 = vmmov %vm4360_vm11  ;;  %v800_v32 = vsel %vm4303_vm12, %v4353_v20, %v799_v39 }
 0x13a   :  { %v831_v26 = vsel %vm4361_vm8, %v4352_v15, %v830_v50  ;;  %v840_v11 = vrot.slane %v3160_v36, 2  ;;  %v932_v25 = vrot.slane %v3173_v17, 2  ;;  %v761_v34 = vadd.f32 %v759_v56, %v720_v52  ;;  %vm3480_vm8 = vmand %vm149_vm1, %vm152_vm2 }
 0x13b   :  { %v792_v18 = vadd.f32 %v790_v33, %v751_v62  ;;  %v902_v2 = vrot.slane %v3179_v60, 2  ;;  %vm1056_vm11 = vcmask 392192   ;;  %v2757_v6 = vmov 0  }
 0x13c   :  { %v3457_v5 = vpop.permute.xlu1 %1074  ;;  %v3487_v7 = vsel %vm3445_vm6, 1, %v2757_v6  ;;  %v854_v27 = vadd.f32 %v852_v63, %v813_v37  ;;  %v823_v10 = vadd.f32 %v821_v43, %v782_v21  ;;  %vm4366_vm7 = vcmask 547840  }
 0x13d   :  { %v3465_v59 = vpop.permute.xlu0 %1043  ;;  %v893_v9 = vsel %vm4366_vm7, %v4357_v41, %v891_v47  ;;  %v912_v29 = vrot.slane %v3191_v38, 2  ;;  %v833_v12 = vadd.f32 %v831_v26, %v792_v18  ;;  %v802_v54 = vadd.f32 %v800_v32, %v761_v34  ;;  %vm158_vm7 = vmor %vm3471_vm0, %vm3480_vm8 }
 0x13e   :  { %v862_v46 = vsel %vm4304_vm15, %v3139_v61, %v861_v53  ;;  %v872_v15 = vsel %vm4304_vm15, %v3157_v24, %v871_v16  ;;  %vm4367_vm6 = vcmask 687104   ;;  %v934_v39 = vsel %vm933_vm9, %v3173_v17, %v932_v25  ;;  %vm3562_vm0 = vmand %vm173_vm3, %vm176_vm13 }
 0x13f   :  { %v841_v20 = vsel %vm4367_vm6, %v3160_v36, %v840_v11  ;;  %v881_v52 = vrot.slane %v3198_v14, 2  ;;  %v973_v56 = vrot.slane %v3213_v48, 2  ;;  %v895_v61 = vadd.f32 %v893_v9, %v854_v27 }
 0x140   :  { %v3498_v50 = vpop.permute.xlu1 %1135  ;;  %vm4368_vm12 = vcmask 547840   ;;  %v943_v36 = vrot.slane %v3217_v51, 2  ;;  %v953_v19 = vrot.slane %v3228_v28, 2  ;;  %vm1138_vm6 = vcmask 375808  }
 0x141   :  { %v3506_v62 = vpop.permute.xlu0 %1105  ;;  %v903_v24 = vsel %vm4368_vm12, %v3179_v60, %v902_v2  ;;  %vm4369_vm2 = vcmp.ge.s32.totalorder %v3235_v35, 180  ;;  %v864_v21 = vadd.f32 %v862_v46, %v823_v10  ;;  %vm4372_vm1 = vmmov %vm4368_vm12  ;;  %v922_v37 = vrot.slane %v3232_v3, 2 }
 0x142   :  { %vm3520_vm4 = vmand %vm4369_vm2, %vm164_vm5  ;;  %v913_v33 = vsel %vm4372_vm1, %v3191_v38, %v912_v29  ;;  %v1014_v60 = vrot.slane %v3262_v40, 2  ;;  %v874_v41 = vadd.f32 %v872_v15, %v833_v12  ;;  %v843_v47 = vadd.f32 %v841_v20, %v802_v54 }
 0x143   :  { %v936_v1 = vadd.f32 %v934_v39, %v895_v61  ;;  %vm1179_vm12 = vcmask 367616   ;;  %v3532_v43 = vsub.s32 %v1273_v44, %v1275_v31  ;;  %v905_v53 = vadd.f32 %v903_v24, %v864_v21  ;;  %vm3548_vm5 = vmor %vm158_vm7, %vm3520_vm4 }
 0x144   :  { %v3528_v63 = vpop.permute.xlu1 %1115  ;;  %v882_v16 = vsel %vm4304_vm15, %v3198_v14, %v881_v52  ;;  %v975_v38 = vsel %vm974_vm14, %v3213_v48, %v973_v56  ;;  %v1055_v26 = vrot.slane %v3331_v8, 2  ;;  %vm197_vm1 = vcmp.ge.s32.totalorder %v3235_v35, 240 }
 0x145   :  { %v3539_v32 = vpop.permute.xlu0 %1084  ;;  %v915_v14 = vadd.f32 %v913_v33, %v874_v41  ;;  %v944_v48 = vsel %vm933_vm9, %v3217_v51, %v943_v36  ;;  %v954_v44 = vsel %vm933_vm9, %v3228_v28, %v953_v19  ;;  %v984_v31 = vrot.slane %v3273_v23, 2 }
 0x146   :  { %vm4377_vm2 = vcmask 547840   ;;  %v1016_v28 = vsel %vm4305_vm10, %v3262_v40, %v1014_v60  ;;  %v994_v25 = vrot.slane %v3298_v22, 2  ;;  %v1096_v55 = vrot.slane %v3410_v45, 2 }
 0x147   :  { %v923_v51 = vsel %vm4377_vm2, %v3232_v3, %v922_v37  ;;  %v884_v34 = vadd.f32 %v882_v16, %v843_v47  ;;  %v977_v18 = vadd.f32 %v975_v38, %v936_v1  ;;  %v963_v2 = vrot.slane %v3307_v49, 2  ;;  %vm182_vm2 = vmor %vm3548_vm5, %vm3562_vm0 }
 0x148   :  { %v1025_v0 = vrot.slane %v3351_v30, 2  ;;  %v1177_v27 = vpop.permute.xlu1 %1176  ;;  %v946_v3 = vadd.f32 %v944_v48, %v905_v53  ;;  %v956_v10 = vadd.f32 %v954_v44, %v915_v14  ;;  %v1057_v40 = vsel %vm1056_vm11, %v3331_v8, %v1055_v26 }
 0x149   :  { %v1137_v9 = vrot.slane %v3498_v50, 2  ;;  %v3581_v29 = vpop.permute.xlu0 %1146  ;;  %v925_v12 = vadd.f32 %v923_v51, %v884_v34  ;;  %v1018_v54 = vadd.f32 %v1016_v28, %v977_v18  ;;  %v985_v46 = vsel %vm974_vm14, %v3273_v23, %v984_v31 }
 0x14a   :  { %v1035_v15 = vrot.slane %v3376_v58, 2  ;;  %vm4378_vm15 = vcmp.lt.s32.totalorder %v3235_v35, 236  ;;  %vm4379_vm13 = vcmp.ge.s32.totalorder %v3235_v35, 220  ;;  %v995_v20 = vsel %vm974_vm14, %v3298_v22, %v994_v25 }
 0x14b   :  { %vm3594_vm7 = vmand %vm4379_vm13, %vm4378_vm15  ;;  %v1004_v39 = vrot.slane %v3382_v57, 2  ;;  %vm4382_vm3 = vcmask 384000   ;;  %v1178_v56 = vrot.slane %v1177_v27, 2  ;;  %vm234_vm8 = vcmp.ge.s32.totalorder %v3238_v13, 300 }
 0x14c   :  { %v1098_v52 = vsel %vm4382_vm3, %v3410_v45, %v1096_v55  ;;  %vm237_vm4 = vcmp.lt.s32.totalorder %v3238_v13, 316  ;;  %v964_v23 = vsel %vm933_vm9, %v3307_v49, %v963_v2  ;;  %v1059_v61 = vadd.f32 %v1057_v40, %v1018_v54  ;;  %v1157_v22 = vpop.permute.xlu1 %1156  ;;  %vm194_vm15 = vmor %vm182_vm2, %vm3594_vm7 }
 0x14d   :  { %v1026_v24 = vsel %vm4305_vm10, %v3351_v30, %v1025_v0  ;;  %v1066_v36 = vrot.slane %v3425_v42, 2  ;;  %v987_v19 = vadd.f32 %v985_v46, %v946_v3  ;;  %v1076_v17 = vrot.slane %v3457_v5, 2  ;;  %v1126_v33 = vpop.permute.xlu0 %1125  ;;  %vm3633_vm5 = vmor %vm194_vm15, %vm197_vm1 }
 0x14e   :  { %v1045_v45 = vrot.slane %v3465_v59, 2  ;;  %v1139_v21 = vsel %vm1138_vm6, %v3498_v50, %v1137_v9  ;;  %v997_v49 = vadd.f32 %v995_v20, %v956_v10  ;;  %v1036_v30 = vsel %vm4305_vm10, %v3376_v58, %v1035_v15 }
 0x14f   :  { %v1100_v37 = vadd.f32 %v1098_v52, %v1059_v61  ;;  %v1107_v60 = vrot.slane %v3506_v62, 2  ;;  %v966_v41 = vadd.f32 %v964_v23, %v925_v12  ;;  %v1028_v47 = vadd.f32 %v1026_v24, %v987_v19 }
 0x150   :  { %v1005_v50 = vsel %vm974_vm14, %v3382_v57, %v1004_v39  ;;  %v1180_v1 = vsel %vm1179_vm12, %v1177_v27, %v1178_v56  ;;  %v1067_v53 = vsel %vm1056_vm11, %v3425_v42, %v1066_v36  ;;  %v1117_v38 = vrot.slane %v3528_v63, 2  ;;  %v1218_v4 = vpop.permute.xlu1 %1217 }
 0x151   :  { %v1141_v16 = vadd.f32 %v1139_v21, %v1100_v37  ;;  %v1086_v26 = vrot.slane %v3539_v32, 2  ;;  %v1038_v14 = vadd.f32 %v1036_v30, %v997_v49  ;;  %v1077_v57 = vsel %vm1056_vm11, %v3457_v5, %v1076_v17  ;;  %v1188_v44 = vpop.permute.xlu0 %1187 }
 0x152   :  { %v1046_v48 = vsel %vm4305_vm10, %v3465_v59, %v1045_v45  ;;  %vm4385_vm0 = vcmp.lt.s32.totalorder %v3238_v13, 276  ;;  %vm4386_vm7 = vcmp.ge.s32.totalorder %v3238_v13, 260  ;;  %v1219_v35 = vrot.slane %v1218_v4, 2 }
 0x153   :  { %vm3645_vm3 = vmand %vm4386_vm7, %vm4385_vm0  ;;  %vm1266_vm1 = vcmp.eq.s32.totalorder %v3487_v7, 1  ;;  %vm4389_vm13 = vcmask 384000   ;;  %v1182_v11 = vadd.f32 %v1180_v1, %v1141_v16  ;;  %v1148_v5 = vrot.slane %v3581_v29, 2 }
 0x154   :  { %v1108_v31 = vsel %vm4389_vm13, %v3506_v62, %v1107_v60  ;;  %v1127_v51 = vrot.slane %v1126_v33, 2  ;;  %vm4390_vm2 = vcmp.lt.s32.totalorder %v3238_v13, 296  ;;  %vm4391_vm15 = vcmp.ge.s32.totalorder %v3238_v13, 280  ;;  %vm4395_vm7 = vmmov %vm4389_vm13  ;;  %v1198_v27 = vpop.permute.xlu1 %1197 }
 0x155   :  { %vm3657_vm10 = vmand %vm4391_vm15, %vm4390_vm2  ;;  %v1007_v28 = vadd.f32 %v1005_v50, %v966_v41  ;;  %v1069_v25 = vadd.f32 %v1067_v53, %v1028_v47  ;;  %v1158_v55 = vrot.slane %v1157_v22, 2  ;;  %vm4394_vm0 = vcmask 359424  }
 0x156   :  { %v1221_v34 = vsel %vm4394_vm0, %v1218_v4, %v1219_v35  ;;  %v1118_v62 = vsel %vm4395_vm7, %v3528_v63, %v1117_v38  ;;  %v1087_v18 = vsel %vm1056_vm11, %v3539_v32, %v1086_v26  ;;  %v1189_v0 = vrot.slane %v1188_v44, 2  ;;  %vm231_vm13 = vmor %vm3645_vm3, %vm3657_vm10  ;;  %v1167_v63 = vpop.permute.xlu0 %1166 }
 0x157   :  { %v1223_v2 = vadd.f32 %v1221_v34, %v1182_v11  ;;  %v1079_v3 = vadd.f32 %v1077_v57, %v1038_v14  ;;  %v1048_v10 = vadd.f32 %v1046_v48, %v1007_v28  ;;  %v1110_v40 = vadd.f32 %v1108_v31, %v1069_v25  ;;  %vm4396_vm2 = vmmov %vm4395_vm7 }
 0x158   :  { %v3673_v9 = vsel %vm3633_vm5, 1, %v2757_v6  ;;  %v1149_v32 = vsel %vm1138_vm6, %v3581_v29, %v1148_v5  ;;  %v1128_v12 = vsel %vm4396_vm2, %v1126_v33, %v1127_v51  ;;  %vm240_vm15 = vmand %vm234_vm8, %vm237_vm4  ;;  %v1168_v46 = vrot.slane %v1167_v63, 2  ;;  %v1208_v23 = vpop.permute.xlu1 %1207 }
 0x159   :  { %v1262_v54 = vmax.f32 %v1223_v2, 0.0  ;;  %v1120_v15 = vadd.f32 %v1118_v62, %v1079_v3  ;;  %v1089_v8 = vadd.f32 %v1087_v18, %v1048_v10  ;;  %v1159_v20 = vsel %vm1138_vm6, %v1157_v22, %v1158_v55  ;;  %vm3691_vm8 = vmor %vm231_vm13, %vm240_vm15 }
 0x15a   :  { %v1199_v39 = vrot.slane %v1198_v27, 2  ;;  %v1190_v56 = vsel %vm1179_vm12, %v1188_v44, %v1189_v0  ;;  %v1169_v29 = vsel %vm1138_vm6, %v1167_v63, %v1168_v46  ;;  %v1151_v61 = vadd.f32 %v1149_v32, %v1110_v40  ;;  %v1229_v22 = vpop.permute.xlu0 %1228  ;;  %vm4399_vm10 = vmmov %vm4394_vm0 }
 0x15b   :  { %v1270_v6 = vcombine.high %v1262_v54, %v1262_v54  ;;  %v1277_v52 = vrot.slane %v1262_v54, %v3532_v43  ;;  %v1130_v24 = vadd.f32 %v1128_v12, %v1089_v8  ;;  %vm1267_vm4 = vcmp.eq.s32.totalorder %v3673_v9, 1  ;;  %vm4400_vm5 = vmmov %vm4394_vm0 }
 0x15c   :  { %v1209_v36 = vrot.slane %v1208_v23, 2  ;;  %v1161_v19 = vadd.f32 %v1159_v20, %v1120_v15  ;;  %v1230_v21 = vrot.slane %v1229_v22, 2  ;;  %v1192_v33 = vadd.f32 %v1190_v56, %v1151_v61  ;;  %v1249_v1 = vpop.permute.xlu1 %1248  ;;  %vm4401_vm3 = vmmov %vm4394_vm0 }
 0x15d   :  { %v1284_v17 = vrot.slane %v1270_v6, %v3532_v43  ;;  %v1285_v45 = vcombine.high %v1277_v52, %v1277_v52  ;;  %v1200_v49 = vsel %vm1179_vm12, %v1198_v27, %v1199_v39  ;;  %v1171_v30 = vadd.f32 %v1169_v29, %v1130_v24 }
 0x15e   :  { %v1210_v37 = vsel %vm1179_vm12, %v1208_v23, %v1209_v36  ;;  %v1289_v60 = vsel %vm1266_vm1, %v1277_v52, 0.0  ;;  %v1231_v50 = vsel %vm4399_vm10, %v1229_v22, %v1230_v21  ;;  %v1250_v38 = vrot.slane %v1249_v1, 2  ;;  %v1239_v26 = vpop.permute.xlu0 %1238 }
 0x15f   :  { %v1290_v41 = vsel %vm1267_vm4, %v1285_v45, 0.0  ;;  %v1291_v47 = vsel %vm3691_vm8, %v1284_v17, 0.0  ;;  %v1233_v16 = vadd.f32 %v1231_v50, %v1192_v33  ;;  %v1202_v4 = vadd.f32 %v1200_v49, %v1161_v19 }
 0x160   :  { %v1295_v53 = vcombine.low %v1289_v60, %v1290_v41  ;;  %v1212_v58 = vadd.f32 %v1210_v37, %v1171_v30  ;;  %v1240_v14 = vrot.slane %v1239_v26, 2  ;;  %v1309_v48 = vrot.slane %v1291_v47, %v3532_v43 }
 0x161   :  { %v1313_v42 = vmax.f32 %v1233_v16, 0.0  ;;  %v1251_v35 = vsel %vm4400_vm5, %v1249_v1, %v1250_v38  ;;  %v1468_v12 = vstv %s3706_s0  ;;  %v1458_v8 = vstv %s3711_s27  ;;  %s2608_s0 = sld [smem:[#allocation8 + $0x101]] }
 0x162   :  { %v1302_v57 = vrot.slane %v1295_v53, %v3532_v43  ;;  %v1253_v44 = vadd.f32 %v1251_v35, %v1212_v58  ;;  %v1241_v31 = vsel %vm4401_vm3, %v1239_v26, %v1240_v14  ;;  %v1488_v21 = vstv %s3716_s21  ;;  %s2633_s27 = sld [smem:[#allocation8 + $0x181]] }
 0x163   :  { %v1315_v5 = vcombine.high %v1313_v42, %v1313_v42  ;;  %v1322_v51 = vrot.slane %v1313_v42, %v3532_v43  ;;  %v1243_v59 = vadd.f32 %v1241_v31, %v1202_v4  ;;  %v1478_v33 = vstv %s3721_s10  ;;  %s2609_s21 = sld [smem:[#allocation8 + $0x102]] }
 0x164   :  { %v1310_v11 = vcombine.low %v1302_v57, %v1309_v48  ;;  %v1405_v28 = vmax.f32 %v1253_v44, 0.0  ;;  %v1508_v41 = vstv %s3733_s26  ;;  %v1498_v47 = vstv %s3742_s14  ;;  %s2586_s10 = sld [smem:[#allocation8 + $0x84]] }
 0x165   :  { %v1329_v25 = vrot.slane %v1315_v5, %v3532_v43  ;;  %v1330_v55 = vcombine.high %v1322_v51, %v1322_v51  ;;  %v1359_v34 = vmax.f32 %v1243_v59, 0.0  ;;  %v1334_v62 = vsel %vm1266_vm1, %v1322_v51, 0.0  ;;  %s2610_s26 = sld [smem:[#allocation8 + $0x103]] }
 0x166   :  { %1312 = vst [vmem:[#allocation2 + $0x2] sm:$0x3f] %v1310_v11  ;;  %v1407_v18 = vcombine.high %v1405_v28, %v1405_v28  ;;  %v1414_v2 = vrot.slane %v1405_v28, %v3532_v43  ;;  %v1528_v1 = vstv %s2565_s2  ;;  %v1518_v53 = vstv %s2564_s7  ;;  %s2587_s14 = sld [smem:[#allocation8 + $0x85]] }
 0x167   :  { %v1335_v0 = vsel %vm1267_vm4, %v1330_v55, 0.0  ;;  %v1336_v27 = vsel %vm3691_vm8, %v1329_v25, 0.0  ;;  %v1361_v3 = vcombine.high %v1359_v34, %v1359_v34  ;;  %v1368_v10 = vrot.slane %v1359_v34, %v3532_v43  ;;  %s2634_s2 = sld [smem:[#allocation8 + $0x182]] }
 0x168   :  { %v1340_v40 = vcombine.low %v1334_v62, %v1335_v0  ;;  %v1421_v63 = vrot.slane %v1407_v18, %v3532_v43  ;;  %v1422_v32 = vcombine.high %v1414_v2, %v1414_v2  ;;  %v1354_v54 = vrot.slane %v1336_v27, %v3532_v43  ;;  %s2635_s7 = sld [smem:[#allocation8 + $0x183]] }
 0x169   :  { %v1375_v46 = vrot.slane %v1361_v3, %v3532_v43  ;;  %v1376_v15 = vcombine.high %v1368_v10, %v1368_v10  ;;  %v1426_v39 = vsel %vm1266_vm1, %v1414_v2, 0.0  ;;  %v1380_v29 = vsel %vm1266_vm1, %v1368_v10, 0.0 }
 0x16a   :  { %v1347_v20 = vrot.slane %v1340_v40, %v3532_v43  ;;  %v1427_v6 = vsel %vm1267_vm4, %v1422_v32, 0.0  ;;  %v1428_v52 = vsel %vm3691_vm8, %v1421_v63, 0.0  ;;  %v1715_v4 = vstv %s2584_s11  ;;  %s2611_s11 = sld [smem:[#allocation8 + $0x104]] }
 0x16b   :  { %v1432_v56 = vcombine.low %v1426_v39, %v1427_v6  ;;  %v1381_v23 = vsel %vm1267_vm4, %v1376_v15, 0.0  ;;  %v1382_v61 = vsel %vm3691_vm8, %v1375_v46, 0.0  ;;  %v1446_v17 = vrot.slane %v1428_v52, %v3532_v43 }
 0x16c   :  { %v1355_v24 = vcombine.low %v1347_v20, %v1354_v54  ;;  %v1386_v36 = vcombine.low %v1380_v29, %v1381_v23  ;;  %v1400_v13 = vrot.slane %v1382_v61, %v3532_v43  ;;  %v1705_v58 = vstv %s2583_s19  ;;  %s2612_s19 = sld [smem:[#allocation8 + $0x105]] }
 0x16d   :  { %v3750_v22 = vld [vmem:[#allocation2] sm:$0xff]  ;;  %v1439_v19 = vrot.slane %v1432_v56, %v3532_v43  ;;  %v1725_v48 = vstv %s2585_s1  ;;  %v1952_v35 = vstv %s2608_s0  ;;  %v2199_v5 = vstv %s2633_s27  ;;  %s2588_s1 = sld [smem:[#allocation8 + $0x86]] }
 0x16e   :  { %v1469_v45 = vmul.f32 %v1468_v12, %v3750_v22  ;;  %v1459_v7 = vmul.f32 %v1458_v8, %v3750_v22  ;;  %1358 = vst [vmem:[#allocation2 + $0xc] sm:$0x3f] %v1355_v24  ;;  %v1393_v9 = vrot.slane %v1386_v36, %v3532_v43  ;;  %v1489_v37 = vmul.f32 %v1488_v21, %v3750_v22  ;;  %s2589_s0 = sld [smem:[#allocation8 + $0x87]] }
 0x16f   :  { %v1447_v49 = vcombine.low %v1439_v19, %v1446_v17  ;;  %v1479_v60 = vmul.f32 %v1478_v33, %v3750_v22  ;;  %v1509_v43 = vmul.f32 %v1508_v41, %v3750_v22  ;;  %v1499_v50 = vmul.f32 %v1498_v47, %v3750_v22  ;;  %s2637_s27 = sld [smem:[#allocation8 + $0x185]] }
 0x170   :  { %1471 = vrot.lane.b32.xlu1 %v1469_v45, %s2732_s20  ;;  %1461 = vrot.lane.b32.xlu0 %v1459_v7, %s2731_s15  ;;  %v1401_v30 = vcombine.low %v1393_v9, %v1400_v13  ;;  %v1529_v16 = vmul.f32 %v1528_v1, %v3750_v22  ;;  %v1519_v38 = vmul.f32 %v1518_v53, %v3750_v22  ;;  %v1962_v51 = vstv %s2609_s21  ;;  %s2613_s21 = sld [smem:[#allocation8 + $0x106]] }
 0x171   :  { %1450 = vst [vmem:[#allocation2 + $0x20] sm:$0x3f] %v1447_v49  ;;  %v1972_v25 = vstv %s2610_s26  ;;  %v1735_v55 = vstv %s2586_s10  ;;  %v1745_v18 = vstv %s2587_s14  ;;  %v2209_v2 = vstv %s2634_s2  ;;  %s2566_s10 = sld [smem:[#allocation8 + $0x9]] }
 0x172   :  { %1404 = vst [vmem:[#allocation2 + $0x16] sm:$0x3f] %v1401_v30  ;;  %v2219_v3 = vstv %s2635_s7  ;;  %v1982_v10 = vstv %s2611_s11  ;;  %v1992_v32 = vstv %s2612_s19  ;;  %s2638_s26 = sld [smem:[#allocation8 + $0x186]]  ;;  %vm4402_vm1 = vcmask 1039360  }
 0x173   :  { %v1755_v12 = vstv %s2588_s1  ;;  %s2591_s14 = sld [smem:[#allocation8 + $0x89]]  ;;  %vm4403_vm0 = vcmask 1031168   ;;  %vm4404_vm7 = vcmask 1022976   ;;  %vm4405_vm13 = vcmask 1014784   ;;  %vm4411_vm10 = vmmov %vm4402_vm1 }
 0x174   :  { %1491 = vrot.lane.b32.xlu1 %v1489_v37, %s2734_s28  ;;  %1481 = vrot.lane.b32.xlu0 %v1479_v60, %s2733_s25  ;;  %v1765_v15 = vstv %s2589_s0  ;;  %s2567_s2 = sld [smem:[#allocation8 + $0xa]]  ;;  %vm4406_vm2 = vcmask 883712   ;;  %vm4407_vm15 = vcmask 875520   ;;  %vm4408_vm8 = vcmask 867328   ;;  %vm4412_vm5 = vmmov %vm4403_vm0 }
 0x175   :  { %v3774_v26 = vld [vmem:[#allocation2 + $0xa] sm:$0xff]  ;;  %v2239_v6 = vstv %s2637_s27  ;;  %s2639_s7 = sld [smem:[#allocation8 + $0x187]]  ;;  %vm4409_vm4 = vcmask 859136   ;;  %vm4413_vm3 = vmmov %vm4404_vm7 }
 0x176   :  { %v1716_v14 = vmul.f32 %v1715_v4, %v3774_v26  ;;  %v1706_v57 = vmul.f32 %v1705_v58, %v3774_v26  ;;  %v1726_v44 = vmul.f32 %v1725_v48, %v3774_v26  ;;  %v1736_v62 = vmul.f32 %v1735_v55, %v3774_v26  ;;  %s2592_s11 = sld [smem:[#allocation8 + $0x8a]]  ;;  %v1568_v58 = vld [vmem:[#allocation2 + $0x2] sm:$0x3f] }
 0x177   :  { %v1746_v0 = vmul.f32 %v1745_v18, %v3774_v26  ;;  %v1756_v46 = vmul.f32 %v1755_v12, %v3774_v26  ;;  %v1766_v20 = vmul.f32 %v1765_v15, %v3774_v26  ;;  %v2002_v52 = vstv %s2613_s21  ;;  %s2640_s19 = sld [smem:[#allocation8 + $0x188]] }
 0x178   :  { %1511 = vrot.lane.b32.xlu1 %v1509_v43, %s2736_s12  ;;  %1501 = vrot.lane.b32.xlu0 %v1499_v50, %s2735_s8  ;;  %v3786_v11 = vld [vmem:[#allocation2 + $0x1e] sm:$0xff]  ;;  %v1538_v61 = vstv %s2566_s10  ;;  %v2249_v19 = vstv %s2638_s26  ;;  %s2616_s1 = sld [smem:[#allocation8 + $0x109]] }
 0x179   :  { %v3780_v42 = vld [vmem:[#allocation2 + $0x14] sm:$0xff]  ;;  %v2200_v59 = vmul.f32 %v2199_v5, %v3786_v11  ;;  %v2210_v27 = vmul.f32 %v2209_v2, %v3786_v11  ;;  %v2220_v40 = vmul.f32 %v2219_v3, %v3786_v11  ;;  %v2240_v56 = vmul.f32 %v2239_v6, %v3786_v11  ;;  %s2593_s0 = sld [smem:[#allocation8 + $0x8b]] }
 0x17a   :  { %v1953_v31 = vmul.f32 %v1952_v35, %v3780_v42  ;;  %v1963_v28 = vmul.f32 %v1962_v51, %v3780_v42  ;;  %v1973_v34 = vmul.f32 %v1972_v25, %v3780_v42  ;;  %v1983_v63 = vmul.f32 %v1982_v10, %v3780_v42  ;;  %s2617_s27 = sld [smem:[#allocation8 + $0x10a]]  ;;  %v1815_v51 = vld [vmem:[#allocation2 + $0xc] sm:$0x3f]  ;;  %v2062_v12 = vld [vmem:[#allocation2 + $0x16] sm:$0x3f] }
 0x17b   :  { %v1993_v54 = vmul.f32 %v1992_v32, %v3780_v42  ;;  %v2003_v29 = vmul.f32 %v2002_v52, %v3780_v42  ;;  %v1539_v36 = vmul.f32 %v1538_v61, %v3750_v22  ;;  %v2250_v45 = vmul.f32 %v2249_v19, %v3786_v11  ;;  %s2594_s21 = sld [smem:[#allocation8 + $0x8c]]  ;;  %v2309_v52 = vld [vmem:[#allocation2 + $0x20] sm:$0x3f] }
 0x17c   :  { %1531 = vrot.lane.b32.xlu1 %v1529_v16, %s2738_s24  ;;  %1521 = vrot.lane.b32.xlu0 %v1519_v38, %s2737_s18  ;;  %v1785_v9 = vstv %s2591_s14  ;;  %v1548_v13 = vstv %s2567_s2  ;;  %s2642_s10 = sld [smem:[#allocation8 + $0x18a]] }
 0x17d   :  { %v1786_v21 = vmul.f32 %v1785_v9, %v3774_v26  ;;  %v1549_v33 = vmul.f32 %v1548_v13, %v3750_v22  ;;  %v2259_v49 = vstv %s2639_s7  ;;  %v1795_v41 = vstv %s2592_s11  ;;  %s2595_s26 = sld [smem:[#allocation8 + $0x8d]] }
 0x17e   :  { %v2260_v37 = vmul.f32 %v2259_v49, %v3786_v11  ;;  %v1796_v43 = vmul.f32 %v1795_v41, %v3774_v26  ;;  %v2269_v1 = vstv %s2640_s19  ;;  %v2032_v53 = vstv %s2616_s1  ;;  %s2619_s14 = sld [smem:[#allocation8 + $0x10c]] }
 0x17f   :  { %v2270_v16 = vmul.f32 %v2269_v1, %v3786_v11  ;;  %v2033_v38 = vmul.f32 %v2032_v53, %v3780_v42  ;;  %v1805_v4 = vstv %s2593_s0  ;;  %s2596_s2 = sld [smem:[#allocation8 + $0x8e]] }
 0x180   :  { %1718 = vrot.lane.b32.xlu1 %v1716_v14, %s2732_s20  ;;  %1708 = vrot.lane.b32.xlu0 %v1706_v57, %s2731_s15  ;;  %v1806_v57 = vmul.f32 %v1805_v4, %v3774_v26  ;;  %s2644_s7 = sld [smem:[#allocation8 + $0x18c]] }
 0x181   :  { %s2597_s11 = sld [smem:[#allocation8 + $0x8f]] }
 0x182   :  { %s2621_s19 = sld [smem:[#allocation8 + $0x10e]] }
 0x183   :  { %v1827_v3 = vstv %s2595_s26  ;;  %s2574_s1 = sld [smem:[#allocation8 + $0x11]] }
 0x184   :  { %1728 = vrot.lane.b32.xlu1 %v1726_v44, %s2733_s25  ;;  %1955 = vrot.lane.b32.xlu0 %v1953_v31, %s2731_s15  ;;  %v2042_v44 = vstv %s2617_s27  ;;  %s1453_s0 = sld [smem:[#allocation8]] }
 0x185   :  { %v2043_v5 = vmul.f32 %v2042_v44, %v3780_v42  ;;  %s3888_s27 = sld [smem:[#allocation8 + $0x12]] }
 0x186   :  { %s3920_s26 = sld [smem:[#allocation8 + $0x190]] }
 0x188   :  { %2202 = vrot.lane.b32.xlu1 %v2200_v59, %s2731_s15  ;;  %1965 = vrot.lane.b32.xlu0 %v1963_v28, %s2732_s20  ;;  %s2636_s15 = sld [smem:[#allocation8 + $0x184]]  ;;  %v1816_v59 = vstv %s2594_s21  ;;  %v3847_v28 = vld [vmem:[#allocation2 + $0x2] sm:$0xff]  ;;  %v2084_v13 = vstv %s2621_s19 }
 0x189   :  { %v1817_v55 = vmul.f32 %v1816_v59, %v1815_v51  ;;  %s3894_s21 = sld [smem:[#allocation8 + $0x18f]] }
 0x18a   :  { %s3992_s19 = sld [smem:[#allocation8 + $0x95]] }
 0x18b   :  { %v1630_v51 = vstv %s3888_s27  ;;  %s4424_s27 = smov 46  }
 0x18c   :  { %1975 = vrot.lane.b32.xlu1 %v1973_v34, %s2733_s25  ;;  %1738 = vrot.lane.b32.xlu0 %v1736_v62, %s2734_s28  ;;  %v2289_v62 = vstv %s2642_s10  ;;  %s3910_s10 = sld [smem:[#allocation8 + $0x13]] }
 0x18d   :  { %v2290_v2 = vmul.f32 %v2289_v62, %v3786_v11 }
 0x18e   :  { %v2229_v8 = vstv %s2636_s15  ;;  %s2641_s15 = sld [smem:[#allocation8 + $0x189]] }
 0x18f   :  { %v2230_v39 = vmul.f32 %v2229_v8, %v3786_v11  ;;  %v1837_v8 = vstv %s2596_s2  ;;  %s3944_s2 = sld [smem:[#allocation8 + $0x180]] }
 0x190   :  { %1748 = vrot.lane.b32.xlu1 %v1746_v0, %s2735_s8  ;;  %2212 = vrot.lane.b32.xlu0 %v2210_v27, %s2732_s20  ;;  %s2590_s20 = sld [smem:[#allocation8 + $0x88]]  ;;  %v3856_v27 = vld [vmem:[#allocation2 + $0xc] sm:$0xff] }
 0x194   :  { %2222 = vrot.lane.b32.xlu1 %v2220_v40, %s2733_s25  ;;  %1985 = vrot.lane.b32.xlu0 %v1983_v63, %s2734_s28  ;;  %s2614_s25 = sld [smem:[#allocation8 + $0x107]]  ;;  %v2279_v35 = vstv %s2641_s15  ;;  %v1828_v40 = vmul.f32 %v1827_v3, %v3856_v27 }
 0x195   :  { %v2280_v31 = vmul.f32 %v2279_v35, %v3786_v11  ;;  %s2622_s15 = sld [smem:[#allocation8 + $0x10f]] }
 0x196   :  { %v1775_v23 = vstv %s2590_s20  ;;  %s2618_s20 = sld [smem:[#allocation8 + $0x10b]] }
 0x197   :  { %v1776_v24 = vmul.f32 %v1775_v23, %v3774_v26 }
 0x198   :  { %1995 = vrot.lane.b32.xlu1 %v1993_v54, %s2735_s8  ;;  %1758 = vrot.lane.b32.xlu0 %v1756_v46, %s2736_s12  ;;  %v2063_v54 = vstv %s2619_s14  ;;  %s3938_s14 = sld [smem:[#allocation8 + $0x14]] }
 0x199   :  { %v2064_v15 = vmul.f32 %v2063_v54, %v2062_v12 }
 0x19a   :  { %v2012_v17 = vstv %s2614_s25  ;;  %s2643_s25 = sld [smem:[#allocation8 + $0x18b]] }
 0x19b   :  { %v2013_v7 = vmul.f32 %v2012_v17, %v3780_v42 }
 0x19c   :  { %1768 = vrot.lane.b32.xlu1 %v1766_v20, %s2737_s18  ;;  %2232 = vrot.lane.b32.xlu0 %v2230_v39, %s2734_s28  ;;  %s2615_s28 = sld [smem:[#allocation8 + $0x108]]  ;;  %v2052_v18 = vstv %s2618_s20  ;;  %v1838_v39 = vmul.f32 %v1837_v8, %v3856_v27 }
 0x19d   :  { %v2053_v0 = vmul.f32 %v2052_v18, %v3780_v42  ;;  %s3915_s20 = sld [smem:[#allocation8 + $0x80]] }
 0x1a0   :  { %2242 = vrot.lane.b32.xlu1 %v2240_v56, %s2735_s8  ;;  %2005 = vrot.lane.b32.xlu0 %v2003_v29, %s2736_s12  ;;  %s2568_s8 = sld [smem:[#allocation8 + $0xb]]  ;;  %v2299_v32 = vstv %s2643_s25  ;;  %v2310_v56 = vstv %s2644_s7  ;;  %v3869_v29 = vld [vmem:[#allocation2 + $0x16] sm:$0xff]  ;;  %s4410_s7 = smov 64  }
 0x1a1   :  { %v2300_v46 = vmul.f32 %v2299_v32, %v3786_v11  ;;  %v2311_v61 = vmul.f32 %v2310_v56, %v2309_v52  ;;  %s3934_s25 = sld [smem:[#allocation8 + $0x93]] }
 0x1a2   :  { %v2022_v30 = vstv %s2615_s28  ;;  %s2620_s28 = sld [smem:[#allocation8 + $0x10d]] }
 0x1a3   :  { %v2023_v60 = vmul.f32 %v2022_v30, %v3780_v42  ;;  %v1620_v30 = vstv %s2574_s1  ;;  %s4004_s1 = sld [smem:[#allocation8 + $0x193]] }
 0x1a4   :  { %1778 = vrot.lane.b32.xlu1 %v1776_v24, %s2738_s24  ;;  %1541 = vrot.lane.b32.xlu0 %v1539_v36, %s2739_s29  ;;  %v1847_v36 = vstv %s2597_s11  ;;  %s3969_s11 = sld [smem:[#allocation8 + $0x15]] }
 0x1a5   :  { %v1848_v17 = vmul.f32 %v1847_v36, %v3856_v27  ;;  %v1702_v36 = vstv %s3915_s20  ;;  %s4429_s20 = smov 45  }
 0x1a6   :  { %v1558_v47 = vstv %s2568_s8  ;;  %s2645_s8 = sld [smem:[#allocation8 + $0x18d]] }
 0x1a7   :  { %v1559_v50 = vmul.f32 %v1558_v47, %v3750_v22 }
 0x1a8   :  { %2252 = vrot.lane.b32.xlu1 %v2250_v45, %s2736_s12  ;;  %2015 = vrot.lane.b32.xlu0 %v2013_v7, %s2737_s18  ;;  %s2569_s12 = sld [smem:[#allocation8 + $0xc]]  ;;  %v2074_v23 = vstv %s2620_s28  ;;  %v3880_v7 = vld [vmem:[#allocation2 + $0x20] sm:$0xff] }
 0x1a9   :  { %v2075_v24 = vmul.f32 %v2074_v23, %v3869_v29  ;;  %v1640_v23 = vstv %s3910_s10  ;;  %s3965_s28 = sld [smem:[#allocation8 + $0x94]] }
 0x1aa   :  { %s4056_s10 = sld [smem:[#allocation8 + $0x116]] }
 0x1ac   :  { %1788 = vrot.lane.b32.xlu1 %v1786_v21, %s2739_s29  ;;  %1551 = vrot.lane.b32.xlu0 %v1549_v33, %s2740_s3  ;;  %v2321_v9 = vstv %s2645_s8  ;;  %v2085_v33 = vmul.f32 %v2084_v13, %v3869_v29  ;;  %v1641_v13 = vmul.f32 %v1640_v23, %v3847_v28  ;;  %s4414_s8 = smov 48  }
 0x1ad   :  { %v2322_v21 = vmul.f32 %v2321_v9, %v3880_v7 }
 0x1ae   :  { %v1569_v14 = vstv %s2569_s12  ;;  %s3878_s12 = sld [smem:[#allocation8 + $0x18e]] }
 0x1af   :  { %v1570_v48 = vmul.f32 %v1569_v14, %v1568_v58 }
 0x1b0   :  { %2262 = vrot.lane.b32.xlu1 %v2260_v37, %s2737_s18  ;;  %2025 = vrot.lane.b32.xlu0 %v2023_v60, %s2738_s24  ;;  %s2570_s18 = sld [smem:[#allocation8 + $0xd]]  ;;  %v1455_v37 = vstv %s1453_s0  ;;  %s4419_s0 = smov 47  }
 0x1b4   :  { %1798 = vrot.lane.b32.xlu1 %v1796_v43, %s2740_s3  ;;  %1561 = vrot.lane.b32.xlu0 %v1559_v50, %s2741_s16  ;;  %v1621_v43 = vmul.f32 %v1620_v30, %v3847_v28  ;;  %v2331_v53 = vstv %s3878_s12  ;;  %s4016_s12 = sld [smem:[#allocation8 + $0x96]] }
 0x1b6   :  { %v1580_v25 = vstv %s2570_s18  ;;  %s3897_s18 = sld [smem:[#allocation8 + $0x110]] }
 0x1b7   :  { %v1581_v34 = vmul.f32 %v1580_v25, %v3847_v28 }
 0x1b8   :  { %2272 = vrot.lane.b32.xlu1 %v2270_v16, %s2738_s24  ;;  %2035 = vrot.lane.b32.xlu0 %v2033_v38, %s2739_s29  ;;  %s2571_s24 = sld [smem:[#allocation8 + $0xe]]  ;;  %v2094_v16 = vstv %s2622_s15  ;;  %v1456_v38 = vmul.f32 %v1455_v37, %v3750_v22 }
 0x1b9   :  { %v2095_v35 = vmul.f32 %v2094_v16, %v3869_v29  ;;  %s4020_s15 = sld [smem:[#allocation8 + $0x17]] }
 0x1bc   :  { %1808 = vrot.lane.b32.xlu1 %v1806_v57, %s2741_s16  ;;  %1572 = vrot.lane.b32.xlu0 %v1570_v48, %s2742_s23  ;;  %v2332_v48 = vmul.f32 %v2331_v53, %v3880_v7 }
 0x1be   :  { %v1590_v10 = vstv %s2571_s24  ;;  %s3929_s24 = sld [smem:[#allocation8 + $0x100]] }
 0x1bf   :  { %v1591_v63 = vmul.f32 %v1590_v10, %v3847_v28 }
 0x1c0   :  { %2282 = vrot.lane.b32.xlu1 %v2280_v31, %s2739_s29  ;;  %2045 = vrot.lane.b32.xlu0 %v2043_v5, %s2740_s3  ;;  %s2572_s29 = sld [smem:[#allocation8 + $0xf]] }
 0x1c4   :  { %1819 = vrot.lane.b32.xlu1 %v1817_v55, %s2742_s23  ;;  %1583 = vrot.lane.b32.xlu0 %v1581_v34, %s2743_s30 }
 0x1c6   :  { %v1600_v20 = vstv %s2572_s29  ;;  %s3949_s29 = sld [smem:[#allocation8 + $0x191]] }
 0x1c7   :  { %v1601_v6 = vmul.f32 %v1600_v20, %v3847_v28 }
 0x1c8   :  { %2292 = vrot.lane.b32.xlu1 %v2290_v2, %s2740_s3  ;;  %2055 = vrot.lane.b32.xlu0 %v2053_v0, %s2741_s16  ;;  %s2573_s3 = sld [smem:[#allocation8 + $0x10]]  ;;  %v1631_v2 = vmul.f32 %v1630_v51, %v3847_v28  ;;  %v2341_v0 = vstv %s3894_s21 }
 0x1c9   :  { %v2342_v8 = vmul.f32 %v2341_v0, %v3880_v7  ;;  %s4040_s21 = sld [smem:[#allocation8 + $0x97]] }
 0x1cc   :  { %1830 = vrot.lane.b32.xlu1 %v1828_v40, %s2743_s30  ;;  %1593 = vrot.lane.b32.xlu0 %v1591_v63, %s2744_s9  ;;  %v2104_v63 = vstv %s3897_s18  ;;  %s4044_s18 = sld [smem:[#allocation8 + $0x18]] }
 0x1cd   :  { %v2105_v20 = vmul.f32 %v2104_v63, %v3869_v29 }
 0x1ce   :  { %v1610_v19 = vstv %s2573_s3  ;;  %s3979_s3 = sld [smem:[#allocation8 + $0x192]] }
 0x1cf   :  { %v1611_v45 = vmul.f32 %v1610_v19, %v3847_v28 }
 0x1d0   :  { %2302 = vrot.lane.b32.xlu1 %v2300_v46, %s2741_s16  ;;  %2066 = vrot.lane.b32.xlu0 %v2064_v15, %s2742_s23  ;;  %s2598_s16 = sld [smem:[#allocation8 + $0x90]] }
 0x1d4   :  { %1840 = vrot.lane.b32.xlu1 %v1838_v39, %s2744_s9  ;;  %1603 = vrot.lane.b32.xlu0 %v1601_v6, %s2745_s13 }
 0x1d6   :  { %v1857_v49 = vstv %s2598_s16  ;;  %s3996_s16 = sld [smem:[#allocation8 + $0x16]] }
 0x1d7   :  { %v1858_v47 = vmul.f32 %v1857_v49, %v3856_v27 }
 0x1d8   :  { %2313 = vrot.lane.b32.xlu1 %v2311_v61, %s2742_s23  ;;  %2077 = vrot.lane.b32.xlu0 %v2075_v24, %s2743_s30  ;;  %s3886_s23 = sld [smem:[#allocation8 + $0x91]] }
 0x1dc   :  { %1850 = vrot.lane.b32.xlu1 %v1848_v17, %s2745_s13  ;;  %1613 = vrot.lane.b32.xlu0 %v1611_v45, %s2746_s22 }
 0x1de   :  { %v1867_v44 = vstv %s3886_s23  ;;  %s4028_s23 = sld [smem:[#allocation8 + $0x194]] }
 0x1df   :  { %v1868_v18 = vmul.f32 %v1867_v44, %v3856_v27 }
 0x1e0   :  { %2324 = vrot.lane.b32.xlu1 %v2322_v21, %s2743_s30  ;;  %2087 = vrot.lane.b32.xlu0 %v2085_v33, %s2744_s9  ;;  %s3906_s30 = sld [smem:[#allocation8 + $0x92]]  ;;  %v2351_v21 = vstv %s3920_s26 }
 0x1e1   :  { %v2352_v16 = vmul.f32 %v2351_v21, %v3880_v7  ;;  %s4064_s26 = sld [smem:[#allocation8 + $0x117]] }
 0x1e2   :  { %v1472_v60 = vpop.permute.xlu1 %1471  ;;  %v1462_v41 = vpop.permute.xlu0 %1461 }
 0x1e3   :  { %v1473_v50 = vrot.slane %v1472_v60, 2  ;;  %v1463_v1 = vrot.slane %v1462_v41, 2 }
 0x1e4   :  { %1860 = vrot.lane.b32.xlu1 %v1858_v47, %s2746_s22  ;;  %1623 = vrot.lane.b32.xlu0 %v1621_v43, %s2747_s6  ;;  %v1949_v43 = vstv %s3929_s24  ;;  %s4077_s24 = sld [smem:[#allocation8 + $0x118]] }
 0x1e5   :  { %v1464_v4 = vsel %vm4402_vm1, %v1462_v41, %v1463_v1  ;;  %v1474_v31 = vsel %vm4403_vm0, %v1472_v60, %v1473_v50  ;;  %v1703_v60 = vmul.f32 %v1702_v36, %v3774_v26  ;;  %vm4415_vm0 = vmmov %vm4402_vm1 }
 0x1e6   :  { %v1466_v58 = vadd.f32 %v1464_v4, %v1456_v38  ;;  %v1492_v14 = vpop.permute.xlu1 %1491  ;;  %v1482_v57 = vpop.permute.xlu0 %1481  ;;  %v1877_v39 = vstv %s3906_s30  ;;  %v1887_v4 = vstv %s3934_s25  ;;  %s4052_s30 = sld [smem:[#allocation8 + $0x195]] }
 0x1e7   :  { %v1493_v22 = vrot.slane %v1492_v14, 2  ;;  %v1483_v5 = vrot.slane %v1482_v57, 2  ;;  %v1878_v9 = vmul.f32 %v1877_v39, %v3856_v27  ;;  %s4081_s25 = sld [smem:[#allocation8 + $0x196]] }
 0x1e8   :  { %v1476_v59 = vadd.f32 %v1474_v31, %v1466_v58  ;;  %2334 = vrot.lane.b32.xlu1 %v2332_v48, %s2744_s9  ;;  %2097 = vrot.lane.b32.xlu0 %v2095_v35, %s2745_s13  ;;  %s3924_s9 = sld [smem:[#allocation8 + $0x111]]  ;;  %v1950_v35 = vmul.f32 %v1949_v43, %v3780_v42 }
 0x1e9   :  { %v1484_v25 = vsel %vm4404_vm7, %v1482_v57, %v1483_v5  ;;  %v1494_v3 = vsel %vm4405_vm13, %v1492_v14, %v1493_v22  ;;  %v1650_v57 = vstv %s3938_s14  ;;  %v2196_v22 = vstv %s3944_s2  ;;  %vm4416_vm7 = vmmov %vm4412_vm5  ;;  %s4434_s14 = smov 44   ;;  %s4089_s2 = sld [smem:[#allocation8 + $0x198]] }
 0x1ea   :  { %v1486_v55 = vadd.f32 %v1484_v25, %v1476_v59  ;;  %v1512_v34 = vpop.permute.xlu1 %1511  ;;  %v1502_v62 = vpop.permute.xlu0 %1501  ;;  %v2197_v0 = vmul.f32 %v2196_v22, %v3786_v11  ;;  %vm4417_vm13 = vmmov %vm4413_vm3 }
 0x1eb   :  { %v1513_v10 = vrot.slane %v1512_v34, 2  ;;  %v1503_v40 = vrot.slane %v1502_v62, 2 }
 0x1ec   :  { %v1496_v32 = vadd.f32 %v1494_v3, %v1486_v55  ;;  %1870 = vrot.lane.b32.xlu1 %v1868_v18, %s2747_s6  ;;  %1633 = vrot.lane.b32.xlu0 %v1631_v2, %s2748_s17  ;;  %v1888_v55 = vmul.f32 %v1887_v4, %v3856_v27  ;;  %v2361_v18 = vstv %s3949_s29  ;;  %s4093_s29 = sld [smem:[#allocation8 + $0x197]] }
 0x1ed   :  { %v1504_v12 = vsel %vm4406_vm2, %v1502_v62, %v1503_v40  ;;  %v1514_v6 = vsel %vm4407_vm15, %v1512_v34, %v1513_v10  ;;  %v1651_v34 = vmul.f32 %v1650_v57, %v3847_v28  ;;  %vm4418_vm2 = vcmask 1014784  }
 0x1ee   :  { %v1506_v54 = vadd.f32 %v1504_v12, %v1496_v32  ;;  %v1532_v46 = vpop.permute.xlu1 %1531  ;;  %v1522_v15 = vpop.permute.xlu0 %1521  ;;  %v2114_v37 = vstv %s3924_s9  ;;  %vm4420_vm15 = vcmask 883712   ;;  %s4068_s9 = sld [smem:[#allocation8 + $0x98]] }
 0x1ef   :  { %v1533_v52 = vrot.slane %v1532_v46, 2  ;;  %v1523_v56 = vrot.slane %v1522_v15, 2  ;;  %v2115_v38 = vmul.f32 %v2114_v37, %v3869_v29 }
 0x1f0   :  { %v1516_v61 = vadd.f32 %v1514_v6, %v1506_v54  ;;  %2344 = vrot.lane.b32.xlu1 %v2342_v8, %s2745_s13  ;;  %2107 = vrot.lane.b32.xlu0 %v2105_v20, %s2746_s22  ;;  %s3953_s13 = sld [smem:[#allocation8 + $0x112]]  ;;  %v2362_v54 = vmul.f32 %v2361_v18, %v3880_v7  ;;  %v1897_v8 = vstv %s3965_s28  ;;  %v1660_v20 = vstv %s3969_s11 }
 0x1f1   :  { %v1524_v24 = vsel %vm4408_vm8, %v1522_v15, %v1523_v56  ;;  %v1534_v33 = vsel %vm4409_vm4, %v1532_v46, %v1533_v52  ;;  %v1661_v36 = vmul.f32 %v1660_v20, %v3847_v28  ;;  %vm4421_vm8 = vmmov %vm4412_vm5  ;;  %v2391_v20 = vstv %s4028_s23 }
 0x1f2   :  { %v1526_v19 = vadd.f32 %v1524_v24, %v1516_v61  ;;  %v1719_v17 = vpop.permute.xlu1 %1718  ;;  %v1709_v45 = vpop.permute.xlu0 %1708  ;;  %v1898_v24 = vmul.f32 %v1897_v8, %v3856_v27  ;;  %vm4422_vm4 = vmmov %vm4413_vm3 }
 0x1f3   :  { %v1720_v49 = vrot.slane %v1719_v17, 2  ;;  %v1710_v30 = vrot.slane %v1709_v45, 2 }
 0x1f4   :  { %1880 = vrot.lane.b32.xlu1 %v1878_v9, %s2748_s17  ;;  %1643 = vrot.lane.b32.xlu0 %v1641_v13, %s4410_s7  ;;  %v3958_v41 = vadd.f32 %v1534_v33, %v1526_v19 }
 0x1f5   :  { %v1711_v47 = vsel %vm4411_vm10, %v1709_v45, %v1710_v30  ;;  %v1721_v26 = vsel %vm4412_vm5, %v1719_v17, %v1720_v49  ;;  %v2371_v45 = vstv %s3979_s3  ;;  %vm4423_vm10 = vmmov %vm4418_vm2 }
 0x1f6   :  { %v1713_v50 = vadd.f32 %v1711_v47, %v1703_v60  ;;  %v1729_v1 = vpop.permute.xlu1 %1728  ;;  %v1956_v53 = vpop.permute.xlu0 %1955  ;;  %v2124_v2 = vstv %s3953_s13  ;;  %v2372_v60 = vmul.f32 %v2371_v45, %v3880_v7  ;;  %vm4425_vm5 = vmmov %vm4420_vm15 }
 0x1f7   :  { %v1730_v58 = vrot.slane %v1729_v1, 2  ;;  %v1957_v14 = vrot.slane %v1956_v53, 2  ;;  %v2125_v46 = vmul.f32 %v2124_v2, %v3869_v29 }
 0x1f8   :  { %v1723_v48 = vadd.f32 %v1721_v26, %v1713_v50  ;;  %2354 = vrot.lane.b32.xlu1 %v2352_v16, %s2746_s22  ;;  %2117 = vrot.lane.b32.xlu0 %v2115_v38, %s2747_s6  ;;  %s3983_s22 = sld [smem:[#allocation8 + $0x113]] }
 0x1f9   :  { %v1731_v44 = vsel %vm4413_vm3, %v1729_v1, %v1730_v58  ;;  %v1958_v31 = vsel %vm4402_vm1, %v1956_v53, %v1957_v14  ;;  %v1907_v1 = vstv %s3992_s19  ;;  %v1670_v53 = vstv %s3996_s16 }
 0x1fa   :  { %v1733_v5 = vadd.f32 %v1731_v44, %v1723_v48  ;;  %v1960_v51 = vadd.f32 %v1958_v31, %v1950_v35  ;;  %v2203_v59 = vpop.permute.xlu1 %2202  ;;  %v1966_v25 = vpop.permute.xlu0 %1965  ;;  %v1908_v57 = vmul.f32 %v1907_v1, %v3856_v27  ;;  %v1671_v48 = vmul.f32 %v1670_v53, %v3847_v28 }
 0x1fb   :  { %v2204_v42 = vrot.slane %v2203_v59, 2  ;;  %v1967_v62 = vrot.slane %v1966_v25, 2  ;;  %v2381_v31 = vstv %s4004_s1  ;;  %vm4426_vm3 = vcmask 875520  }
 0x1fc   :  { %1890 = vrot.lane.b32.xlu1 %v1888_v55, %s4410_s7  ;;  %1653 = vrot.lane.b32.xlu0 %v1651_v34, %s4414_s8  ;;  %vm4427_vm1 = vcmask 867328   ;;  %v2401_v53 = vstv %s4052_s30 }
 0x1fd   :  { %v2205_v3 = vsel %vm4415_vm0, %v2203_v59, %v2204_v42  ;;  %v1968_v10 = vsel %vm4416_vm7, %v1966_v25, %v1967_v62  ;;  %v2382_v42 = vmul.f32 %v2381_v31, %v3880_v7  ;;  %vm4428_vm0 = vmmov %vm4418_vm2  ;;  %v1937_v31 = vstv %s4068_s9 }
 0x1fe   :  { %v2207_v40 = vadd.f32 %v2205_v3, %v2197_v0  ;;  %v1970_v63 = vadd.f32 %v1968_v10, %v1960_v51  ;;  %v1976_v32 = vpop.permute.xlu1 %1975  ;;  %v1739_v12 = vpop.permute.xlu0 %1738  ;;  %v2134_v9 = vstv %s3983_s22  ;;  %v1917_v0 = vstv %s4016_s12  ;;  %vm4430_vm7 = vmmov %vm4425_vm5 }
 0x1ff   :  { %v1977_v15 = vrot.slane %v1976_v32, 2  ;;  %v1740_v11 = vrot.slane %v1739_v12, 2  ;;  %v2135_v47 = vmul.f32 %v2134_v9, %v3869_v29  ;;  %v1680_v3 = vstv %s4020_s15 }
 0x200   :  { %2364 = vrot.lane.b32.xlu1 %v2362_v54, %s2747_s6  ;;  %2127 = vrot.lane.b32.xlu0 %v2125_v46, %s2748_s17  ;;  %s4008_s6 = sld [smem:[#allocation8 + $0x114]]  ;;  %v1918_v46 = vmul.f32 %v1917_v0, %v3856_v27  ;;  %v1927_v9 = vstv %s4040_s21  ;;  %v2411_v0 = vstv %s4081_s25 }
 0x201   :  { %v1978_v39 = vsel %vm4417_vm13, %v1976_v32, %v1977_v15  ;;  %v1741_v6 = vsel %vm4418_vm2, %v1739_v12, %v1740_v11  ;;  %v1681_v15 = vmul.f32 %v1680_v3, %v3847_v28  ;;  %vm4431_vm13 = vmmov %vm4426_vm3  ;;  %vm4432_vm2 = vcmask 859136  }
 0x202   :  { %v1980_v52 = vadd.f32 %v1978_v39, %v1970_v63  ;;  %v1743_v56 = vadd.f32 %v1741_v6, %v1733_v5  ;;  %v1749_v23 = vpop.permute.xlu1 %1748  ;;  %v2213_v61 = vpop.permute.xlu0 %2212 }
 0x203   :  { %v1750_v19 = vrot.slane %v1749_v23, 2  ;;  %v2214_v17 = vrot.slane %v2213_v61, 2 }
 0x204   :  { %1900 = vrot.lane.b32.xlu1 %v1898_v24, %s4414_s8  ;;  %1663 = vrot.lane.b32.xlu0 %v1661_v36, %s4419_s0  ;;  %v2392_v36 = vmul.f32 %v2391_v20, %v3880_v7 }
 0x205   :  { %v1751_v13 = vsel %vm4420_vm15, %v1749_v23, %v1750_v19  ;;  %v2215_v21 = vsel %vm4421_vm8, %v2213_v61, %v2214_v17  ;;  %vm4433_vm15 = vcmask 850944   ;;  %vm4435_vm8 = vmmov %vm4426_vm3 }
 0x206   :  { %v1753_v33 = vadd.f32 %v1751_v13, %v1743_v56  ;;  %v2217_v49 = vadd.f32 %v2215_v21, %v2207_v40  ;;  %v2223_v30 = vpop.permute.xlu1 %2222  ;;  %v1986_v37 = vpop.permute.xlu0 %1985  ;;  %v2144_v22 = vstv %s4008_s6  ;;  %v1690_v13 = vstv %s4044_s18 }
 0x207   :  { %v2224_v43 = vrot.slane %v2223_v30, 2  ;;  %v1987_v50 = vrot.slane %v1986_v37, 2  ;;  %v2145_v62 = vmul.f32 %v2144_v22, %v3869_v29 }
 0x208   :  { %2374 = vrot.lane.b32.xlu1 %v2372_v60, %s2748_s17  ;;  %2137 = vrot.lane.b32.xlu0 %v2135_v47, %s4410_s7  ;;  %s4032_s17 = sld [smem:[#allocation8 + $0x115]]  ;;  %v1928_v47 = vmul.f32 %v1927_v9, %v3856_v27 }
 0x209   :  { %v2225_v16 = vsel %vm4422_vm4, %v2223_v30, %v2224_v43  ;;  %v1988_v38 = vsel %vm4423_vm10, %v1986_v37, %v1987_v50  ;;  %v1691_v43 = vmul.f32 %v1690_v13, %v3847_v28  ;;  %vm4436_vm4 = vmmov %vm4427_vm1 }
 0x20a   :  { %v2227_v4 = vadd.f32 %v2225_v16, %v2217_v49  ;;  %v1990_v26 = vadd.f32 %v1988_v38, %v1980_v52  ;;  %v1996_v58 = vpop.permute.xlu1 %1995  ;;  %v1759_v14 = vpop.permute.xlu0 %1758  ;;  %v2164_v16 = vstv %s4056_s10  ;;  %vm4437_vm10 = vmmov %vm4433_vm15 }
 0x20b   :  { %v1997_v35 = vrot.slane %v1996_v58, 2  ;;  %v1760_v44 = vrot.slane %v1759_v14, 2 }
 0x20c   :  { %1910 = vrot.lane.b32.xlu1 %v1908_v57, %s4419_s0  ;;  %1673 = vrot.lane.b32.xlu0 %v1671_v48, %s4424_s27  ;;  %v2165_v57 = vmul.f32 %v2164_v16, %v3869_v29 }
 0x20d   :  { %v1998_v5 = vsel %vm4425_vm5, %v1996_v58, %v1997_v35  ;;  %v1761_v51 = vsel %vm4426_vm3, %v1759_v14, %v1760_v44  ;;  %v2402_v14 = vmul.f32 %v2401_v53, %v3880_v7  ;;  %v2174_v44 = vstv %s4064_s26  ;;  %vm4439_vm3 = vmmov %vm4427_vm1 }
 0x20e   :  { %v2000_v59 = vadd.f32 %v1998_v5, %v1990_v26  ;;  %v1763_v25 = vadd.f32 %v1761_v51, %v1753_v33  ;;  %v1769_v55 = vpop.permute.xlu1 %1768  ;;  %v2233_v34 = vpop.permute.xlu0 %2232  ;;  %v2154_v39 = vstv %s4032_s17  ;;  %vm4438_vm5 = vcmask 719872  }
 0x20f   :  { %v1770_v18 = vrot.slane %v1769_v55, 2  ;;  %v2234_v2 = vrot.slane %v2233_v34, 2  ;;  %v2155_v19 = vmul.f32 %v2154_v39, %v3869_v29 }
 0x210   :  { %2384 = vrot.lane.b32.xlu1 %v2382_v42, %s4410_s7  ;;  %2147 = vrot.lane.b32.xlu0 %v2145_v62, %s4414_s8  ;;  %v1938_v42 = vmul.f32 %v1937_v31, %v3856_v27 }
 0x211   :  { %v1771_v10 = vsel %vm4427_vm1, %v1769_v55, %v1770_v18  ;;  %v2235_v40 = vsel %vm4428_vm0, %v2233_v34, %v2234_v2  ;;  %v2175_v34 = vmul.f32 %v2174_v44, %v3869_v29  ;;  %v2184_v2 = vstv %s4077_s24  ;;  %vm4440_vm1 = vmmov %vm4432_vm2 }
 0x212   :  { %v1773_v63 = vadd.f32 %v1771_v10, %v1763_v25  ;;  %v2237_v32 = vadd.f32 %v2235_v40, %v2227_v4  ;;  %v2243_v12 = vpop.permute.xlu1 %2242  ;;  %v2006_v54 = vpop.permute.xlu0 %2005  ;;  %v2185_v27 = vmul.f32 %v2184_v2, %v3869_v29  ;;  %vm4441_vm0 = vmmov %vm4438_vm5 }
 0x213   :  { %v2244_v11 = vrot.slane %v2243_v12, 2  ;;  %v2007_v8 = vrot.slane %v2006_v54, 2 }
 0x214   :  { %1920 = vrot.lane.b32.xlu1 %v1918_v46, %s4424_s27  ;;  %1683 = vrot.lane.b32.xlu0 %v1681_v15, %s4429_s20 }
 0x215   :  { %v2245_v6 = vsel %vm4430_vm7, %v2243_v12, %v2244_v11  ;;  %v2008_v52 = vsel %vm4431_vm13, %v2006_v54, %v2007_v8  ;;  %v2412_v54 = vmul.f32 %v2411_v0, %v3880_v7  ;;  %v2431_v11 = vstv %s4089_s2  ;;  %vm4443_vm13 = vmmov %vm4440_vm1 }
 0x216   :  { %v2247_v56 = vadd.f32 %v2245_v6, %v2237_v32  ;;  %v2010_v23 = vadd.f32 %v2008_v52, %v2000_v59  ;;  %v1779_v61 = vpop.permute.xlu1 %1778  ;;  %v1542_v24 = vpop.permute.xlu0 %1541  ;;  %v2421_v8 = vstv %s4093_s29  ;;  %vm4442_vm7 = vcmask 711680  }
 0x217   :  { %v1780_v17 = vrot.slane %v1779_v61, 2  ;;  %v1543_v45 = vrot.slane %v1542_v24, 2  ;;  %v2432_v29 = vmul.f32 %v2431_v11, %v3880_v7 }
 0x218   :  { %2394 = vrot.lane.b32.xlu1 %v2392_v36, %s4414_s8  ;;  %2157 = vrot.lane.b32.xlu0 %v2155_v19, %s4419_s0 }
 0x219   :  { %v1781_v21 = vsel %vm4432_vm2, %v1779_v61, %v1780_v17  ;;  %v1544_v33 = vsel %vm4433_vm15, %v1542_v24, %v1543_v45  ;;  %v2422_v61 = vmul.f32 %v2421_v8, %v3880_v7  ;;  %vm4444_vm2 = vmmov %vm4437_vm10 }
 0x21a   :  { %v1783_v49 = vadd.f32 %v1781_v21, %v1773_v63  ;;  %v1546_v30 = vadd.f32 %v1544_v33, %v3958_v41  ;;  %v2253_v37 = vpop.permute.xlu1 %2252  ;;  %v2016_v60 = vpop.permute.xlu0 %2015  ;;  %vm4445_vm15 = vmmov %vm4442_vm7 }
 0x21b   :  { %v2254_v50 = vrot.slane %v2253_v37, 2  ;;  %v2017_v1 = vrot.slane %v2016_v60, 2 }
 0x21c   :  { %1930 = vrot.lane.b32.xlu1 %v1928_v47, %s4429_s20  ;;  %1693 = vrot.lane.b32.xlu0 %v1691_v43, %s4434_s14 }
 0x21d   :  { %v2255_v41 = vsel %vm4435_vm8, %v2253_v37, %v2254_v50  ;;  %v2018_v38 = vsel %vm4436_vm4, %v2016_v60, %v2017_v1  ;;  %vm4446_vm8 = vcmask 703488   ;;  %vm4447_vm4 = vmmov %vm4444_vm2 }
 0x21e   :  { %v2257_v4 = vadd.f32 %v2255_v41, %v2247_v56  ;;  %v2020_v28 = vadd.f32 %v2018_v38, %v2010_v23  ;;  %v1789_v26 = vpop.permute.xlu1 %1788  ;;  %v1552_v58 = vpop.permute.xlu0 %1551 }
 0x21f   :  { %v1790_v48 = vrot.slane %v1789_v26, 2  ;;  %v1553_v35 = vrot.slane %v1552_v58, 2 }
 0x220   :  { %2404 = vrot.lane.b32.xlu1 %v2402_v14, %s4419_s0  ;;  %2167 = vrot.lane.b32.xlu0 %v2165_v57, %s4424_s27 }
 0x221   :  { %v1791_v22 = vsel %vm4437_vm10, %v1789_v26, %v1790_v48  ;;  %v1554_v5 = vsel %vm4438_vm5, %v1552_v58, %v1553_v35  ;;  %vm4448_vm10 = vmmov %vm4441_vm0 }
 0x222   :  { %v1793_v51 = vadd.f32 %v1791_v22, %v1783_v49  ;;  %v1556_v59 = vadd.f32 %v1554_v5, %v1546_v30  ;;  %v2263_v25 = vpop.permute.xlu1 %2262  ;;  %v2026_v55 = vpop.permute.xlu0 %2025  ;;  %vm4449_vm5 = vmmov %vm4446_vm8 }
 0x223   :  { %v2264_v62 = vrot.slane %v2263_v25, 2  ;;  %v2027_v18 = vrot.slane %v2026_v55, 2 }
 0x224   :  { %2177 = vrot.lane.b32.xlu1 %v2175_v34, %s4429_s20  ;;  %1940 = vrot.lane.b32.xlu0 %v1938_v42, %s4434_s14 }
 0x225   :  { %v2265_v3 = vsel %vm4439_vm3, %v2263_v25, %v2264_v62  ;;  %v2028_v10 = vsel %vm4440_vm1, %v2026_v55, %v2027_v18  ;;  %vm4450_vm3 = vcmask 695296   ;;  %vm4451_vm1 = vmmov %vm4441_vm0 }
 0x226   :  { %v2267_v40 = vadd.f32 %v2265_v3, %v2257_v4  ;;  %v2030_v63 = vadd.f32 %v2028_v10, %v2020_v28  ;;  %v1799_v32 = vpop.permute.xlu1 %1798  ;;  %v1562_v12 = vpop.permute.xlu0 %1561 }
 0x227   :  { %v1800_v46 = vrot.slane %v1799_v32, 2  ;;  %v1563_v15 = vrot.slane %v1562_v12, 2 }
 0x228   :  { %2187 = vrot.lane.b32.xlu1 %v2185_v27, %s4434_s14  ;;  %2414 = vrot.lane.b32.xlu0 %v2412_v54, %s4424_s27 }
 0x229   :  { %v1801_v20 = vsel %vm4441_vm0, %v1799_v32, %v1800_v46  ;;  %v1564_v39 = vsel %vm4442_vm7, %v1562_v12, %v1563_v15  ;;  %vm4452_vm0 = vmmov %vm4442_vm7 }
 0x22a   :  { %v1803_v6 = vadd.f32 %v1801_v20, %v1793_v51  ;;  %v1566_v52 = vadd.f32 %v1564_v39, %v1556_v59  ;;  %v2273_v56 = vpop.permute.xlu1 %2272  ;;  %v2036_v23 = vpop.permute.xlu0 %2035  ;;  %vm4453_vm7 = vmmov %vm4450_vm3 }
 0x22b   :  { %v2274_v24 = vrot.slane %v2273_v56, 2  ;;  %v2037_v36 = vrot.slane %v2036_v23, 2 }
 0x22c   :  { %2434 = vrot.lane.b32.xlu1 %v2432_v29, %s4434_s14  ;;  %2424 = vrot.lane.b32.xlu0 %v2422_v61, %s4429_s20 }
 0x22d   :  { %v2275_v19 = vsel %vm4443_vm13, %v2273_v56, %v2274_v24  ;;  %v2038_v17 = vsel %vm4444_vm2, %v2036_v23, %v2037_v36  ;;  %vm4454_vm13 = vcmask 687104   ;;  %vm4455_vm2 = vmmov %vm4452_vm0 }
 0x22e   :  { %v2277_v45 = vadd.f32 %v2275_v19, %v2267_v40  ;;  %v2040_v9 = vadd.f32 %v2038_v17, %v2030_v63  ;;  %v1809_v13 = vpop.permute.xlu1 %1808  ;;  %v1573_v21 = vpop.permute.xlu0 %1572 }
 0x22f   :  { %v1810_v33 = vrot.slane %v1809_v13, 2  ;;  %v1574_v49 = vrot.slane %v1573_v21, 6 }
 0x231   :  { %v1811_v30 = vsel %vm4445_vm15, %v1809_v13, %v1810_v33  ;;  %v1575_v7 = vsel %vm4446_vm8, %v1574_v49, %v1573_v21  ;;  %vm4456_vm15 = vmmov %vm4449_vm5 }
 0x232   :  { %v1813_v37 = vadd.f32 %v1811_v30, %v1803_v6  ;;  %v1577_v60 = vadd.f32 %v1575_v7, %v1566_v52  ;;  %v2283_v47 = vpop.permute.xlu1 %2282  ;;  %v2046_v43 = vpop.permute.xlu0 %2045  ;;  %vm4457_vm8 = vmmov %vm4454_vm13 }
 0x233   :  { %v2284_v50 = vrot.slane %v2283_v47, 2  ;;  %v2047_v1 = vrot.slane %v2046_v43, 2 }
 0x235   :  { %v2285_v53 = vsel %vm4447_vm4, %v2283_v47, %v2284_v50  ;;  %v2048_v16 = vsel %vm4448_vm10, %v2046_v43, %v2047_v1  ;;  %vm4458_vm4 = vcmask 556032   ;;  %vm4459_vm10 = vmmov %vm4450_vm3 }
 0x236   :  { %v2287_v41 = vadd.f32 %v2285_v53, %v2277_v45  ;;  %v2050_v38 = vadd.f32 %v2048_v16, %v2040_v9  ;;  %v1820_v4 = vpop.permute.xlu1 %1819  ;;  %v1584_v28 = vpop.permute.xlu0 %1583 }
 0x237   :  { %v1821_v26 = vrot.slane %v1820_v4, 6  ;;  %v1585_v58 = vrot.slane %v1584_v28, 6 }
 0x239   :  { %v1822_v14 = vsel %vm4449_vm5, %v1821_v26, %v1820_v4  ;;  %v1586_v57 = vsel %vm4450_vm3, %v1585_v58, %v1584_v28  ;;  %vm4460_vm3 = vmmov %vm4458_vm4 }
 0x23a   :  { %v1824_v48 = vadd.f32 %v1822_v14, %v1813_v37  ;;  %v1588_v35 = vadd.f32 %v1586_v57, %v1577_v60  ;;  %v2293_v44 = vpop.permute.xlu1 %2292  ;;  %v2056_v31 = vpop.permute.xlu0 %2055 }
 0x23b   :  { %v2294_v22 = vrot.slane %v2293_v44, 2  ;;  %v2057_v5 = vrot.slane %v2056_v31, 2 }
 0x23d   :  { %v2295_v51 = vsel %vm4451_vm1, %v2293_v44, %v2294_v22  ;;  %v2058_v59 = vsel %vm4452_vm0, %v2056_v31, %v2057_v5  ;;  %vm4461_vm1 = vcmask 547840   ;;  %vm4462_vm0 = vmmov %vm4453_vm7 }
 0x23e   :  { %v2297_v25 = vadd.f32 %v2295_v51, %v2287_v41  ;;  %v2060_v55 = vadd.f32 %v2058_v59, %v2050_v38  ;;  %v1831_v34 = vpop.permute.xlu1 %1830  ;;  %v1594_v42 = vpop.permute.xlu0 %1593 }
 0x23f   :  { %v1832_v62 = vrot.slane %v1831_v34, 6  ;;  %v1595_v18 = vrot.slane %v1594_v42, 6 }
 0x241   :  { %v1833_v2 = vsel %vm4453_vm7, %v1832_v62, %v1831_v34  ;;  %v1596_v0 = vsel %vm4454_vm13, %v1595_v18, %v1594_v42  ;;  %vm4463_vm7 = vmmov %vm4457_vm8 }
 0x242   :  { %v1835_v3 = vadd.f32 %v1833_v2, %v1824_v48  ;;  %v1598_v10 = vadd.f32 %v1596_v0, %v1588_v35  ;;  %v2303_v40 = vpop.permute.xlu1 %2302  ;;  %v2067_v63 = vpop.permute.xlu0 %2066  ;;  %vm4464_vm13 = vmmov %vm4461_vm1 }
 0x243   :  { %v2304_v32 = vrot.slane %v2303_v40, 2  ;;  %v2068_v12 = vrot.slane %v2067_v63, 6 }
 0x245   :  { %v2305_v27 = vsel %vm4455_vm2, %v2303_v40, %v2304_v32  ;;  %v2069_v54 = vsel %vm4456_vm15, %v2068_v12, %v2067_v63  ;;  %vm4465_vm2 = vmmov %vm4463_vm7 }
 0x246   :  { %v2307_v46 = vadd.f32 %v2305_v27, %v2297_v25  ;;  %v2071_v15 = vadd.f32 %v2069_v54, %v2060_v55  ;;  %v1841_v11 = vpop.permute.xlu1 %1840  ;;  %v1604_v8 = vpop.permute.xlu0 %1603  ;;  %v1452_v54 = vstv %s4261_s4  ;;  %vm4466_vm15 = vmmov %vm4460_vm3  ;;  %s2758_s4 = smov 42  }
 0x247   :  { %v1842_v20 = vrot.slane %v1841_v11, 6  ;;  %v1605_v39 = vrot.slane %v1604_v8, 6 }
 0x249   :  { %v1843_v6 = vsel %vm4457_vm8, %v1842_v20, %v1841_v11  ;;  %v1606_v52 = vsel %vm4458_vm4, %v1605_v39, %v1604_v8  ;;  %vm4467_vm8 = vmmov %vm4460_vm3 }
 0x24a   :  { %v1845_v56 = vadd.f32 %v1843_v6, %v1835_v3  ;;  %v1608_v23 = vadd.f32 %v1606_v52, %v1598_v10  ;;  %v2314_v29 = vpop.permute.xlu1 %2313  ;;  %v2078_v61 = vpop.permute.xlu0 %2077  ;;  %vm4468_vm4 = vmmov %vm4461_vm1 }
 0x24b   :  { %v2079_v24 = vrot.slane %v2078_v61, 6  ;;  %v2315_v58 = vrot.slane %v2314_v29, 6 }
 0x24d   :  { %v2080_v36 = vsel %vm4459_vm10, %v2079_v24, %v2078_v61  ;;  %v2316_v22 = vsel %vm4449_vm5, %v2315_v58, %v2314_v29  ;;  %vm4469_vm10 = vcmask 523264   ;;  %vm4470_vm5 = vmmov %vm4461_vm1 }
 0x24e   :  { %v2082_v19 = vadd.f32 %v2080_v36, %v2071_v15  ;;  %v1851_v17 = vpop.permute.xlu1 %1850  ;;  %v1614_v45 = vpop.permute.xlu0 %1613  ;;  %v2318_v2 = vadd.f32 %v2316_v22, %v2307_v46 }
 0x24f   :  { %v1852_v48 = vrot.slane %v1851_v17, 6  ;;  %v1615_v35 = vrot.slane %v1614_v45, 6 }
 0x251   :  { %v1853_v59 = vsel %vm4460_vm3, %v1852_v48, %v1851_v17  ;;  %v1616_v25 = vsel %vm4461_vm1, %v1615_v35, %v1614_v45  ;;  %vm4471_vm3 = vmmov %vm4469_vm10  ;;  %vm4472_vm1 = vcmask 384000  }
 0x252   :  { %v2325_v9 = vpop.permute.xlu1 %2324  ;;  %v2088_v13 = vpop.permute.xlu0 %2087  ;;  %v1855_v40 = vadd.f32 %v1853_v59, %v1845_v56  ;;  %v1618_v63 = vadd.f32 %v1616_v25, %v1608_v23 }
 0x253   :  { %v2326_v44 = vrot.slane %v2325_v9, 6  ;;  %v2089_v31 = vrot.slane %v2088_v13, 6 }
 0x255   :  { %v2327_v42 = vsel %vm4462_vm0, %v2326_v44, %v2325_v9  ;;  %v2090_v0 = vsel %vm4463_vm7, %v2089_v31, %v2088_v13  ;;  %vm4473_vm0 = vmmov %vm4471_vm3 }
 0x256   :  { %v1861_v21 = vpop.permute.xlu1 %1860  ;;  %v1624_v33 = vpop.permute.xlu0 %1623  ;;  %v2329_v15 = vadd.f32 %v2327_v42, %v2318_v2  ;;  %v2092_v20 = vadd.f32 %v2090_v0, %v2082_v19  ;;  %vm4474_vm7 = vmmov %vm4472_vm1 }
 0x257   :  { %v1862_v55 = vrot.slane %v1861_v21, 6  ;;  %v1625_v34 = vrot.slane %v1624_v33, 6 }
 0x259   :  { %v1863_v11 = vsel %vm4464_vm13, %v1862_v55, %v1861_v21  ;;  %v1626_v46 = vsel %vm933_vm9, %v1625_v34, %v1624_v33  ;;  %vm4476_vm13 = vmmov %vm4472_vm1 }
 0x25a   :  { %v2335_v49 = vpop.permute.xlu1 %2334  ;;  %v2098_v30 = vpop.permute.xlu0 %2097  ;;  %v1865_v24 = vadd.f32 %v1863_v11, %v1855_v40  ;;  %v1628_v36 = vadd.f32 %v1626_v46, %v1618_v63 }
 0x25b   :  { %v2336_v62 = vrot.slane %v2335_v49, 6  ;;  %v2099_v18 = vrot.slane %v2098_v30, 6 }
 0x25d   :  { %v2337_v39 = vsel %vm4465_vm2, %v2336_v62, %v2335_v49  ;;  %v2100_v6 = vsel %vm4466_vm15, %v2099_v18, %v2098_v30  ;;  %vm4477_vm2 = vmmov %vm4473_vm0 }
 0x25e   :  { %v1871_v7 = vpop.permute.xlu1 %1870  ;;  %v1634_v37 = vpop.permute.xlu0 %1633  ;;  %v2339_v13 = vadd.f32 %v2337_v39, %v2329_v15  ;;  %v2102_v30 = vadd.f32 %v2100_v6, %v2092_v20  ;;  %vm4479_vm15 = vmmov %vm4472_vm1 }
 0x25f   :  { %v1872_v3 = vrot.slane %v1871_v7, 6  ;;  %v1635_v10 = vrot.slane %v1634_v37, 6 }
 0x261   :  { %v1873_v56 = vsel %vm933_vm9, %v1872_v3, %v1871_v7  ;;  %v1636_v23 = vsel %vm974_vm14, %v1635_v10, %v1634_v37 }
 0x262   :  { %v2345_v60 = vpop.permute.xlu1 %2344  ;;  %v2108_v47 = vpop.permute.xlu0 %2107  ;;  %v1875_v7 = vadd.f32 %v1873_v56, %v1865_v24  ;;  %v1638_v37 = vadd.f32 %v1636_v23, %v1628_v36 }
 0x263   :  { %v2346_v32 = vrot.slane %v2345_v60, 6  ;;  %v2109_v8 = vrot.slane %v2108_v47, 6 }
 0x265   :  { %v2347_v17 = vsel %vm4467_vm8, %v2346_v32, %v2345_v60  ;;  %v2110_v21 = vsel %vm4468_vm4, %v2109_v8, %v2108_v47  ;;  %vm2446_vm4 = vcmask 343040  }
 0x266   :  { %v4136_v43 = vpop.permute.xlu1 %1880  ;;  %v4138_v50 = vpop.permute.xlu0 %1643  ;;  %v2349_v48 = vadd.f32 %v2347_v17, %v2339_v13  ;;  %v2112_v47 = vadd.f32 %v2110_v21, %v2102_v30 }
 0x267   :  { %v1882_v52 = vrot.slane %v4136_v43, 6  ;;  %v1645_v29 = vrot.slane %v4138_v50, 6 }
 0x269   :  { %v1883_v58 = vsel %vm974_vm14, %v1882_v52, %v4136_v43  ;;  %v1646_v60 = vsel %vm4469_vm10, %v1645_v29, %v4138_v50 }
 0x26a   :  { %v4140_v1 = vpop.permute.xlu1 %2354  ;;  %v4142_v53 = vpop.permute.xlu0 %2117  ;;  %v1885_v55 = vadd.f32 %v1883_v58, %v1875_v7  ;;  %v1648_v42 = vadd.f32 %v1646_v60, %v1638_v37 }
 0x26b   :  { %v2356_v61 = vrot.slane %v4140_v1, 6  ;;  %v2119_v19 = vrot.slane %v4142_v53, 6 }
 0x26d   :  { %v2357_v35 = vsel %vm4470_vm5, %v2356_v61, %v4140_v1  ;;  %v2120_v31 = vsel %vm933_vm9, %v2119_v19, %v4142_v53 }
 0x26e   :  { %v4144_v16 = vpop.permute.xlu1 %1890  ;;  %v4146_v41 = vpop.permute.xlu0 %1653  ;;  %v2359_v62 = vadd.f32 %v2357_v35, %v2349_v48  ;;  %v2122_v2 = vadd.f32 %v2120_v31, %v2112_v47 }
 0x26f   :  { %v1892_v33 = vrot.slane %v4144_v16, 6  ;;  %v1655_v49 = vrot.slane %v4146_v41, 6 }
 0x271   :  { %v1893_v50 = vsel %vm4471_vm3, %v1892_v33, %v4144_v16  ;;  %v1656_v1 = vsel %vm1056_vm11, %v1655_v49, %v4146_v41 }
 0x272   :  { %v4148_v38 = vpop.permute.xlu1 %2364  ;;  %v4150_v4 = vpop.permute.xlu0 %2127  ;;  %v1895_v40 = vadd.f32 %v1893_v50, %v1885_v55  ;;  %v1658_v16 = vadd.f32 %v1656_v1, %v1648_v42 }
 0x273   :  { %v2129_v22 = vrot.slane %v4150_v4, 6  ;;  %v2366_v53 = vrot.slane %v4148_v38, 6 }
 0x275   :  { %v2130_v41 = vsel %vm974_vm14, %v2129_v22, %v4150_v4  ;;  %v2367_v20 = vsel %vm933_vm9, %v2366_v53, %v4148_v38  ;;  %vm4475_vm9 = vcmask 359424  }
 0x276   :  { %v4152_v28 = vpop.permute.xlu1 %1900  ;;  %v4154_v26 = vpop.permute.xlu0 %1663  ;;  %v2132_v23 = vadd.f32 %v2130_v41, %v2122_v2  ;;  %vm4481_vm8 = vmmov %vm4475_vm9 }
 0x277   :  { %v1665_v44 = vrot.slane %v4154_v26, 6  ;;  %v1902_v59 = vrot.slane %v4152_v28, 6 }
 0x279   :  { %v1666_v0 = vsel %vm4472_vm1, %v1665_v44, %v4154_v26  ;;  %v1903_v63 = vsel %vm1056_vm11, %v1902_v59, %v4152_v28 }
 0x27a   :  { %v4156_v14 = vpop.permute.xlu1 %2374  ;;  %v4158_v57 = vpop.permute.xlu0 %2137  ;;  %v1668_v39 = vadd.f32 %v1666_v0, %v1658_v16  ;;  %v1905_v29 = vadd.f32 %v1903_v63, %v1895_v40 }
 0x27b   :  { %v2139_v18 = vrot.slane %v4158_v57, 6  ;;  %v2376_v6 = vrot.slane %v4156_v14, 6 }
 0x27d   :  { %v2140_v4 = vsel %vm4473_vm0, %v2139_v18, %v4158_v57  ;;  %v2377_v49 = vsel %vm974_vm14, %v2376_v6, %v4156_v14  ;;  %vm4478_vm14 = vmmov %vm4475_vm9 }
 0x27e   :  { %v4161_v5 = vpop.permute.xlu1 %1910  ;;  %v4163_v51 = vpop.permute.xlu0 %1673  ;;  %v2142_v21 = vadd.f32 %v2140_v4, %v2132_v23 }
 0x27f   :  { %v1675_v34 = vrot.slane %v4163_v51, 6  ;;  %v1912_v3 = vrot.slane %v4161_v5, 6 }
 0x281   :  { %v1676_v11 = vsel %vm1138_vm6, %v1675_v34, %v4163_v51  ;;  %v1913_v28 = vsel %vm4474_vm7, %v1912_v3, %v4161_v5  ;;  %v2369_v5 = vadd.f32 %v2367_v20, %v2359_v62 }
 0x282   :  { %v4169_v12 = vpop.permute.xlu1 %2384  ;;  %v4171_v27 = vpop.permute.xlu0 %2147  ;;  %v1678_v61 = vadd.f32 %v1676_v11, %v1668_v39 }
 0x283   :  { %v2149_v46 = vrot.slane %v4171_v27, 6  ;;  %v2386_v24 = vrot.slane %v4169_v12, 6  ;;  %v2379_v14 = vadd.f32 %v2377_v49, %v2369_v5 }
 0x285   :  { %v2150_v17 = vsel %vm1056_vm11, %v2149_v46, %v4171_v27  ;;  %v2387_v27 = vsel %vm4477_vm2, %v2386_v24, %v4169_v12 }
 0x286   :  { %v1921_v45 = vpop.permute.xlu1 %1920  ;;  %v1684_v9 = vpop.permute.xlu0 %1683  ;;  %v2389_v1 = vadd.f32 %v2387_v27, %v2379_v14 }
 0x287   :  { %v1685_v10 = vrot.slane %v1684_v9, 6  ;;  %v1922_v8 = vrot.slane %v1921_v45, 6 }
 0x289   :  { %v1686_v52 = vsel %vm1179_vm12, %v1685_v10, %v1684_v9  ;;  %v1923_v19 = vsel %vm1138_vm6, %v1922_v8, %v1921_v45  ;;  %v1915_v9 = vadd.f32 %v1913_v28, %v1905_v29  ;;  %v2152_v45 = vadd.f32 %v2150_v17, %v2142_v21 }
 0x28a   :  { %v4201_v25 = vpop.permute.xlu1 %2394  ;;  %v2158_v43 = vpop.permute.xlu0 %2157  ;;  %v1688_v33 = vadd.f32 %v1686_v52, %v1678_v61 }
 0x28b   :  { %v2159_v56 = vrot.slane %v2158_v43, 6  ;;  %v2396_v30 = vrot.slane %v4201_v25, 6  ;;  %v1925_v58 = vadd.f32 %v1923_v19, %v1915_v9 }
 0x28d   :  { %v2160_v7 = vsel %vm4476_vm13, %v2159_v56, %v2158_v43  ;;  %v2397_v43 = vsel %vm1056_vm11, %v2396_v30, %v4201_v25  ;;  %vm4480_vm11 = vmmov %vm4475_vm9 }
 0x28e   :  { %v1931_v32 = vpop.permute.xlu1 %1930  ;;  %v1694_v15 = vpop.permute.xlu0 %1693  ;;  %v2162_v59 = vadd.f32 %v2160_v7, %v2152_v45  ;;  %v2399_v10 = vadd.f32 %v2397_v43, %v2389_v1 }
 0x28f   :  { %v1695_v26 = vrot.slane %v1694_v15, 6  ;;  %v1932_v51 = vrot.slane %v1931_v32, 6 }
 0x291   :  { %v1696_v57 = vsel %vm4475_vm9, %v1695_v26, %v1694_v15  ;;  %v1933_v37 = vsel %vm1179_vm12, %v1932_v51, %v1931_v32 }
 0x292   :  { %v2405_v36 = vpop.permute.xlu1 %2404  ;;  %v2168_v38 = vpop.permute.xlu0 %2167  ;;  %v1698_v48 = vadd.f32 %v1696_v57, %v1688_v33  ;;  %v1935_v55 = vadd.f32 %v1933_v37, %v1925_v58 }
 0x293   :  { %v2169_v13 = vrot.slane %v2168_v38, 6  ;;  %v2406_v44 = vrot.slane %v2405_v36, 6 }
 0x294   :  { %v1699_v34 = vadd.f32 %v1698_v48, %v1452_v54 }
 0x295   :  { %v2170_v47 = vsel %vm1138_vm6, %v2169_v13, %v2168_v38  ;;  %v2407_v2 = vsel %vm4479_vm15, %v2406_v44, %v2405_v36 }
 0x296   :  { %v2178_v60 = vpop.permute.xlu1 %2177  ;;  %v1941_v35 = vpop.permute.xlu0 %1940  ;;  %v2172_v42 = vadd.f32 %v2170_v47, %v2162_v59  ;;  %v2409_v63 = vadd.f32 %v2407_v2, %v2399_v10 }
 0x297   :  { %v2179_v31 = vrot.slane %v2178_v60, 6  ;;  %v1942_v22 = vrot.slane %v1941_v35, 6 }
 0x299   :  { %v2180_v50 = vsel %vm1179_vm12, %v2179_v31, %v2178_v60  ;;  %v1943_v12 = vsel %vm4478_vm14, %v1942_v22, %v1941_v35 }
 0x29a   :  { %v1945_v62 = vadd.f32 %v1943_v12, %v1935_v55  ;;  %v2188_v53 = vpop.permute.xlu1 %2187  ;;  %v2415_v18 = vpop.permute.xlu0 %2414  ;;  %v2182_v25 = vadd.f32 %v2180_v50, %v2172_v42 }
 0x29b   :  { %v2189_v0 = vrot.slane %v2188_v53, 6  ;;  %v2416_v3 = vrot.slane %v2415_v18, 6 }
 0x29c   :  { %v1946_v40 = vadd.f32 %v1945_v62, %v1699_v34 }
 0x29d   :  { %v2190_v16 = vsel %vm4480_vm11, %v2189_v0, %v2188_v53  ;;  %v2417_v41 = vsel %vm1138_vm6, %v2416_v3, %v2415_v18 }
 0x29e   :  { %v2192_v32 = vadd.f32 %v2190_v16, %v2182_v25  ;;  %v2435_v15 = vpop.permute.xlu1 %2434  ;;  %v2425_v11 = vpop.permute.xlu0 %2424  ;;  %v2419_v26 = vadd.f32 %v2417_v41, %v2409_v63 }
 0x29f   :  { %v2436_v54 = vrot.slane %v2435_v15, 6  ;;  %v2426_v46 = vrot.slane %v2425_v11, 6 }
 0x2a0   :  { %v2193_v8 = vadd.f32 %v2192_v32, %v1946_v40 }
 0x2a1   :  { %v2427_v20 = vsel %vm1179_vm12, %v2426_v46, %v2425_v11  ;;  %v2437_v6 = vsel %vm4481_vm8, %v2436_v54, %v2435_v15 }
 0x2a2   :  { %v2429_v39 = vadd.f32 %v2427_v20, %v2419_v26 }
 0x2a4   :  { %v2439_v4 = vadd.f32 %v2437_v6, %v2429_v39 }
 0x2a6   :  { %v2440_v28 = vadd.f32 %v2439_v4, %v2193_v8 }
 0x2a8   :  { %v2441_v52 = vmax.f32 %v2440_v28, 0.0 }
 0x2aa   :  { %2443 = vrot.lane.b32.xlu0 %v2441_v52, %s2758_s4 }
 0x31c   :  { %v2444_v56 = vpop.permute.xlu0 %2443 }
 0x31d   :  { %v2445_v51 = vrot.slane %v2444_v56, 2 }
 0x31f   :  { %v2447_v23 = vsel %vm2446_vm4, %v2444_v56, %v2445_v51 }
 0x320   :  { %2449 = vst [vmem:[%s4262_s5] sm:$0x3f] %v2447_v23 }
 0x321   :  { %2454 = vsyncpa [#allocation5], 1 }
 0x322   :  { %2455 = vsyncpa [#allocation7], 1 }

</bundles_post_ra>
